<compile_context>
chip_gen: v7x
topology: tpu7x:2x2x1
jax: 0.10.0
libtpu: 0.0.40
codegen_flags: <defaults>
</compile_context>

<pallas_src>
import functools

import jax
import jax.numpy as jnp
from jax.experimental import pallas as pl
from jax.experimental.pallas import tpu as pltpu

_LANE_CHUNK = 256   # in-kernel batch-chunk width (lanes); multiple of 128


def _round_up(v, m):
    return ((v + m - 1) // m) * m


def _tetrad_kernel(*refs, num_rest, chunk, compute_dtype):
    """Transposed-layout kernel (batch on the 128-lane axis).

    refs = (x, w_first_t, b_first, [wh_rest_t, bh_rest,] w_out_t, b_out, out)
      x:[TB,4]  w_first_t:[F,4]  b_first:[F,1]  wh_rest_t:[R,F,F]  bh_rest:[R,F,1]
      w_out_t:[16,F]  b_out:[16,1]  out:[TB,16]
    """
    if num_rest > 0:
        x_ref, wf_ref, bf_ref, whr_ref, bhr_ref, wo_ref, bo_ref, o_ref = refs
    else:
        x_ref, wf_ref, bf_ref, wo_ref, bo_ref, o_ref = refs

    tb = x_ref.shape[0]
    # Static chunk loop: offsets are compile-time constants (free slices); chunk count
    # is small by construction (TB is at most a few * chunk).
    for c in range(tb // chunk):
        xc = x_ref[pl.ds(c * chunk, chunk), :].astype(compute_dtype)        # (C, 4)
        # Fused (layer1 + hidden[0]): h^T = cos(Wf' x^T + bf') via a transposed-RHS
        # matmul (contract last dims) -> no explicit transpose of x is needed.
        h = jax.lax.dot_general(wf_ref[...], xc, (((1,), (1,)), ((), ())),
                                preferred_element_type=jnp.float32)          # (F, C)
        h = jnp.cos(h + bf_ref[...])          # bias + cos in f32 (v5e EUP has no bf16)

        if num_rest > 0:
            if num_rest <= 4:
                # Short chain: full static unroll keeps the LLO scheduler window open.
                for i in range(num_rest):
                    z = jnp.dot(whr_ref[i], h.astype(compute_dtype),
                                preferred_element_type=jnp.float32)
                    h = jnp.cos(z + bhr_ref[i])
            else:
                # Deep chain: bounded code size; dynamic first-axis ref indexing is free.
                def body(i, h):
                    z = jnp.dot(whr_ref[i], h.astype(compute_dtype),
                                preferred_element_type=jnp.float32)
                    return jnp.cos(z + bhr_ref[i])
                h = jax.lax.fori_loop(0, num_rest, body, h, unroll=2)

        out_t = jnp.dot(wo_ref[...], h.astype(compute_dtype),
                        preferred_element_type=jnp.float32)                  # (16, C)
        out_t = out_t + bo_ref[...]
        # Tiny (16,C)->(C,16) transpose rides the otherwise-idle XLU; storing (TB,16)
        # blocks of a [B,16] output eliminates the wrapper-side output transpose.
        o_ref[pl.ds(c * chunk, chunk), :] = out_t.T.astype(o_ref.dtype)


def _tetrad_kernel_linear(x_ref, w_ref, b_ref, o_ref, *, chunk, compute_dtype):
    """num_layers == 0: the whole network is one affine map (no activation anywhere)."""
    tb = x_ref.shape[0]
    for c in range(tb // chunk):
        xc = x_ref[pl.ds(c * chunk, chunk), :].astype(compute_dtype)         # (C, 4)
        out_t = jax.lax.dot_general(w_ref[...], xc, (((1,), (1,)), ((), ())),
                                    preferred_element_type=jnp.float32)      # (16, C)
        out_t = out_t + b_ref[...]
        o_ref[pl.ds(c * chunk, chunk), :] = out_t.T.astype(o_ref.dtype)


def tetrad_forward(x, params, *, num_layers, block_b=1024, compute_dtype=jnp.float32):
    """x: [B, 4] float32 -> [B, 4, 4] float32 (matches the torch module's forward).

    compute_dtype=jnp.bfloat16 is recommended on v6e/v7x (native bf16 MXU, f32 accum);
    the f32 default matches the torch module bit-for-bit up to sum reordering.
    """
    w1, b1, wh, bh, wo, bo = params        # weights stored [in, out]; biases [1, out]
    F = w1.shape[1]
    B = x.shape[0]

    # ---- batch tiling ---------------------------------------------------------------
    chunk = _LANE_CHUNK
    TB = max(chunk, _round_up(block_b, chunk))
    if B > chunk:
        # Cap the tile so large-enough batches always give >=2 grid tiles ("parallel"
        # axis shards across both TensorCores on v7x).
        TB = min(TB, _round_up(pl.cdiv(B, 2), chunk))
    num_tiles = pl.cdiv(B, TB)
    B_pad = num_tiles * TB          # only for the cost estimate; no actual padding made

    # ---- fold / transpose weights (stored [in,out] -> kernel wants [out,in]) ---------
    if num_layers == 0:
        w_full = (w1 @ wo).T.astype(compute_dtype)          # [16, 4]
        b_full = (b1 @ wo + bo).T                           # [16, 1]  (f32)
        operands = [w_full, b_full]
        weight_specs = [pl.BlockSpec((16, 4), lambda i: (0, 0)),
                        pl.BlockSpec((16, 1), lambda i: (0, 0))]
        kernel = functools.partial(_tetrad_kernel_linear, chunk=chunk,
                                   compute_dtype=compute_dtype)
        flops_per_row = 2 * 4 * 16
        trans_per_row = 0
    else:
        num_rest = num_layers - 1
        # Fuse layer1 into the first hidden layer (no activation between them).
        wf = (w1 @ wh[0]).T.astype(compute_dtype)           # [F, 4]
        bf = (b1 @ wh[0] + bh[0]).T                         # [F, 1]  (keep f32)
        operands = [wf, bf]
        weight_specs = [pl.BlockSpec((F, 4), lambda i: (0, 0)),
                        pl.BlockSpec((F, 1), lambda i: (0, 0))]
        if num_rest > 0:
            whr = jnp.swapaxes(wh[1:], 1, 2).astype(compute_dtype)   # [R, F, F]
            bhr = jnp.swapaxes(bh[1:], 1, 2)                         # [R, F, 1]
            operands += [whr, bhr]
            weight_specs += [pl.BlockSpec((num_rest, F, F), lambda i: (0, 0, 0)),
                             pl.BlockSpec((num_rest, F, 1), lambda i: (0, 0, 0))]
        wo_t = wo.T.astype(compute_dtype)                   # [16, F]
        bo_t = bo.T                                         # [16, 1]
        operands += [wo_t, bo_t]
        weight_specs += [pl.BlockSpec((16, F), lambda i: (0, 0)),
                         pl.BlockSpec((16, 1), lambda i: (0, 0))]
        kernel = functools.partial(_tetrad_kernel, num_rest=num_rest, chunk=chunk,
                                   compute_dtype=compute_dtype)
        flops_per_row = 2 * (4 * F + num_rest * F * F + F * 16)
        trans_per_row = F * num_layers

    # ---- VMEM budget: resident weight stack + double-buffered x/out tiles ------------
    # Constant-index weight blocks are fetched once and stay resident across the grid.
    # TODO(synk): for very large F (num_rest*F*F*itemsize > ~1/2 of v7x's 64 MiB VMEM)
    # the hidden-weight stack should be streamed layer-by-layer instead of kept resident.
    w_bytes = sum(int(a.size) * a.dtype.itemsize for a in operands)
    tile_bytes = TB * 4 * x.dtype.itemsize + TB * 16 * 4
    vmem_limit = int(min(64 << 20, max(32 << 20, 2 * w_bytes + 2 * tile_bytes + (8 << 20))))

    cost = pl.CostEstimate(
        flops=int(flops_per_row) * B_pad,
        transcendentals=int(trans_per_row) * B_pad,
        bytes_accessed=w_bytes + B * 4 * int(x.dtype.itemsize) + B * 16 * 4,
    )

    out = pl.pallas_call(
        kernel,
        out_shape=jax.ShapeDtypeStruct((B, 16), jnp.float32),
        grid_spec=pltpu.PrefetchScalarGridSpec(
            num_scalar_prefetch=0,
            grid=(num_tiles,),
            in_specs=[pl.BlockSpec((TB, 4), lambda i: (i, 0))] + weight_specs,
            out_specs=pl.BlockSpec((TB, 16), lambda i: (i, 0)),
        ),
        compiler_params=pltpu.CompilerParams(
            # Batch tiles are independent -> shards across both TensorCores on v7x.
            dimension_semantics=("parallel",),
            vmem_limit_bytes=vmem_limit,
        ),
        cost_estimate=cost,
    )(x, *operands)

    return out.reshape(-1, 4, 4)     # contiguous [B,16]->[B,4,4]: free, no data movement


def init_params(key, num_layers, feature_size):
    """Xavier-uniform weights, zero biases (matches _init_weights); weights stored [in, out]."""
    def xavier(key, fan_in, fan_out, shape):
        bound = jnp.sqrt(6.0 / (fan_in + fan_out))
        return jax.random.uniform(key, shape, jnp.float32, -bound, bound)

    k1, k2, k3 = jax.random.split(key, 3)
    w1 = xavier(k1, 4, feature_size, (4, feature_size))
    b1 = jnp.zeros((1, feature_size), jnp.float32)

    if num_layers > 0:
        hk = jax.random.split(k2, num_layers)
        wh = jnp.stack([
            xavier(hk[i], feature_size, feature_size, (feature_size, feature_size))
            for i in range(num_layers)
        ])
    else:
        wh = jnp.zeros((0, feature_size, feature_size), jnp.float32)
    bh = jnp.zeros((num_layers, 1, feature_size), jnp.float32)

    wo = xavier(k3, feature_size, 16, (feature_size, 16))
    bo = jnp.zeros((1, 16), jnp.float32)
    return w1, b1, wh, bh, wo, bo


def reference_forward(x, params, num_layers):
    """Pure-JAX reference, identical math to the PyTorch module (f32)."""
    w1, b1, wh, bh, wo, bo = params
    h = x @ w1 + b1
    for i in range(num_layers):
        h = jnp.cos(h @ wh[i] + bh[i])
    out = h @ wo + bo
    return out.reshape(-1, 4, 4)


if __name__ == "__main__":
    num_layers = 3
    feature_size = 32
    batch = 300   # not a multiple of the tile -> exercises the masked partial block

    key = jax.random.PRNGKey(0)
    kx, kp = jax.random.split(key)
    x = jax.random.normal(kx, (batch, 4), jnp.float32)
    params = init_params(kp, num_layers, feature_size)
    y_ref = reference_forward(x, params, num_layers)

    # f32 compute path (tight match to the torch math; layer1 fusion only reorders sums).
    y = tetrad_forward(x, params, num_layers=num_layers, compute_dtype=jnp.float32)
    jax.block_until_ready(y)
    assert y.shape == (batch, 4, 4), y.shape
    assert jnp.allclose(y, y_ref, atol=1e-4, rtol=1e-4), "f32 kernel mismatch vs reference"

    # Larger batch exercises the multi-chunk in-kernel loop and a multi-tile grid.
    xb = jax.random.normal(kx, (2048, 4), jnp.float32)
    yb = tetrad_forward(xb, params, num_layers=num_layers, block_b=1024)
    jax.block_until_ready(yb)
    assert yb.shape == (2048, 4, 4)
    assert jnp.allclose(yb, reference_forward(xb, params, num_layers),
                        atol=1e-4, rtol=1e-4), "multi-chunk kernel mismatch vs reference"

    # bf16 weights/activations with f32 accumulation (halves weight HBM/VMEM traffic,
    # uses native bf16 MXU throughput on v6e/v7x); loose tolerance vs the f32 reference.
    # Note: x is also cast to bf16 before the first matmul (input quantization).
    y_bf16 = tetrad_forward(x, params, num_layers=num_layers, compute_dtype=jnp.bfloat16)
    jax.block_until_ready(y_bf16)
    assert y_bf16.shape == (batch, 4, 4)
    assert bool(jnp.all(jnp.isfinite(y_bf16)))
    assert float(jnp.max(jnp.abs(y_bf16 - y_ref))) < 0.5, "bf16 kernel far from f32 reference"

    # Edge cases: num_layers == 0 and == 1 (no zero-sized operands reach pallas_call).
    for nl in (0, 1):
        p_nl = init_params(kp, nl, feature_size)
        y_nl = tetrad_forward(x, p_nl, num_layers=nl)
        jax.block_until_ready(y_nl)
        assert jnp.allclose(y_nl, reference_forward(x, p_nl, nl),
                            atol=1e-4, rtol=1e-4), f"mismatch at num_layers={nl}"

    print("KERNEL_OK")
</pallas_src>

<mosaic_0001>
module attributes {stable_mosaic.version = 11 : i64} {
  func.func @_tetrad_kernel(%arg0: i32, %arg1: memref<256x4xf32, #tpu.memory_space<vmem>>, %arg2: memref<32x4xf32, #tpu.memory_space<vmem>>, %arg3: memref<32x1xf32, #tpu.memory_space<vmem>>, %arg4: memref<2x32x32xf32, #tpu.memory_space<vmem>>, %arg5: memref<2x32x1xf32, #tpu.memory_space<vmem>>, %arg6: memref<16x32xf32, #tpu.memory_space<vmem>>, %arg7: memref<16x1xf32, #tpu.memory_space<vmem>>, %arg8: memref<256x16xf32, #tpu.memory_space<vmem>>) attributes {dimension_semantics = [#tpu.dimension_semantics<parallel>], iteration_bounds = array<i64: 2>, scalar_prefetch = 0 : i64, scratch_operands = 0 : i64, tpu.core_type = #tpu.core_type<tc>, window_params = [{transform_indices = @transform_0, window_bounds = array<i64: 256, 4>}, {pipeline_mode = #tpu.pipeline_mode<synchronous>, transform_indices = @transform_1, window_bounds = array<i64: 32, 4>}, {pipeline_mode = #tpu.pipeline_mode<synchronous>, transform_indices = @transform_2, window_bounds = array<i64: 32, 1>}, {pipeline_mode = #tpu.pipeline_mode<synchronous>, transform_indices = @transform_3, window_bounds = array<i64: 2, 32, 32>}, {pipeline_mode = #tpu.pipeline_mode<synchronous>, transform_indices = @transform_4, window_bounds = array<i64: 2, 32, 1>}, {pipeline_mode = #tpu.pipeline_mode<synchronous>, transform_indices = @transform_5, window_bounds = array<i64: 16, 32>}, {pipeline_mode = #tpu.pipeline_mode<synchronous>, transform_indices = @transform_6, window_bounds = array<i64: 16, 1>}, {transform_indices = @transform_7, window_bounds = array<i64: 256, 16>}]} {
    %c0 = arith.constant 0 : index
    %c0_0 = arith.constant 0 : index
    %0 = vector.load %arg1[%c0, %c0_0] : memref<256x4xf32, #tpu.memory_space<vmem>>, vector<256x4xf32>
    %c0_1 = arith.constant 0 : index
    %c0_2 = arith.constant 0 : index
    %1 = vector.load %arg2[%c0_1, %c0_2] : memref<32x4xf32, #tpu.memory_space<vmem>>, vector<32x4xf32>
    %cst = arith.constant dense<0.000000e+00> : vector<32x256xf32>
    %2 = tpu.matmul %1, %0, %cst {dimension_numbers = #tpu.dot_dimension_numbers<[1], [1], [0], [0], [0, 0, 1, 0], [], []>} : vector<32x4xf32>, vector<256x4xf32>, vector<32x256xf32> -> vector<32x256xf32>
    %c0_3 = arith.constant 0 : index
    %c0_4 = arith.constant 0 : index
    %3 = vector.load %arg3[%c0_3, %c0_4] : memref<32x1xf32, #tpu.memory_space<vmem>>, vector<32x1xf32>
    %4 = vector.broadcast %3 : vector<32x1xf32> to vector<32x256xf32>
    %5 = arith.addf %2, %4 : vector<32x256xf32>
    %6 = math.cos %5 : vector<32x256xf32>
    %c0_5 = arith.constant 0 : index
    %c0_6 = arith.constant 0 : index
    %c0_7 = arith.constant 0 : index
    %7 = vector.load %arg4[%c0_5, %c0_6, %c0_7] : memref<2x32x32xf32, #tpu.memory_space<vmem>>, vector<1x32x32xf32>
    %8 = vector.shape_cast %7 : vector<1x32x32xf32> to vector<32x32xf32>
    %cst_8 = arith.constant dense<0.000000e+00> : vector<32x256xf32>
    %9 = tpu.matmul %8, %6, %cst_8 {dimension_numbers = #tpu.dot_dimension_numbers<[1], [0], [0], [1], [0, 0, 1, 1], [], []>} : vector<32x32xf32>, vector<32x256xf32>, vector<32x256xf32> -> vector<32x256xf32>
    %c0_9 = arith.constant 0 : index
    %c0_10 = arith.constant 0 : index
    %c0_11 = arith.constant 0 : index
    %10 = vector.load %arg5[%c0_9, %c0_10, %c0_11] : memref<2x32x1xf32, #tpu.memory_space<vmem>>, vector<1x32x1xf32>
    %11 = vector.shape_cast %10 : vector<1x32x1xf32> to vector<32x1xf32>
    %12 = vector.broadcast %11 : vector<32x1xf32> to vector<32x256xf32>
    %13 = arith.addf %9, %12 : vector<32x256xf32>
    %14 = math.cos %13 : vector<32x256xf32>
    %c1 = arith.constant 1 : index
    %c0_12 = arith.constant 0 : index
    %c0_13 = arith.constant 0 : index
    %15 = vector.load %arg4[%c1, %c0_12, %c0_13] : memref<2x32x32xf32, #tpu.memory_space<vmem>>, vector<1x32x32xf32>
    %16 = vector.shape_cast %15 : vector<1x32x32xf32> to vector<32x32xf32>
    %cst_14 = arith.constant dense<0.000000e+00> : vector<32x256xf32>
    %17 = tpu.matmul %16, %14, %cst_14 {dimension_numbers = #tpu.dot_dimension_numbers<[1], [0], [0], [1], [0, 0, 1, 1], [], []>} : vector<32x32xf32>, vector<32x256xf32>, vector<32x256xf32> -> vector<32x256xf32>
    %c1_15 = arith.constant 1 : index
    %c0_16 = arith.constant 0 : index
    %c0_17 = arith.constant 0 : index
    %18 = vector.load %arg5[%c1_15, %c0_16, %c0_17] : memref<2x32x1xf32, #tpu.memory_space<vmem>>, vector<1x32x1xf32>
    %19 = vector.shape_cast %18 : vector<1x32x1xf32> to vector<32x1xf32>
    %20 = vector.broadcast %19 : vector<32x1xf32> to vector<32x256xf32>
    %21 = arith.addf %17, %20 : vector<32x256xf32>
    %22 = math.cos %21 : vector<32x256xf32>
    %c0_18 = arith.constant 0 : index
    %c0_19 = arith.constant 0 : index
    %23 = vector.load %arg6[%c0_18, %c0_19] : memref<16x32xf32, #tpu.memory_space<vmem>>, vector<16x32xf32>
    %cst_20 = arith.constant dense<0.000000e+00> : vector<16x256xf32>
    %24 = tpu.matmul %23, %22, %cst_20 {dimension_numbers = #tpu.dot_dimension_numbers<[1], [0], [0], [1], [0, 0, 1, 1], [], []>} : vector<16x32xf32>, vector<32x256xf32>, vector<16x256xf32> -> vector<16x256xf32>
    %c0_21 = arith.constant 0 : index
    %c0_22 = arith.constant 0 : index
    %25 = vector.load %arg7[%c0_21, %c0_22] : memref<16x1xf32, #tpu.memory_space<vmem>>, vector<16x1xf32>
    %26 = vector.broadcast %25 : vector<16x1xf32> to vector<16x256xf32>
    %27 = arith.addf %24, %26 : vector<16x256xf32>
    %28 = tpu.transpose %27, [1, 0] : vector<16x256xf32> -> vector<256x16xf32>
    %c0_23 = arith.constant 0 : index
    %c0_24 = arith.constant 0 : index
    %29 = vector.load %arg8[%c0_23, %c0_24] : memref<256x16xf32, #tpu.memory_space<vmem>>, vector<256x16xf32>
    tpu.vector_store %arg8[%c0_23, %c0_24], %28 {strides = array<i32>} : memref<256x16xf32, #tpu.memory_space<vmem>>, vector<256x16xf32>,
    return
  }
  func.func @transform_0(%arg0: i32) -> (i32, i32) {
    %c0_i32 = arith.constant 0 : i32
    %c0_i32_0 = arith.constant 0 : i32
    return %arg0, %c0_i32 : i32, i32
  }
  func.func @transform_1(%arg0: i32) -> (i32, i32) {
    %c0_i32 = arith.constant 0 : i32
    %c0_i32_0 = arith.constant 0 : i32
    %c0_i32_1 = arith.constant 0 : i32
    return %c0_i32, %c0_i32_0 : i32, i32
  }
  func.func @transform_2(%arg0: i32) -> (i32, i32) {
    %c0_i32 = arith.constant 0 : i32
    %c0_i32_0 = arith.constant 0 : i32
    %c0_i32_1 = arith.constant 0 : i32
    return %c0_i32, %c0_i32_0 : i32, i32
  }
  func.func @transform_3(%arg0: i32) -> (i32, i32, i32) {
    %c0_i32 = arith.constant 0 : i32
    %c0_i32_0 = arith.constant 0 : i32
    %c0_i32_1 = arith.constant 0 : i32
    %c0_i32_2 = arith.constant 0 : i32
    return %c0_i32, %c0_i32_0, %c0_i32_1 : i32, i32, i32
  }
  func.func @transform_4(%arg0: i32) -> (i32, i32, i32) {
    %c0_i32 = arith.constant 0 : i32
    %c0_i32_0 = arith.constant 0 : i32
    %c0_i32_1 = arith.constant 0 : i32
    %c0_i32_2 = arith.constant 0 : i32
    return %c0_i32, %c0_i32_0, %c0_i32_1 : i32, i32, i32
  }
  func.func @transform_5(%arg0: i32) -> (i32, i32) {
    %c0_i32 = arith.constant 0 : i32
    %c0_i32_0 = arith.constant 0 : i32
    %c0_i32_1 = arith.constant 0 : i32
    return %c0_i32, %c0_i32_0 : i32, i32
  }
  func.func @transform_6(%arg0: i32) -> (i32, i32) {
    %c0_i32 = arith.constant 0 : i32
    %c0_i32_0 = arith.constant 0 : i32
    %c0_i32_1 = arith.constant 0 : i32
    return %c0_i32, %c0_i32_0 : i32, i32
  }
  func.func @transform_7(%arg0: i32) -> (i32, i32) {
    %c0_i32 = arith.constant 0 : i32
    %c0_i32_0 = arith.constant 0 : i32
    return %arg0, %c0_i32 : i32, i32
  }
}

</mosaic_0001>

<bundles_post_ra>
// kernel: tpu_custom_call.1
= control target key start
LH: loop header
LB: loop body
LE: loop exit
PB: predicated region body
PF: predicated region fallthrough
CT: control target
= control target key end

     0   :  { %s4539_s24 = smov 0   ;;  %s4541_s25 = smov 0   ;;  %s7162_s0 = inlined_call_operand.vmem [shape: f32[300,4], index: 0, kind: input, shape index: {}]   ;;  %s7163_s1 = inlined_call_operand.vmem [shape: f32[32,4], index: 1, kind: input, shape index: {}]   ;;  %s7164_s2 = inlined_call_operand.vmem [shape: f32[32,1], index: 2, kind: input, shape index: {}]   ;;  %s7165_s3 = inlined_call_operand.vmem [shape: f32[2,32,32], index: 3, kind: input, shape index: {}]   ;;  %s7166_s4 = inlined_call_operand.vmem [shape: f32[2,32,1], index: 4, kind: input, shape index: {}]   ;;  %s7167_s5 = inlined_call_operand.vmem [shape: f32[16,32], index: 5, kind: input, shape index: {}]   ;;  %s7168_s6 = inlined_call_operand.vmem [shape: f32[16,1], index: 6, kind: input, shape index: {}]   ;;  %s7169_s7 = inlined_call_operand.vmem [shape: f32[300,16], index: 7, kind: output, shape index: {}]  }
   0x1   :  { %s4543_s26 = smov 0  }
   0x2 LB: > { %s4552_s27 = sadd.s32 4294967295, %s4457_s26   ;;  %s4554_s28 = sadd.s32 1, %s4457_s26   ;;  %s4457_s26 = sphi %s4543_s26, %s7350_s26   ;;  %s4453_s25 = sphi %s4541_s25, %s7349_s25   ;;  %s4449_s24 = sphi %s4539_s24, %s7348_s24  }
   0x3   : > { %s173_s29 = ssub.s32 %s4457_s26, %s4554_s28  ;;  %s176_s30 = sadd.s32 1, %s4453_s25 }
   0x4   : > { %p174_p0 = scmp.eq.s32.totalorder %s173_s29, 0  ;;  %p186_p1 = scmp.ne.s32.totalorder %s4453_s25, %s4449_s24 }
   0x5   : > { %p187_p2 = scmp.eq.s32.totalorder %s4552_s27, 1  ;;  %p3827_p3 = scmp.ge.s32.totalorder %s4457_s26, 1 }
   0x6   : > { %s4562_s8 = scalar_select %p174_p0, %s4453_s25, %s176_s30  }
   0x7   : > { %p4564_p4 = por %p187_p2, %p186_p1  ;;  %p246_p5 = scmp.lt.s32.totalorder %s4457_s26, 3 }
   0x9   : > { %p247_p6 = pnand %p3827_p3, %p246_p5 }
   0xb   : > { %250 = sbr.rel (%p247_p6) target bundleno = 1847 (0x737), region = 48 }
  0x12   : > { %s4569_s10 = sshll.u32 %s4552_s27, 5  ;;  %vm360_vm0 = vcmask 31744   ;;  %v4574_v0 = vld [vmem:[%s7163_s1] sm:$0xff]  ;;  %v4491_v1 = vmov 0   ;;  %v338_v3 = vld [vmem:[%s7164_s2 + $0x10] sm:$0xff]  ;;  %v337_v4 = vld [vmem:[%s7164_s2 + $0x8] sm:$0xff] }
  0x13   : > { %p286_p7 = scmp.lt.s32.totalorder %s4569_s10, 37  ;;  %4033 = vmatprep.mubr.msk.f32.mxu0 %vm360_vm0, %v4574_v0  ;;  %4305 = vset.pattern.permute.xlu0 %v4491_v1  ;;  %v336_v2 = vld [vmem:[%s7164_s2] sm:$0xff]  ;;  %v339_v5 = vld [vmem:[%s7164_s2 + $0x18] sm:$0xff]  ;;  %vm4599_vm1 = vmpackc.low %vm360_vm0, %vm360_vm0  ;;  %s278_s26 = sand.u32 1, %s4449_s24  }
  0x14   : > { %342 = vperm.xlu0 %4305, %v336_v2   ;;  %4306 = vset.pattern.permute.xlu1 %v4491_v1  ;;  %v1386_v7 = vld [vmem:[%s7166_s4] sm:$0xff]  ;;  %v1387_v8 = vld [vmem:[%s7166_s4 + $0x8] sm:$0xff]  ;;  %v1388_v18 = vld [vmem:[%s7166_s4 + $0x10] sm:$0xff]  ;;  %s3828_s30 = sshll.u32 %s278_s26, 8  ;;  %s3493_s24 = ssub.s32 (%p4564_p4), 38, %s4569_s10 }
  0x15   : > { %s287_s17 = scalar_select %p286_p7, %s4569_s10, 37  ;;  %352 = vperm.xlu1 %4306, %v338_v3   ;;  %v1389_v21 = vld [vmem:[%s7166_s4 + $0x18] sm:$0xff]  ;;  %v3939_v25 = vld [vmem:[%s7166_s4 + $0x20] sm:$0xff]  ;;  %v3940_v27 = vld [vmem:[%s7166_s4 + $0x28] sm:$0xff] }
  0x16   : > { %v3941_v28 = vld [vmem:[%s7166_s4 + $0x30] sm:$0xff]  ;;  %v3942_v31 = vld [vmem:[%s7166_s4 + $0x38] sm:$0xff]  ;;  %v3293_v35 = vld [vmem:[%s7168_s6] sm:$0xff]  ;;  %s6957_s11 = scalar_lea.vmem [#allocation2], %s3828_s30   ;;  %s3998_s12 = sshll.u32 (%p4564_p4), %s4552_s27, 8 }
  0x17   : > { %s3830_s22 = sshll.u32 %s287_s17, 3  ;;  %v3294_v37 = vld [vmem:[%s7168_s6 + $0x8] sm:$0xff]  ;;  %v334_v3 = vld [vmem:[%s7163_s1 + $0x10] sm:$0xff]  ;;  %p3494_p8 = scmp.lt.s32.totalorder (%p4564_p4), %s3493_s24, 32 }
  0x18   : > { %s4595_s29 = scalar_lea.vmem %s7162_s0, %s3830_s22  ;;  %347 = vperm.xlu0 %4305, %v337_v4   ;;  %v333_v2 = vld [vmem:[%s7163_s1 + $0x8] sm:$0xff]  ;;  %v335_v4 = vld [vmem:[%s7163_s1 + $0x18] sm:$0xff]  ;;  %s7030_s15 = scalar_lea.vmem (%p4564_p4), %s7169_s7, %s3998_s12  }
  0x19   : > { %v316_v9 = vld [vmem:[%s4595_s29 + $0x80] sm:$0xff]  ;;  %v317_v10 = vld [vmem:[%s4595_s29 + $0x88] sm:$0xff]  ;;  %357 = vperm.xlu1 %4306, %v339_v5   ;;  %v318_v14 = vld [vmem:[%s4595_s29 + $0x90] sm:$0xff] }
  0x1a   : > { %v300_v11 = vld [vmem:[%s4595_s29] sm:$0xff]  ;;  %v4041_v12 = vpack.c.bf16 %v317_v10, %v316_v9  ;;  %v301_v13 = vld [vmem:[%s4595_s29 + $0x8] sm:$0xff]  ;;  %v319_v15 = vld [vmem:[%s4595_s29 + $0x98] sm:$0xff] }
  0x1b   : > { %v4044_v16 = vpack.c.bf16 %v301_v13, %v300_v11  ;;  %v4047_v17 = vpack.c.bf16 %v319_v15, %v318_v14  ;;  %v302_v19 = vld [vmem:[%s4595_s29 + $0x10] sm:$0xff]  ;;  %v303_v20 = vld [vmem:[%s4595_s29 + $0x18] sm:$0xff]  ;;  %v320_v22 = vld [vmem:[%s4595_s29 + $0xa0] sm:$0xff] }
  0x1c   : > { %4043 = vmatprep.subr.msk.bf16.mxu0 %vm4599_vm1, %v4041_v12  ;;  %1392 = vperm.xlu0 %4305, %v1386_v7   ;;  %v321_v23 = vld [vmem:[%s4595_s29 + $0xa8] sm:$0xff]  ;;  %v4050_v24 = vpack.c.bf16 %v303_v20, %v302_v19  ;;  %v304_v29 = vld [vmem:[%s4595_s29 + $0x20] sm:$0xff]  ;;  %v322_v32 = vld [vmem:[%s4595_s29 + $0xb0] sm:$0xff] }
  0x1d   : > { %4046 = vmatpush3.bf16.xpose.msk.msra.mxu0 %vm4599_vm1, %v4044_v16  ;;  %1397 = vperm.xlu1 %4306, %v1387_v8   ;;  %v4053_v26 = vpack.c.bf16 %v321_v23, %v320_v22  ;;  %v305_v30 = vld [vmem:[%s4595_s29 + $0x28] sm:$0xff]  ;;  %v323_v33 = vld [vmem:[%s4595_s29 + $0xb8] sm:$0xff]  ;;  %v306_v38 = vld [vmem:[%s4595_s29 + $0x30] sm:$0xff] }
  0x1e   : > { %4049 = vmatprep.subr.msk.bf16.mxu0 %vm4599_vm1, %v4047_v17  ;;  %v4056_v34 = vpack.c.bf16 %v305_v30, %v304_v29  ;;  %v4059_v36 = vpack.c.bf16 %v323_v33, %v322_v32  ;;  %v307_v39 = vld [vmem:[%s4595_s29 + $0x38] sm:$0xff]  ;;  %v324_v40 = vld [vmem:[%s4595_s29 + $0xc0] sm:$0xff]  ;;  %v325_v41 = vld [vmem:[%s4595_s29 + $0xc8] sm:$0xff]  ;;  %v7178_v30 = vmov 2475754826  }
  0x1f   : > { %v4062_v42 = vpack.c.bf16 %v307_v39, %v306_v38  ;;  %v4065_v43 = vpack.c.bf16 %v325_v41, %v324_v40  ;;  %v308_v44 = vld [vmem:[%s4595_s29 + $0x40] sm:$0xff]  ;;  %v309_v45 = vld [vmem:[%s4595_s29 + $0x48] sm:$0xff]  ;;  %v326_v46 = vld [vmem:[%s4595_s29 + $0xd0] sm:$0xff]  ;;  %v7180_v40 = vmov 920167782  }
  0x20   : > { %1402 = vperm.xlu0 %4305, %v1388_v18   ;;  %v327_v47 = vld [vmem:[%s4595_s29 + $0xd8] sm:$0xff]  ;;  %v4068_v48 = vpack.c.bf16 %v309_v45, %v308_v44  ;;  %v310_v50 = vld [vmem:[%s4595_s29 + $0x50] sm:$0xff]  ;;  %v328_v52 = vld [vmem:[%s4595_s29 + $0xe0] sm:$0xff] }
  0x21   : > { %1407 = vperm.xlu1 %4306, %v1389_v21   ;;  %v4071_v49 = vpack.c.bf16 %v327_v47, %v326_v46  ;;  %v311_v51 = vld [vmem:[%s4595_s29 + $0x58] sm:$0xff]  ;;  %v329_v53 = vld [vmem:[%s4595_s29 + $0xe8] sm:$0xff]  ;;  %v312_v56 = vld [vmem:[%s4595_s29 + $0x60] sm:$0xff] }
  0x22   : > { %v4074_v54 = vpack.c.bf16 %v311_v51, %v310_v50  ;;  %v4077_v55 = vpack.c.bf16 %v329_v53, %v328_v52  ;;  %v313_v57 = vld [vmem:[%s4595_s29 + $0x68] sm:$0xff]  ;;  %v330_v58 = vld [vmem:[%s4595_s29 + $0xf0] sm:$0xff]  ;;  %v331_v59 = vld [vmem:[%s4595_s29 + $0xf8] sm:$0xff] }
  0x23   : > { %v4080_v60 = vpack.c.bf16 %v313_v57, %v312_v56  ;;  %v4083_v61 = vpack.c.bf16 %v331_v59, %v330_v58  ;;  %v314_v62 = vld [vmem:[%s4595_s29 + $0x70] sm:$0xff]  ;;  %v315_v63 = vld [vmem:[%s4595_s29 + $0x78] sm:$0xff] }
  0x24   : > { %2348 = vperm.xlu0 %4305, %v3939_v25   ;;  %v4086_v1 = vpack.c.bf16 %v315_v63, %v314_v62 }
  0x25   : > { %4052 = vmatpush3.bf16.xpose.msk.msra.mxu0 %vm4599_vm1, %v4050_v24  ;;  %2353 = vperm.xlu1 %4306, %v3940_v27  }
  0x26   : > { %4055 = vmatprep.subr.msk.bf16.mxu0 %vm4599_vm1, %v4053_v26 }
  0x28   : > { %2358 = vperm.xlu0 %4305, %v3941_v28   ;;  %v7186_v28 = vmov 683565275  }
  0x29   : > { %2363 = vperm.xlu1 %4306, %v3942_v31  }
  0x2c   : > { %3297 = vperm.xlu0 %4305, %v3293_v35  }
  0x2d   : > { %4058 = vmatpush3.bf16.xpose.msk.msra.mxu0 %vm4599_vm1, %v4056_v34  ;;  %3302 = vperm.xlu1 %4306, %v3294_v37   ;;  %v7176_v34 = vmov 2131351028   ;;  %v7184_v37 = vmov 2102212464  }
  0x2e   : > { %4061 = vmatprep.subr.msk.bf16.mxu0 %vm4599_vm1, %v4059_v36 }
  0x35   : > { %4064 = vmatpush3.bf16.xpose.msk.msra.mxu0 %vm4599_vm1, %v4062_v42 }
  0x36   : > { %4067 = vmatprep.subr.msk.bf16.mxu0 %vm4599_vm1, %v4065_v43  ;;  %v7182_v43 = vmov 1326507024  }
  0x3d   : > { %4070 = vmatpush3.bf16.xpose.msk.msra.mxu0 %vm4599_vm1, %v4068_v48 }
  0x3e   : > { %4073 = vmatprep.subr.msk.bf16.mxu0 %vm4599_vm1, %v4071_v49 }
  0x45   : > { %4076 = vmatpush3.bf16.xpose.msk.msra.mxu0 %vm4599_vm1, %v4074_v54 }
  0x46   : > { %4079 = vmatprep.subr.msk.bf16.mxu0 %vm4599_vm1, %v4077_v55 }
  0x4d   : > { %4082 = vmatpush3.bf16.xpose.msk.msra.mxu0 %vm4599_vm1, %v4080_v60 }
  0x4e   : > { %4085 = vmatprep.subr.msk.bf16.mxu0 %vm4599_vm1, %v4083_v61 }
  0x55   : > { %4088 = vmatpush3.bf16.xpose.msk.msra.mxu0 %vm4599_vm1, %v4086_v1 }
  0x5c   : > { %4034 = vmatmul.mubr.msk.f32.vlgmr.msra.gmra.mrb[0].mxu0 %vm360_vm0, %v4574_v0 }
  0x5d   : > { %4035 = vmatprep.mubr.msk.f32.mxu0 %vm360_vm0, %v333_v2 }
  0x60   : > { %4036 = vmatmul.mubr.msk.f32.gmra.mrb[2].mxu0 %vm360_vm0, %v333_v2 }
  0x61   : > { %4037 = vmatprep.mubr.msk.f32.mxu0 %vm360_vm0, %v334_v3 }
  0x64   : > { %4038 = vmatmul.mubr.msk.f32.gmra.mrb[4].mxu0 %vm360_vm0, %v334_v3 }
  0x65   : > { %4039 = vmatprep.mubr.msk.f32.mxu0 %vm360_vm0, %v335_v4 }
  0x68   : > { %4040 = vmatmul.mubr.msk.f32.gmra.mrb[6].mxu0 %vm360_vm0, %v335_v4 }
  0x93   : > { %v4714_v0 = vpop.permute.xlu0 %342 }
  0x97   : > { %v4720_v9 = vpop.permute.xlu0 %347 }
 0x12f   : > { %v535_v5 = vpop.f32.mrb[0].mxu0 }
 0x130   : > { %v4717_v6 = vadd.f32 %v535_v5, %v4714_v0  ;;  %v537_v7 = vpop.f32.mrb[1].mxu0 }
 0x131   : > { %v4758_v61 = vadd.f32 %v537_v7, %v4714_v0 }
 0x132   : > { %7230 = vst [vmem:[#allocation3_spill] sm:$0xff] %v4717_v6  ;;  %v561_v8 = vand.u32 2139095040, %v4717_v6  ;;  %v7172_v19 = vand.u32 2147483647, %v4717_v6 }
 0x133   : > { %v541_v10 = vpop.f32.mrb[2].mxu0  ;;  %7232 = vst [vmem:[#allocation5_spill] sm:$0xff] %v4758_v61 }
 0x134   : > { %v562_v11 = vshrl.u32 %v561_v8, 23  ;;  %v4723_v12 = vadd.f32 %v541_v10, %v4720_v9  ;;  %v4725_v13 = vpop.f32.mrb[3].mxu0  ;;  %v565_v25 = vand.u32 8388607, %v7172_v19  ;;  %v664_v8 = vand.u32 2139095040, %v4758_v61 }
 0x136   : > { %7231 = vst [vmem:[#allocation4_spill] sm:$0xff] %v4723_v12  ;;  %v3867_v14 = vadd.s32 4294967169, %v562_v11  ;;  %v767_v15 = vand.u32 2139095040, %v4723_v12  ;;  %v566_v45 = vor.u32 8388608, %v565_v25 }
 0x137   : > { %v4728_v16 = vpop.f32.mrb[4].mxu0 }
 0x138   : > { %v568_v17 = vadd.s32 1, %v3867_v14  ;;  %v4730_v18 = vpop.f32.mrb[5].mxu0  ;;  %v768_v21 = vshrl.u32 %v767_v15, 23  ;;  %v606_v58 = vshll.u32 %v566_v45, 8 }
 0x13a   : > { %vm569_vm2 = vcmp.gt.s32.totalorder %v568_v17, 0  ;;  %v3875_v32 = vadd.s32 4294967169, %v768_v21 }
 0x13b   : > { %v570_v20 = vsel %vm569_vm2, %v568_v17, 0  ;;  %v4733_v22 = vpop.f32.mrb[6].mxu0  ;;  %v665_v17 = vshrl.u32 %v664_v8, 23 }
 0x13c   : > { %v572_v23 = vand.u32 31, %v570_v20  ;;  %v4735_v24 = vpop.f32.mrb[7].mxu0  ;;  %v571_v27 = vshrl.u32 %v570_v20, 5  ;;  %v774_v55 = vadd.s32 1, %v3875_v32  ;;  %v7170_v20 = vand.u32 2147483647, %v4723_v12 }
 0x13e   : > { %v573_v26 = vsub.s32 32, %v572_v23  ;;  %v575_v29 = vshll.u32 %v7186_v28, %v572_v23  ;;  %v578_v31 = vshll.u32 %v7178_v30, %v572_v23  ;;  %v581_v36 = vshll.u32 %v7176_v34, %v572_v23 }
 0x13f   : > { %v584_v39 = vshll.u32 %v7184_v37, %v572_v23  ;;  %v587_v42 = vshll.u32 %v7180_v40, %v572_v23  ;;  %vm590_vm3 = vcmp.lt.s32.totalorder %v571_v27, 1  ;;  %vm593_vm4 = vcmp.lt.s32.totalorder %v571_v27, 4 }
 0x140   : > { %v576_v33 = vshrl.u32 %v7178_v30, %v573_v26  ;;  %v579_v35 = vshrl.u32 %v7176_v34, %v573_v26  ;;  %v582_v38 = vshrl.u32 %v7184_v37, %v573_v26  ;;  %v585_v41 = vshrl.u32 %v7180_v40, %v573_v26 }
 0x141   : > { %v588_v44 = vshrl.u32 %v7182_v43, %v573_v26  ;;  %vm592_vm5 = vcmp.lt.s32.totalorder %v571_v27, 3  ;;  %vm591_vm6 = vcmp.lt.s32.totalorder %v571_v27, 2  ;;  %vm775_vm7 = vcmp.gt.s32.totalorder %v774_v55, 0 }
 0x142   : > { %v577_v46 = vor.u32 %v576_v33, %v575_v29  ;;  %v580_v47 = vor.u32 %v579_v35, %v578_v31  ;;  %v583_v48 = vor.u32 %v582_v38, %v581_v36  ;;  %v586_v49 = vor.u32 %v585_v41, %v584_v39  ;;  %v353_v38 = vpop.permute.xlu1 %352 }
 0x143   : > { %v589_v50 = vor.u32 %v588_v44, %v587_v42  ;;  %v574_v4 = vshrl.u32 %v7186_v28, %v573_v26  ;;  %v776_v5 = vsel %vm775_vm7, %v774_v55, 0  ;;  %v4824_v8 = vadd.f32 %v4730_v18, %v353_v38 }
 0x144   : > { %v598_v51 = vsel %vm590_vm3, %v577_v46, %v580_v47  ;;  %v602_v52 = vsel %vm590_vm3, %v580_v47, %v583_v48  ;;  %v599_v53 = vsel %vm593_vm4, %v586_v49, 920167782  ;;  %v595_v3 = vsel %vm593_vm4, %v583_v48, 2102212464 }
 0x145   : > { %v603_v54 = vsel %vm593_vm4, %v589_v50, 1326507024  ;;  %v600_v56 = vsel %vm592_vm5, %v583_v48, %v599_v53  ;;  %v778_v10 = vand.u32 31, %v776_v5  ;;  %v594_v11 = vsel %vm590_vm3, %v574_v4, %v577_v46  ;;  %7235 = vst [vmem:[#allocation8_spill] sm:$0xff] %v4824_v8 }
 0x146   : > { %v604_v57 = vsel %vm592_vm5, %v586_v49, %v603_v54  ;;  %v601_v59 = vsel %vm591_vm6, %v598_v51, %v600_v56  ;;  %v596_v0 = vsel %vm592_vm5, %v580_v47, %v595_v3  ;;  %v4777_v21 = vshrl.u32 %v776_v5, 5 }
 0x147   : > { %v605_v60 = vsel %vm591_vm6, %v602_v52, %v604_v57  ;;  %v4763_v1 = vmul.u32.u64.low %v606_v58, %v601_v59  ;;  %v4764_v2 = vmul.u32.u64.high %v606_v58, %v601_v59, %v4763_v1  ;;  %v779_v14 = vsub.s32 32, %v778_v10 }
 0x148   : > { %v4760_v62 = vmul.u32.u64.low %v606_v58, %v605_v60  ;;  %v4761_v63 = vmul.u32.u64.high %v606_v58, %v605_v60, %v4760_v62  ;;  %v597_v15 = vsel %vm591_vm6, %v594_v11, %v596_v0  ;;  %v790_v25 = vshll.u32 %v7184_v37, %v778_v10 }
 0x149   : > { %v616_v7 = vadd.s32 1, %v4764_v2  ;;  %v791_v26 = vshrl.u32 %v7180_v40, %v779_v14  ;;  %v794_v29 = vshrl.u32 %v7182_v43, %v779_v14  ;;  %v782_v31 = vshrl.u32 %v7178_v30, %v779_v14 }
 0x14a   : > { %vm615_vm8 = vc.u32 %v4761_v63, %v4763_v1  ;;  %v785_v32 = vshrl.u32 %v7176_v34, %v779_v14  ;;  %v788_v27 = vshrl.u32 %v7184_v37, %v779_v14  ;;  %v793_v33 = vshll.u32 %v7180_v40, %v778_v10 }
 0x14b   : > { %v617_v23 = vsel %vm615_vm8, %v616_v7, %v4764_v2  ;;  %v613_v35 = vmul.u32 %v606_v58, %v597_v15  ;;  %v792_v36 = vor.u32 %v791_v26, %v790_v25  ;;  %v781_v39 = vshll.u32 %v7186_v28, %v778_v10 }
 0x14c   : > { %v784_v41 = vshll.u32 %v7178_v30, %v778_v10  ;;  %v787_v42 = vshll.u32 %v7176_v34, %v778_v10  ;;  %v795_v44 = vor.u32 %v794_v29, %v793_v33  ;;  %v3871_v46 = vadd.s32 4294967169, %v665_v17 }
 0x14d   : > { %v618_v45 = vadd.s32 %v617_v23, %v613_v35  ;;  %v771_v47 = vand.u32 8388607, %v7170_v20  ;;  %v4793_v48 = vadd.f32 %v4728_v16, %v353_v38  ;;  %v783_v49 = vor.u32 %v782_v31, %v781_v39 }
 0x14e   : > { %v786_v50 = vor.u32 %v785_v32, %v784_v41  ;;  %v789_v51 = vor.u32 %v788_v27, %v787_v42  ;;  %vm799_vm9 = vcmp.lt.s32.totalorder %v4777_v21, 4  ;;  %v4800_v53 = vadd.f32 %v4725_v13, %v4720_v9 }
 0x14f   : > { %7233 = vst [vmem:[#allocation6_spill] sm:$0xff] %v4793_v48  ;;  %v805_v52 = vsel %vm799_vm9, %v792_v36, 920167782  ;;  %v809_v54 = vsel %vm799_vm9, %v795_v44, 1326507024  ;;  %v619_v55 = vadd.s32 536870912, %v618_v45  ;;  %v780_v15 = vshrl.u32 %v7186_v28, %v779_v14 }
 0x150   : > { %v671_v56 = vadd.s32 1, %v3871_v46  ;;  %vm796_vm10 = vcmp.lt.s32.totalorder %v4777_v21, 1  ;;  %vm798_vm11 = vcmp.lt.s32.totalorder %v4777_v21, 3  ;;  %v772_v16 = vor.u32 8388608, %v771_v47 }
 0x151   : > { %v804_v57 = vsel %vm796_vm10, %v783_v49, %v786_v50  ;;  %v806_v58 = vsel %vm798_vm11, %v789_v51, %v805_v52  ;;  %v973_v59 = vand.u32 2139095040, %v4793_v48  ;;  %v808_v9 = vsel %vm796_vm10, %v786_v50, %v789_v51 }
 0x152   : > { %v810_v13 = vsel %vm798_vm11, %v792_v36, %v809_v54  ;;  %v870_v60 = vand.u32 2139095040, %v4800_v53  ;;  %vm797_vm12 = vcmp.lt.s32.totalorder %v4777_v21, 2  ;;  %v4817_v62 = vshrl.u32 %v619_v55, 30 }
 0x153   : > { %vm672_vm13 = vcmp.gt.s32.totalorder %v671_v56, 0  ;;  %v807_v2 = vsel %vm797_vm12, %v804_v57, %v806_v58  ;;  %v974_v3 = vshrl.u32 %v973_v59, 23  ;;  %v811_v4 = vsel %vm797_vm12, %v808_v9, %v810_v13 }
 0x154   : > { %7234 = vst [vmem:[#allocation7_spill] sm:$0xff] %v4817_v62  ;;  %v812_v5 = vshll.u32 %v772_v16, 8  ;;  %v801_v10 = vsel %vm799_vm9, %v789_v51, 2102212464  ;;  %v871_v11 = vshrl.u32 %v870_v60, 23  ;;  %v4828_v7 = vsel %vm672_vm13, %v671_v56, 0 }
 0x155   : > { %v3883_v0 = vadd.s32 4294967169, %v974_v3  ;;  %v621_v25 = vshll.u32 %v4817_v62, 30  ;;  %v800_v31 = vsel %vm796_vm10, %v780_v15, %v783_v49  ;;  %v802_v32 = vsel %vm798_vm11, %v786_v50, %v801_v10 }
 0x156   : > { %v4831_v17 = vmul.u32.u64.low %v812_v5, %v807_v2  ;;  %v4832_v23 = vmul.u32.u64.high %v812_v5, %v807_v2, %v4831_v17  ;;  %v4836_v26 = vmul.u32.u64.low %v812_v5, %v811_v4  ;;  %v4837_v29 = vmul.u32.u64.high %v812_v5, %v811_v4, %v4836_v26  ;;  %v4878_v4 = vpop.permute.xlu1 %357 }
 0x157   : > { %v980_v18 = vadd.s32 1, %v3883_v0  ;;  %v1076_v27 = vand.u32 2139095040, %v4824_v8  ;;  %v7171_v14 = vand.u32 2147483647, %v4758_v61  ;;  %v4846_v33 = vand.u32 31, %v4828_v7 }
 0x158   : > { %v3879_v35 = vadd.s32 4294967169, %v871_v11  ;;  %v4848_v36 = vsub.s32 %v618_v45, %v621_v25  ;;  %v803_v38 = vsel %vm797_vm12, %v800_v31, %v802_v32  ;;  %v7174_v39 = vand.u32 2147483647, %v4793_v48 }
 0x159   : > { %vm981_vm14 = vcmp.gt.s32.totalorder %v980_v18, 0  ;;  %v1077_v42 = vshrl.u32 %v1076_v27, 23  ;;  %v4855_v46 = vand.u32 8388607, %v7171_v14  ;;  %v4858_v47 = vsub.s32 32, %v4846_v33 }
 0x15a   : > { %v982_v41 = vsel %vm981_vm14, %v980_v18, 0  ;;  %v819_v49 = vmul.u32 %v812_v5, %v803_v38  ;;  %v822_v50 = vadd.s32 1, %v4832_v23  ;;  %v4861_v45 = vadd.s32 1, %v3879_v35 }
 0x15b   : > { %v984_v44 = vand.u32 31, %v982_v41  ;;  %v624_v21 = vsub.s32 0, %v4848_v36  ;;  %vm821_vm15 = vc.u32 %v4837_v29, %v4831_v17  ;;  %v977_v51 = vand.u32 8388607, %v7174_v39 }
 0x15c   : > { %v983_v54 = vshrl.u32 %v982_v41, 5  ;;  %v3887_v16 = vadd.s32 4294967169, %v1077_v42  ;;  %v823_v13 = vsel %vm821_vm15, %v822_v50, %v4832_v23  ;;  %vm878_vm0 = vcmp.gt.s32.totalorder %v4861_v45, 0 }
 0x15d   : > { %v985_v52 = vsub.s32 32, %v984_v44  ;;  %v987_v55 = vshll.u32 %v7186_v28, %v984_v44  ;;  %v990_v56 = vshll.u32 %v7178_v30, %v984_v44  ;;  %v993_v59 = vshll.u32 %v7176_v34, %v984_v44 }
 0x15e   : > { %v996_v60 = vshll.u32 %v7184_v37, %v984_v44  ;;  %v999_v3 = vshll.u32 %v7180_v40, %v984_v44  ;;  %v4883_v15 = vmin.u32 %v624_v21, %v4848_v36  ;;  %v7173_v23 = vand.u32 2147483647, %v4824_v8 }
 0x15f   : > { %v988_v57 = vshrl.u32 %v7178_v30, %v985_v52  ;;  %v991_v58 = vshrl.u32 %v7176_v34, %v985_v52  ;;  %v994_v9 = vshrl.u32 %v7184_v37, %v985_v52  ;;  %v997_v2 = vshrl.u32 %v7180_v40, %v985_v52 }
 0x160   : > { %v1000_v0 = vshrl.u32 %v7182_v43, %v985_v52  ;;  %v4888_v26 = vadd.f32 %v4733_v22, %v4878_v4  ;;  %v978_v18 = vor.u32 8388608, %v977_v51  ;;  %vm1002_vm1 = vcmp.lt.s32.totalorder %v983_v54, 1 }
 0x161   : > { %v989_v5 = vor.u32 %v988_v57, %v987_v55  ;;  %v992_v10 = vor.u32 %v991_v58, %v990_v56  ;;  %v995_v11 = vor.u32 %v994_v9, %v993_v59  ;;  %v998_v25 = vor.u32 %v997_v2, %v996_v60 }
 0x162   : > { %7236 = vst [vmem:[#allocation9_spill] sm:$0xff] %v4888_v26  ;;  %v1001_v31 = vor.u32 %v1000_v0, %v999_v3  ;;  %v1083_v32 = vadd.s32 1, %v3887_v16  ;;  %v4890_v27 = vadd.s32 %v823_v13, %v819_v49  ;;  %vm1004_vm2 = vcmp.lt.s32.totalorder %v983_v54, 3 }
 0x163   : > { %vm1005_vm3 = vcmp.lt.s32.totalorder %v983_v54, 4  ;;  %v1010_v35 = vsel %vm1002_vm1, %v989_v5, %v992_v10  ;;  %v1014_v42 = vsel %vm1002_vm1, %v992_v10, %v995_v11  ;;  %v986_v50 = vshrl.u32 %v7186_v28, %v985_v52 }
 0x164   : > { %v1007_v38 = vsel %vm1005_vm3, %v995_v11, 2102212464  ;;  %v1011_v41 = vsel %vm1005_vm3, %v998_v25, 920167782  ;;  %v1015_v44 = vsel %vm1005_vm3, %v1001_v31, 1326507024  ;;  %v688_v31 = vshrl.u32 %v7180_v40, %v4858_v47 }
 0x165   : > { %vm1003_vm4 = vcmp.lt.s32.totalorder %v983_v54, 2  ;;  %v1012_v22 = vsel %vm1004_vm2, %v995_v11, %v1011_v41  ;;  %v1179_v21 = vand.u32 2139095040, %v4888_v26  ;;  %v1016_v49 = vsel %vm1004_vm2, %v998_v25, %v1015_v44 }
 0x166   : > { %v1013_v51 = vsel %vm1003_vm4, %v1010_v35, %v1012_v22  ;;  %v1018_v55 = vshll.u32 %v978_v18, 8  ;;  %vm1084_vm5 = vcmp.gt.s32.totalorder %v1083_v32, 0  ;;  %v1006_v56 = vsel %vm1002_vm1, %v986_v50, %v989_v5 }
 0x167   : > { %v1008_v16 = vsel %vm1004_vm2, %v992_v10, %v1007_v38  ;;  %v1017_v57 = vsel %vm1003_vm4, %v1014_v42, %v1016_v49  ;;  %v1080_v52 = vand.u32 8388607, %v7173_v23  ;;  %v825_v60 = vadd.s32 536870912, %v4890_v27 }
 0x168   : > { %v4904_v58 = vmul.u32.u64.low %v1018_v55, %v1017_v57  ;;  %v4905_v59 = vmul.u32.u64.high %v1018_v55, %v1017_v57, %v4904_v58  ;;  %v4907_v9 = vmul.u32.u64.low %v1018_v55, %v1013_v51  ;;  %v4908_v13 = vmul.u32.u64.high %v1018_v55, %v1013_v51, %v4907_v9 }
 0x169   : > { %v1085_v2 = vsel %vm1084_vm5, %v1083_v32, 0  ;;  %v1180_v3 = vshrl.u32 %v1179_v21, 23  ;;  %v4913_v5 = vshrl.u32 %v4828_v7, 5  ;;  %v1009_v10 = vsel %vm1003_vm4, %v1006_v56, %v1008_v16 }
 0x16a   : > { %v1087_v11 = vand.u32 31, %v1085_v2  ;;  %v626_v25 = vclz %v4883_v15  ;;  %v687_v18 = vshll.u32 %v7184_v37, %v4846_v33  ;;  %v4925_v32 = vsel %vm878_vm0, %v4861_v45, 0 }
 0x16b   : > { %vm1027_vm6 = vc.u32 %v4905_v59, %v4907_v9  ;;  %v1028_v7 = vadd.s32 1, %v4908_v13  ;;  %v1081_v54 = vor.u32 8388608, %v1080_v52  ;;  %v4930_v38 = vshrl.u32 %v825_v60, 30 }
 0x16c   : > { %v1088_v35 = vsub.s32 32, %v1087_v11  ;;  %v1025_v15 = vmul.u32 %v1018_v55, %v1009_v10  ;;  %v1090_v41 = vshll.u32 %v7186_v28, %v1087_v11  ;;  %v3891_v42 = vadd.s32 4294967169, %v1180_v3 }
 0x16d   : > { %7237 = vst [vmem:[#allocation10_spill] sm:$0xff] %v4930_v38  ;;  %v1029_v44 = vsel %vm1027_vm6, %v1028_v7, %v4908_v13  ;;  %v1093_v45 = vshll.u32 %v7178_v30, %v1087_v11  ;;  %v1086_v51 = vshrl.u32 %v1085_v2, 5  ;;  %v1096_v49 = vshll.u32 %v7176_v34, %v1087_v11 }
 0x16e   : > { %v1091_v50 = vshrl.u32 %v7178_v30, %v1088_v35  ;;  %v1094_v22 = vshrl.u32 %v7176_v34, %v1088_v35  ;;  %v4937_v21 = vadd.s32 %v1029_v44, %v1025_v15  ;;  %v1097_v56 = vshrl.u32 %v7184_v37, %v1088_v35 }
 0x16f   : > { %v1099_v57 = vshll.u32 %v7184_v37, %v1087_v11  ;;  %v1100_v52 = vshrl.u32 %v7180_v40, %v1088_v35  ;;  %v3869_v58 = vadd.s32 4294967294, %v626_v25  ;;  %v4944_v13 = vand.u32 31, %v4925_v32 }
 0x170   : > { %v1092_v16 = vor.u32 %v1091_v50, %v1090_v41  ;;  %v1095_v55 = vor.u32 %v1094_v22, %v1093_v45  ;;  %v1098_v60 = vor.u32 %v1097_v56, %v1096_v49  ;;  %v7175_v3 = vand.u32 2147483647, %v4888_v26 }
 0x171   : > { %v1031_v10 = vadd.s32 536870912, %v4937_v21  ;;  %v1101_v2 = vor.u32 %v1100_v52, %v1099_v57  ;;  %v1102_v7 = vshll.u32 %v7180_v40, %v1087_v11  ;;  %v1103_v15 = vshrl.u32 %v7182_v43, %v1088_v35 }
 0x172   : > { %v827_v41 = vshll.u32 %v4930_v38, 30  ;;  %vm1105_vm7 = vcmp.lt.s32.totalorder %v1086_v51, 1  ;;  %vm1108_vm8 = vcmp.lt.s32.totalorder %v1086_v51, 4  ;;  %v1121_v44 = vshll.u32 %v1081_v54, 8 }
 0x173   : > { %v1104_v50 = vor.u32 %v1103_v15, %v1102_v7  ;;  %v1110_v25 = vsel %vm1108_vm8, %v1098_v60, 2102212464  ;;  %v1113_v45 = vsel %vm1105_vm7, %v1092_v16, %v1095_v55  ;;  %v1186_v22 = vadd.s32 1, %v3891_v42 }
 0x174   : > { %v1089_v49 = vshrl.u32 %v7186_v28, %v1088_v35  ;;  %vm1106_vm9 = vcmp.lt.s32.totalorder %v1086_v51, 2  ;;  %vm1107_vm10 = vcmp.lt.s32.totalorder %v1086_v51, 3  ;;  %v1114_v56 = vsel %vm1108_vm8, %v1101_v2, 920167782 }
 0x175   : > { %v4952_v20 = vshrl.u32 %v1031_v10, 30  ;;  %v1115_v57 = vsel %vm1107_vm10, %v1098_v60, %v1114_v56  ;;  %v1117_v11 = vsel %vm1105_vm7, %v1095_v55, %v1098_v60  ;;  %v1118_v52 = vsel %vm1108_vm8, %v1104_v50, 1326507024 }
 0x176   : > { %v1109_v14 = vsel %vm1105_vm7, %v1089_v49, %v1092_v16  ;;  %v1111_v19 = vsel %vm1107_vm10, %v1095_v55, %v1110_v25  ;;  %v1116_v23 = vsel %vm1106_vm9, %v1113_v45, %v1115_v57  ;;  %v1119_v39 = vsel %vm1107_vm10, %v1101_v2, %v1118_v52 }
 0x177   : > { %7238 = vst [vmem:[#allocation11_spill] sm:$0xff] %v4952_v20  ;;  %v1120_v54 = vsel %vm1106_vm9, %v1117_v11, %v1119_v39  ;;  %v4956_v7 = vmul.u32.u64.low %v1121_v44, %v1116_v23  ;;  %v4957_v15 = vmul.u32.u64.high %v1121_v44, %v1116_v23, %v4956_v7  ;;  %vm1187_vm11 = vcmp.gt.s32.totalorder %v1186_v22, 0 }
 0x178   : > { %v4961_v35 = vsub.s32 %v4890_v27, %v827_v41  ;;  %v4963_v42 = vmul.u32.u64.low %v1121_v44, %v1120_v54  ;;  %v4964_v10 = vmul.u32.u64.high %v1121_v44, %v1120_v54, %v4963_v42  ;;  %v1188_v60 = vsel %vm1187_vm11, %v1186_v22, 0 }
 0x179   : > { %vm3870_vm12 = vcmp.lt.s32.totalorder %v3869_v58, 0  ;;  %v1112_v16 = vsel %vm1106_vm9, %v1109_v14, %v1111_v19  ;;  %v1183_v55 = vand.u32 8388607, %v7175_v3  ;;  %v1190_v2 = vand.u32 31, %v1188_v60 }
 0x17a   : > { %7239 = vst [vmem:[#allocation12_spill] sm:$0xff] %v4961_v35  ;;  %v4969_v39 = vor.u32 %v688_v31, %v687_v18  ;;  %v4973_v23 = vshll.u32 %v7180_v40, %v4846_v33  ;;  %v4977_v27 = vshrl.u32 %v7182_v43, %v4858_v47  ;;  %v1033_v41 = vshll.u32 %v4952_v20, 30 }
 0x17b   : > { %v4981_v50 = vsub.s32 32, %v4944_v13  ;;  %v1131_v19 = vadd.s32 1, %v4957_v15  ;;  %v1191_v14 = vsub.s32 32, %v1190_v2  ;;  %v4986_v18 = vadd.f32 %v4735_v24, %v4878_v4 }
 0x17c   : > { %v4988_v31 = vsel %vm3870_vm12, 0, %v3869_v58  ;;  %v830_v51 = vsub.s32 0, %v4961_v35  ;;  %v1128_v25 = vmul.u32 %v1121_v44, %v1112_v16  ;;  %vm1130_vm13 = vc.u32 %v4964_v10, %v4956_v7 }
 0x17d   : > { %7240 = vst [vmem:[#allocation13_spill] sm:$0xff] %v4986_v18  ;;  %v1132_v45 = vsel %vm1130_vm13, %v1131_v19, %v4957_v15  ;;  %v1184_v22 = vor.u32 8388608, %v1183_v55  ;;  %v1194_v49 = vshrl.u32 %v7178_v30, %v1191_v14  ;;  %v1197_v56 = vshrl.u32 %v7176_v34, %v1191_v14 }
 0x17e   : > { %v4997_v57 = vsub.s32 %v4937_v21, %v1033_v41  ;;  %v1133_v24 = vadd.s32 %v1132_v45, %v1128_v25  ;;  %v1193_v4 = vshll.u32 %v7186_v28, %v1190_v2  ;;  %v1200_v58 = vshrl.u32 %v7184_v37, %v1191_v14 }
 0x17f   : > { %v1196_v44 = vshll.u32 %v7178_v30, %v1190_v2  ;;  %v1199_v11 = vshll.u32 %v7176_v34, %v1190_v2  ;;  %v1202_v52 = vshll.u32 %v7184_v37, %v1190_v2  ;;  %v1203_v54 = vshrl.u32 %v7180_v40, %v1191_v14 }
 0x180   : > { %v1134_v15 = vadd.s32 536870912, %v1133_v24  ;;  %v1189_v42 = vshrl.u32 %v1188_v60, 5  ;;  %v1195_v16 = vor.u32 %v1194_v49, %v1193_v4  ;;  %v1206_v55 = vshrl.u32 %v7182_v43, %v1191_v14 }
 0x181   : > { %v1198_v21 = vor.u32 %v1197_v56, %v1196_v44  ;;  %v1201_v41 = vor.u32 %v1200_v58, %v1199_v11  ;;  %v1204_v19 = vor.u32 %v1203_v54, %v1202_v52  ;;  %v1205_v25 = vshll.u32 %v7180_v40, %v1190_v2 }
 0x182   : > { %v614_v45 = vadd.s32 %v4763_v1, %v4761_v63  ;;  %v894_v0 = vshrl.u32 %v7180_v40, %v4981_v50  ;;  %v1036_v34 = vsub.s32 0, %v4997_v57  ;;  %v630_v60 = vsub.s32 32, %v4988_v31 }
 0x183   : > { %v634_v49 = vsub.s32 4294967266, %v4988_v31  ;;  %v1207_v56 = vor.u32 %v1206_v55, %v1205_v25  ;;  %v1282_v4 = vand.u32 2139095040, %v4986_v18  ;;  %v3876_v2 = vmin.u32 %v830_v51, %v4961_v35 }
 0x184   : > { %v5018_v58 = vshrl.u32 %v1134_v15, 30  ;;  %vm1208_vm14 = vcmp.lt.s32.totalorder %v1189_v42, 1  ;;  %vm1211_vm15 = vcmp.lt.s32.totalorder %v1189_v42, 4  ;;  %v1224_v11 = vshll.u32 %v1184_v22, 8 }
 0x185   : > { %v1213_v63 = vsel %vm1211_vm15, %v1201_v41, 2102212464  ;;  %v1216_v1 = vsel %vm1208_vm14, %v1195_v16, %v1198_v21  ;;  %v1217_v44 = vsel %vm1211_vm15, %v1204_v19, 920167782  ;;  %v3884_v52 = vmin.u32 %v1036_v34, %v4997_v57 }
 0x186   : > { %7241 = vst [vmem:[#allocation14_spill] sm:$0xff] %v5018_v58  ;;  %v1192_v54 = vshrl.u32 %v7186_v28, %v1191_v14  ;;  %vm1209_vm0 = vcmp.lt.s32.totalorder %v1189_v42, 2  ;;  %vm1210_vm1 = vcmp.lt.s32.totalorder %v1189_v42, 3  ;;  %vm696_vm2 = vcmp.lt.s32.totalorder %v4913_v5, 4 }
 0x187   : > { %v1218_v55 = vsel %vm1210_vm1, %v1201_v41, %v1217_v44  ;;  %v1220_v51 = vsel %vm1208_vm14, %v1198_v21, %v1201_v41  ;;  %v1221_v15 = vsel %vm1211_vm15, %v1207_v56, 1326507024  ;;  %v1283_v25 = vshrl.u32 %v1282_v4, 23 }
 0x188   : > { %v1136_v30 = vshll.u32 %v5018_v58, 30  ;;  %v1212_v3 = vsel %vm1208_vm14, %v1192_v54, %v1195_v16  ;;  %v1214_v40 = vsel %vm1210_vm1, %v1198_v21, %v1213_v63  ;;  %v1219_v22 = vsel %vm1209_vm0, %v1216_v1, %v1218_v55 }
 0x189   : > { %v1222_v43 = vsel %vm1210_vm1, %v1204_v19, %v1221_v15  ;;  %v5028_v34 = vmul.u32.u64.low %v1224_v11, %v1219_v22  ;;  %v5029_v37 = vmul.u32.u64.high %v1224_v11, %v1219_v22, %v5028_v34  ;;  %v3895_v14 = vadd.s32 4294967169, %v1283_v25 }
 0x18a   : > { %v635_v28 = vadd.s32 127, %v634_v49  ;;  %v832_v20 = vclz %v3876_v2  ;;  %v7243_v44 = vmov 2102212464   ;;  %v1223_v56 = vsel %vm1209_vm0, %v1220_v51, %v1222_v43 }
 0x18b   : > { %7242 = vst [vmem:[#allocation15_spill] sm:$0xff] %v5028_v34  ;;  %v893_v41 = vshll.u32 %v7243_v44, %v4944_v13  ;;  %v1038_v4 = vclz %v3884_v52  ;;  %v5035_v58 = vmul.u32.u64.low %v1224_v11, %v1223_v56  ;;  %v5036_v38 = vmul.u32.u64.high %v1224_v11, %v1223_v56, %v5035_v58 }
 0x18c   : > { %v1289_v16 = vadd.s32 1, %v3895_v14  ;;  %v5039_v21 = vshrl.u32 %v4925_v32, 5  ;;  %v7245_v19 = vmov 1326507024   ;;  %v5045_v1 = vsub.s32 %v1133_v24, %v1136_v30 }
 0x18d   : > { %7244 = vst [vmem:[#allocation16_spill] sm:$0xff] %v5036_v38  ;;  %v5043_v63 = vshrl.u32 %v7245_v19, %v4981_v50  ;;  %v1215_v49 = vsel %vm1209_vm0, %v1212_v3, %v1214_v40  ;;  %v632_v2 = vshrl.u32 %v614_v45, %v630_v60  ;;  %v5048_v54 = vor.u32 %v894_v0, %v893_v41 }
 0x18e   : > { %v1234_v43 = vadd.s32 1, %v5029_v37  ;;  %vm1290_vm3 = vcmp.gt.s32.totalorder %v1289_v16, 0  ;;  %v636_v52 = vshll.u32 %v635_v28, 23  ;;  %v3877_v58 = vadd.s32 4294967294, %v832_v20 }
 0x18f   : > { %v7194_v55 = vand.u32 2147483647, %v4986_v18  ;;  %v1291_v32 = vsel %vm1290_vm3, %v1289_v16, 0  ;;  %v3885_v51 = vadd.s32 4294967294, %v1038_v4  ;;  %v1231_v15 = vmul.u32 %v1224_v11, %v1215_v49 }
 0x190   : > { %vm1233_vm4 = vc.u32 %v5036_v38, %v5028_v34  ;;  %v1293_v30 = vand.u32 31, %v1291_v32  ;;  %v5057_v40 = vsel %vm696_vm2, %v4969_v39, 920167782  ;;  %v7246_v0 = vmov 920167782  }
 0x191   : > { %v5061_v3 = vshll.u32 %v7246_v0, %v4944_v13  ;;  %v1139_v28 = vsub.s32 0, %v5045_v1  ;;  %v1235_v20 = vsel %vm1233_vm4, %v1234_v43, %v5029_v37  ;;  %v631_v24 = vshll.u32 %v4848_v36, %v4988_v31 }
 0x192   : > { %vm902_vm5 = vcmp.lt.s32.totalorder %v5039_v21, 4  ;;  %v1236_v42 = vadd.s32 %v1235_v20, %v1231_v15  ;;  %v1294_v45 = vsub.s32 32, %v1293_v30  ;;  %v7247_v60 = vor.u32 %v4977_v27, %v4973_v23 }
 0x193   : > { %v5080_v37 = vsel %vm902_vm5, %v5048_v54, 920167782  ;;  %v1286_v36 = vand.u32 8388607, %v7194_v55  ;;  %v5084_v31 = vor.u32 %v632_v2, %v631_v24  ;;  %v5086_v22 = vor.u32 4788187, %v636_v52 }
 0x194   : > { %v5073_v11 = vsel %vm696_vm2, %v7247_v60, 1326507024  ;;  %vm3878_vm6 = vcmp.lt.s32.totalorder %v3877_v58, 0  ;;  %vm3886_vm7 = vcmp.lt.s32.totalorder %v3885_v51, 0  ;;  %v3888_v23 = vmin.u32 %v1139_v28, %v5045_v1 }
 0x195   : > { %v1237_v27 = vadd.s32 536870912, %v1236_v42  ;;  %v7248_v14 = vmov 683565275   ;;  %v7249_v56 = vmov 2475754826   ;;  %v1303_v2 = vshrl.u32 %v7243_v44, %v1294_v45 }
 0x196   : > { %v1296_v41 = vshll.u32 %v7248_v14, %v1293_v30  ;;  %v1297_v4 = vshrl.u32 %v7249_v56, %v1294_v45  ;;  %v1299_v16 = vshll.u32 %v7249_v56, %v1293_v30  ;;  %v7250_v49 = vmov 2131351028  }
 0x197   : > { %v1300_v43 = vshrl.u32 %v7250_v49, %v1294_v45  ;;  %v1302_v15 = vshll.u32 %v7250_v49, %v1293_v30  ;;  %v5095_v20 = vsel %vm3878_vm6, 0, %v3877_v58  ;;  %v1287_v52 = vor.u32 8388608, %v1286_v36 }
 0x198   : > { %v1292_v24 = vshrl.u32 %v1291_v32, 5  ;;  %v1298_v60 = vor.u32 %v1297_v4, %v1296_v41  ;;  %v1305_v25 = vshll.u32 %v7243_v44, %v1293_v30  ;;  %v1306_v18 = vshrl.u32 %v7246_v0, %v1294_v45 }
 0x199   : > { %v1301_v55 = vor.u32 %v1300_v43, %v1299_v16  ;;  %v1304_v28 = vor.u32 %v1303_v2, %v1302_v15  ;;  %v5100_v26 = vsel %vm3886_vm7, 0, %v3885_v51  ;;  %v1308_v62 = vshll.u32 %v7246_v0, %v1293_v30 }
 0x19a   : > { %v1309_v12 = vshrl.u32 %v7245_v19, %v1294_v45  ;;  %v678_v58 = vshll.u32 %v7248_v14, %v4846_v33  ;;  %v1141_v61 = vclz %v3888_v23  ;;  %v5106_v36 = vshrl.u32 %v1237_v27, 30 }
 0x19b   : > { %v1307_v32 = vor.u32 %v1306_v18, %v1305_v25  ;;  %v679_v41 = vshrl.u32 %v7249_v56, %v4858_v47  ;;  %vm1311_vm8 = vcmp.lt.s32.totalorder %v1292_v24, 1  ;;  %vm1314_vm9 = vcmp.lt.s32.totalorder %v1292_v24, 4 }
 0x19c   : > { %v1310_v4 = vor.u32 %v1309_v12, %v1308_v62  ;;  %v1327_v16 = vshll.u32 %v1287_v52, 8  ;;  %v1316_v51 = vsel %vm1314_vm9, %v1304_v28, 2102212464  ;;  %v1319_v43 = vsel %vm1311_vm8, %v1298_v60, %v1301_v55 }
 0x19d   : > { %v681_v30 = vshll.u32 %v7249_v56, %v4846_v33  ;;  %v682_v15 = vshrl.u32 %v7250_v49, %v4858_v47  ;;  %v1295_v23 = vshrl.u32 %v7248_v14, %v1294_v45  ;;  %vm1313_vm10 = vcmp.lt.s32.totalorder %v1292_v24, 3 }
 0x19e   : > { %v1320_v27 = vsel %vm1314_vm9, %v1307_v32, 920167782  ;;  %v1323_v18 = vsel %vm1311_vm8, %v1301_v55, %v1304_v28  ;;  %v1239_v25 = vshll.u32 %v5106_v36, 30  ;;  %vm1312_vm11 = vcmp.lt.s32.totalorder %v1292_v24, 2 }
 0x19f   : > { %v1321_v12 = vsel %vm1313_vm10, %v1304_v28, %v1320_v27  ;;  %v1324_v62 = vsel %vm1314_vm9, %v1310_v4, 1326507024  ;;  %v1315_v2 = vsel %vm1311_vm8, %v1295_v23, %v1298_v60  ;;  %v1317_v52 = vsel %vm1313_vm10, %v1301_v55, %v1316_v51 }
 0x1a0   : > { %v1322_v19 = vsel %vm1312_vm11, %v1319_v43, %v1321_v12  ;;  %v1325_v0 = vsel %vm1313_vm10, %v1307_v32, %v1324_v62  ;;  %v3889_v6 = vadd.s32 4294967294, %v1141_v61  ;;  %v684_v35 = vshll.u32 %v7250_v49, %v4846_v33 }
 0x1a1   : > { %v1326_v8 = vsel %vm1312_vm11, %v1323_v18, %v1325_v0  ;;  %v5116_v34 = vmul.u32.u64.low %v1327_v16, %v1322_v19  ;;  %v5117_v38 = vmul.u32.u64.high %v1327_v16, %v1322_v19, %v5116_v34  ;;  %v685_v24 = vshrl.u32 %v7243_v44, %v4858_v47 }
 0x1a2   : > { %v5120_v48 = vmul.u32.u64.low %v1327_v16, %v1326_v8  ;;  %v5121_v45 = vmul.u32.u64.high %v1327_v16, %v1326_v8, %v5120_v48  ;;  %v5127_v28 = vsub.s32 %v1236_v42, %v1239_v25  ;;  %v1318_v55 = vsel %vm1312_vm11, %v1315_v2, %v1317_v52 }
 0x1a3   : > { %v680_v60 = vor.u32 %v679_v41, %v678_v58  ;;  %v683_v32 = vor.u32 %v682_v15, %v681_v30  ;;  %v640_v61 = vcvt.s32.f32 %v5084_v31  ;;  %v7251_v19 = vor.u32 %v5043_v63, %v5061_v3 }
 0x1a4   : > { %v677_v48 = vshrl.u32 %v7248_v14, %v4858_v47  ;;  %v686_v33 = vor.u32 %v685_v24, %v684_v35  ;;  %v638_v0 = vand.u32 2147483647, %v5086_v22  ;;  %v836_v42 = vsub.s32 32, %v5095_v20 }
 0x1a5   : > { %v5135_v8 = vsel %vm902_vm5, %v7251_v19, 1326507024  ;;  %v1046_v58 = vsub.s32 4294967266, %v5100_v26  ;;  %v1337_v41 = vadd.s32 1, %v5117_v38  ;;  %vm3890_vm12 = vcmp.lt.s32.totalorder %v3889_v6, 0 }
 0x1a6   : > { %v1334_v4 = vmul.u32 %v1327_v16, %v1318_v55  ;;  %vm1336_vm13 = vc.u32 %v5121_v45, %v5116_v34  ;;  %vm693_vm14 = vcmp.lt.s32.totalorder %v4913_v5, 1  ;;  %v1242_v63 = vsub.s32 0, %v5127_v28 }
 0x1a7   : > { %v1338_v47 = vsel %vm1336_vm13, %v1337_v41, %v5117_v38  ;;  %vm695_vm15 = vcmp.lt.s32.totalorder %v4913_v5, 3  ;;  %v701_v35 = vsel %vm693_vm14, %v680_v60, %v683_v32  ;;  %v698_v51 = vsel %vm696_vm2, %v686_v33, 2102212464 }
 0x1a8   : > { %v1339_v3 = vadd.s32 %v1338_v47, %v1334_v4  ;;  %v703_v16 = vsel %vm695_vm15, %v686_v33, %v5057_v40  ;;  %v705_v43 = vsel %vm693_vm14, %v683_v32, %v686_v33  ;;  %v840_v30 = vsub.s32 4294967266, %v5095_v20 }
 0x1a9   : > { %v1047_v15 = vadd.s32 127, %v1046_v58  ;;  %v5159_v38 = vsel %vm3890_vm12, 0, %v3889_v6  ;;  %vm694_vm0 = vcmp.lt.s32.totalorder %v4913_v5, 2  ;;  %v707_v18 = vsel %vm695_vm15, %v4969_v39, %v5073_v11 }
 0x1aa   : > { %v1340_v23 = vadd.s32 536870912, %v1339_v3  ;;  %v704_v27 = vsel %vm694_vm0, %v701_v35, %v703_v16  ;;  %v7252_v40 = vor.u32 8388608, %v4855_v46  ;;  %v3892_v12 = vmin.u32 %v1242_v63, %v5127_v28 }
 0x1ab   : > { %v697_v6 = vsel %vm693_vm14, %v677_v48, %v680_v60  ;;  %v699_v62 = vsel %vm695_vm15, %v683_v32, %v698_v51  ;;  %v708_v2 = vsel %vm694_vm0, %v705_v43, %v707_v18  ;;  %v867_v39 = vand.u32 2147483647, %v4800_v53 }
 0x1ac   : > { %v709_v25 = vshll.u32 %v7252_v40, 8  ;;  %v5177_v52 = vshrl.u32 %v1340_v23, 30  ;;  %v5183_v46 = vadd.s32 127, %v840_v30  ;;  %v1026_v11 = vadd.s32 %v4907_v9, %v4905_v59 }
 0x1ad   : > { %v1042_v32 = vsub.s32 32, %v5100_v26  ;;  %v1043_v48 = vshll.u32 %v4997_v57, %v5100_v26  ;;  %v1129_v33 = vadd.s32 %v4956_v7, %v4964_v10  ;;  %v1048_v41 = vshll.u32 %v1047_v15, 23 }
 0x1ae   : > { %v5179_v24 = vmul.u32.u64.low %v709_v25, %v708_v2  ;;  %v5180_v55 = vmul.u32.u64.high %v709_v25, %v708_v2, %v5179_v24  ;;  %v5187_v19 = vmul.u32.u64.low %v709_v25, %v704_v27  ;;  %v5188_v60 = vmul.u32.u64.high %v709_v25, %v704_v27, %v5187_v19 }
 0x1af   : > { %v1342_v58 = vshll.u32 %v5177_v52, 30  ;;  %v1149_v4 = vsub.s32 4294967266, %v5159_v38  ;;  %v700_v59 = vsel %vm694_vm0, %v697_v6, %v699_v62  ;;  %v885_v9 = vshrl.u32 %v7249_v56, %v4981_v50 }
 0x1b0   : > { %v1244_v63 = vclz %v3892_v12  ;;  %vm718_vm1 = vc.u32 %v5180_v55, %v5187_v19  ;;  %v874_v7 = vand.u32 8388607, %v867_v39  ;;  %v719_v10 = vadd.s32 1, %v5188_v60 }
 0x1b1   : > { %v5202_v47 = vsub.s32 %v1339_v3, %v1342_v58  ;;  %v884_v35 = vshll.u32 %v7248_v14, %v4944_v13  ;;  %v887_v5 = vshll.u32 %v7249_v56, %v4944_v13  ;;  %v888_v51 = vshrl.u32 %v7250_v49, %v4981_v50 }
 0x1b2   : > { %v716_v16 = vmul.u32 %v709_v25, %v700_v59  ;;  %v890_v43 = vshll.u32 %v7250_v49, %v4944_v13  ;;  %v891_v30 = vshrl.u32 %v7243_v44, %v4981_v50  ;;  %v1044_v15 = vshrl.u32 %v1026_v11, %v1042_v32 }
 0x1b3   : > { %v1345_v3 = vsub.s32 0, %v5202_v47  ;;  %v720_v23 = vsel %vm718_vm1, %v719_v10, %v5188_v60  ;;  %v886_v27 = vor.u32 %v885_v9, %v884_v35  ;;  %v889_v18 = vor.u32 %v888_v51, %v887_v5 }
 0x1b4   : > { %v1150_v40 = vadd.s32 127, %v1149_v4  ;;  %v721_v6 = vadd.s32 %v720_v23, %v716_v16  ;;  %v892_v62 = vor.u32 %v891_v30, %v890_v43  ;;  %v1049_v2 = vor.u32 4788187, %v1048_v41 }
 0x1b5   : > { %v3896_v12 = vmin.u32 %v1345_v3, %v5202_v47  ;;  %v3893_v24 = vadd.s32 4294967294, %v1244_v63  ;;  %v875_v58 = vor.u32 8388608, %v874_v7  ;;  %vm901_vm2 = vcmp.lt.s32.totalorder %v5039_v21, 3 }
 0x1b6   : > { %v722_v13 = vadd.s32 536870912, %v721_v6  ;;  %vm899_vm3 = vcmp.lt.s32.totalorder %v5039_v21, 1  ;;  %v913_v11 = vsel %vm901_vm2, %v5048_v54, %v5135_v8  ;;  %v1145_v60 = vsub.s32 32, %v5159_v38 }
 0x1b7   : > { %v1347_v25 = vclz %v3896_v12  ;;  %v907_v32 = vsel %vm899_vm3, %v886_v27, %v889_v18  ;;  %v909_v41 = vsel %vm901_vm2, %v892_v62, %v5080_v37  ;;  %v911_v4 = vsel %vm899_vm3, %v889_v18, %v892_v62 }
 0x1b8   : > { %v1151_v59 = vshll.u32 %v1150_v40, 23  ;;  %v5236_v63 = vshrl.u32 %v722_v13, 30  ;;  %vm900_vm4 = vcmp.lt.s32.totalorder %v5039_v21, 2  ;;  %vm3894_vm6 = vcmp.lt.s32.totalorder %v3893_v24, 0  ;;  %v7253_v21 = vld [vmem:[#allocation12_spill] sm:$0xff]  ;;  %v7254_v13 = vld [vmem:[#allocation6_spill] sm:$0xff] }
 0x1b9   : > { %v3897_v9 = vadd.s32 4294967294, %v1347_v25  ;;  %v904_v54 = vsel %vm902_vm5, %v892_v62, 2102212464  ;;  %v914_v8 = vsel %vm900_vm4, %v911_v4, %v913_v11  ;;  %v915_v7 = vshll.u32 %v875_v58, 8 }
 0x1ba   : > { %v724_v37 = vshll.u32 %v5236_v63, 30  ;;  %v883_v10 = vshrl.u32 %v7248_v14, %v4981_v50  ;;  %v910_v35 = vsel %vm900_vm4, %v907_v32, %v909_v41  ;;  %v1147_v5 = vshrl.u32 %v1129_v33, %v1145_v60 }
 0x1bb   : > { %vm3898_vm7 = vcmp.lt.s32.totalorder %v3897_v9, 0  ;;  %v5250_v3 = vmul.u32.u64.low %v915_v7, %v914_v8  ;;  %v5251_v16 = vmul.u32.u64.high %v915_v7, %v914_v8, %v5250_v3  ;;  %v5253_v43 = vsel %vm3894_vm6, 0, %v3893_v24 }
 0x1bc   : > { %v5248_v51 = vsel %vm3898_vm7, 0, %v3897_v9  ;;  %v5255_v30 = vsub.s32 %v721_v6, %v724_v37  ;;  %v903_v23 = vsel %vm899_vm3, %v883_v10, %v886_v27  ;;  %v905_v40 = vsel %vm901_vm2, %v889_v18, %v904_v54 }
 0x1bd   : > { %v842_v50 = vshll.u32 %v5183_v46, 23  ;;  %v1355_v12 = vsub.s32 4294967266, %v5248_v51  ;;  %v5263_v33 = vmul.u32.u64.low %v915_v7, %v910_v35  ;;  %v5264_v62 = vmul.u32.u64.high %v915_v7, %v910_v35, %v5263_v33  ;;  %v7255_v35 = vld [vmem:[#allocation16_spill] sm:$0xff] }
 0x1be   : > { %v1045_v24 = vor.u32 %v1044_v15, %v1043_v48  ;;  %v1146_v6 = vshll.u32 %v5045_v1, %v5159_v38  ;;  %v1152_v58 = vor.u32 4788187, %v1151_v59  ;;  %v727_v27 = vsub.s32 0, %v5255_v30 }
 0x1bf   : > { %v5277_v46 = vmul.f32 %v640_v61, %v638_v0  ;;  %v820_v18 = vadd.s32 %v4831_v17, %v4837_v29  ;;  %v1252_v25 = vsub.s32 4294967266, %v5253_v43  ;;  %v906_v26 = vsel %vm900_vm4, %v903_v23, %v905_v40 }
 0x1c0   : > { %v1050_v57 = vand.u32 2147483647, %v1049_v2  ;;  %v1148_v48 = vor.u32 %v1147_v5, %v1146_v6  ;;  %v3872_v1 = vmin.u32 %v727_v27, %v5255_v30  ;;  %vm924_vm5 = vc.u32 %v5251_v16, %v5263_v33  ;;  %v7256_v5 = vld [vmem:[#allocation15_spill] sm:$0xff] }
 0x1c1   : > { %v838_v31 = vshrl.u32 %v820_v18, %v836_v42  ;;  %v843_v22 = vor.u32 4788187, %v842_v50  ;;  %v1356_v61 = vadd.s32 127, %v1355_v12  ;;  %v925_v0 = vadd.s32 1, %v5264_v62 }
 0x1c2   : > { %v1052_v17 = vcvt.s32.f32 %v1045_v24  ;;  %v1153_v29 = vand.u32 2147483647, %v1152_v58  ;;  %v729_v38 = vclz %v3872_v1  ;;  %v922_v15 = vmul.u32 %v915_v7, %v906_v26 }
 0x1c3   : > { %v837_v2 = vshll.u32 %v7253_v21, %v5095_v20  ;;  %vm972_vm8 = vcmp.lt.s32.totalorder %v7254_v13, 0  ;;  %v1253_v11 = vadd.s32 127, %v1252_v25  ;;  %v1351_v60 = vsub.s32 32, %v5248_v51 }
 0x1c4   : > { %v926_v32 = vsel %vm924_vm5, %v925_v0, %v5264_v62  ;;  %v1053_v41 = vmul.f32 %v1052_v17, %v1050_v57  ;;  %v1155_v42 = vcvt.s32.f32 %v1148_v48  ;;  %v3873_v4 = vadd.s32 4294967294, %v729_v38  ;;  %v7260_v38 = vld [vmem:[#allocation8_spill] sm:$0xff] }
 0x1c5   : > { %v927_v59 = vadd.s32 %v926_v32, %v922_v15  ;;  %v839_v9 = vor.u32 %v838_v31, %v837_v2  ;;  %v1248_v54 = vsub.s32 32, %v5253_v43  ;;  %v1335_v8 = vadd.s32 %v5116_v34, %v5121_v45  ;;  %v7261_v32 = vld [vmem:[#allocation3_spill] sm:$0xff] }
 0x1c6   : > { %v1357_v7 = vshll.u32 %v1356_v61, 23  ;;  %v844_v37 = vand.u32 2147483647, %v843_v22  ;;  %v1156_v20 = vmul.f32 %v1155_v42, %v1153_v29  ;;  %vm3874_vm9 = vcmp.lt.s32.totalorder %v3873_v4, 0 }
 0x1c7   : > { %v928_v10 = vadd.s32 536870912, %v927_v59  ;;  %v1232_v3 = vadd.s32 %v7256_v5, %v7255_v35  ;;  %v1254_v23 = vshll.u32 %v1253_v11, 23  ;;  %v1353_v40 = vshrl.u32 %v1335_v8, %v1351_v60  ;;  %v7265_v35 = vld [vmem:[#allocation5_spill] sm:$0xff] }
 0x1c8   : > { %v732_v50 = vsel %vm3874_vm9, 0, %v3873_v4  ;;  %v1054_v12 = vxor.u32 2147483648, %v1053_v41  ;;  %v717_v62 = vadd.s32 %v5187_v19, %v5180_v55  ;;  %v1352_v34 = vshll.u32 %v5202_v47, %v5248_v51 }
 0x1c9   : > { %v733_v24 = vsub.s32 32, %v732_v50  ;;  %v737_v6 = vsub.s32 4294967266, %v732_v50  ;;  %v1250_v58 = vshrl.u32 %v1232_v3, %v1248_v54  ;;  %v1358_v45 = vor.u32 4788187, %v1357_v7 }
 0x1ca   : > { %v5304_v27 = vshrl.u32 %v928_v10, 30  ;;  %v1157_v18 = vxor.u32 2147483648, %v1156_v20  ;;  %v1249_v25 = vshll.u32 %v5127_v28, %v5253_v43  ;;  %v1255_v48 = vor.u32 4788187, %v1254_v23 }
 0x1cb   : > { %v735_v26 = vshrl.u32 %v717_v62, %v733_v24  ;;  %v738_v57 = vadd.s32 127, %v737_v6  ;;  %v1354_v1 = vor.u32 %v1353_v40, %v1352_v34  ;;  %v734_v31 = vshll.u32 %v5255_v30, %v732_v50  ;;  %v7266_v40 = vld [vmem:[#allocation4_spill] sm:$0xff] }
 0x1cc   : > { %v930_v55 = vshll.u32 %v5304_v27, 30  ;;  %v846_v19 = vcvt.s32.f32 %v839_v9  ;;  %v7257_v22 = vand.u32 2147483647, %v7254_v13  ;;  %v1055_v51 = vsel %vm972_vm8, %v1054_v12, %v1053_v41 }
 0x1cd   : > { %v739_v61 = vshll.u32 %v738_v57, 23  ;;  %v1251_v28 = vor.u32 %v1250_v58, %v1249_v25  ;;  %v1359_v43 = vand.u32 2147483647, %v1358_v45  ;;  %v736_v0 = vor.u32 %v735_v26, %v734_v31  ;;  %v7274_v25 = vld [vmem:[#allocation9_spill] sm:$0xff] }
 0x1ce   : > { %vm5312_vm10 = vcmp.le.f32.partialorder %v7257_v22, 0.7853982  ;;  %v5318_v17 = vsub.s32 %v927_v59, %v930_v55  ;;  %v642_v30 = vxor.u32 2147483648, %v5277_v46  ;;  %v847_v29 = vmul.f32 %v846_v19, %v844_v37  ;;  %v7275_v26 = vld [vmem:[#allocation13_spill] sm:$0xff] }
 0x1cf   : > { %vm1075_vm11 = vcmp.lt.s32.totalorder %v7260_v38, 0  ;;  %v740_v15 = vor.u32 4788187, %v739_v61  ;;  %v1256_v2 = vand.u32 2147483647, %v1255_v48  ;;  %v1361_v11 = vcvt.s32.f32 %v1354_v1 }
 0x1d0   : > { %v1158_v21 = vsel %vm1075_vm11, %v1157_v18, %v1156_v20  ;;  %v933_v60 = vsub.s32 0, %v5318_v17  ;;  %vm560_vm12 = vcmp.lt.s32.totalorder %v7261_v32, 0  ;;  %v1058_v41 = vsel %vm5312_vm10, %v7254_v13, %v1055_v51 }
 0x1d1   : > { %v7262_v42 = vand.u32 2147483647, %v7260_v38  ;;  %v741_v59 = vand.u32 2147483647, %v740_v15  ;;  %v1258_v9 = vcvt.s32.f32 %v1251_v28  ;;  %v1362_v54 = vmul.f32 %v1361_v11, %v1359_v43 }
 0x1d2   : > { %v743_v8 = vcvt.s32.f32 %v736_v0  ;;  %v3880_v7 = vmin.u32 %v933_v60, %v5318_v17  ;;  %v643_v37 = vsel %vm560_vm12, %v642_v30, %v5277_v46  ;;  %v848_v20 = vxor.u32 2147483648, %v847_v29  ;;  %v7270_v46 = vld [vmem:[#allocation7_spill] sm:$0xff] }
 0x1d3   : > { %vm5331_vm13 = vcmp.le.f32.partialorder %v7262_v42, 0.7853982  ;;  %vm663_vm14 = vcmp.lt.s32.totalorder %v7265_v35, 0  ;;  %4307 = vcosq.f32 %v1058_v41  ;;  %v1259_v5 = vmul.f32 %v1258_v9, %v1256_v2 }
 0x1d4   : > { %v1161_v10 = vsel %vm5331_vm13, %v7260_v38, %v1158_v21  ;;  %v744_v3 = vmul.f32 %v743_v8, %v741_v59  ;;  %v935_v23 = vclz %v3880_v7  ;;  %vm766_vm15 = vcmp.lt.s32.totalorder %v7266_v40, 0  ;;  %v7283_v8 = vld [vmem:[#allocation14_spill] sm:$0xff] }
 0x1d5   : > { %4309 = vsinq.f32 %v1058_v41  ;;  %v7267_v50 = vand.u32 2147483647, %v7261_v32  ;;  %v644_v62 = vsub.s32 4, %v7270_v46  ;;  %v1363_v24 = vxor.u32 2147483648, %v1362_v54 }
 0x1d6   : > { %4311 = vcosq.f32 %v1161_v10  ;;  %v7271_v6 = vand.u32 2147483647, %v7265_v35  ;;  %v3881_v34 = vadd.s32 4294967294, %v935_v23  ;;  %v849_v18 = vsel %vm766_vm15, %v848_v20, %v847_v29 }
 0x1d7   : > { %vm5346_vm0 = vcmp.le.f32.partialorder %v7267_v50, 0.7853982  ;;  %4313 = vsinq.f32 %v1161_v10  ;;  %vm1178_vm2 = vcmp.lt.s32.totalorder %v7274_v25, 0  ;;  %vm1281_vm3 = vcmp.lt.s32.totalorder %v7275_v26, 0 }
 0x1d8   : > { %vm5353_vm1 = vcmp.le.f32.partialorder %v7271_v6, 0.7853982  ;;  %v646_v45 = vsel %vm5346_vm0, %v7261_v32, %v643_v37  ;;  %v1260_v57 = vxor.u32 2147483648, %v1259_v5  ;;  %v745_v48 = vxor.u32 2147483648, %v744_v3 }
 0x1d9   : > { %v747_v1 = vsub.s32 4, %v5236_v63  ;;  %vm3882_vm4 = vcmp.lt.s32.totalorder %v3881_v34, 0  ;;  %v923_v31 = vadd.s32 %v5263_v33, %v5251_v16  ;;  %v645_v19 = vsel %vm560_vm12, %v644_v62, %v7270_v46  ;;  %v7282_v33 = vld [vmem:[#allocation10_spill] sm:$0xff] }
 0x1da   : > { %v938_v55 = vsel %vm3882_vm4, 0, %v3881_v34  ;;  %4315 = vcosq.f32 %v646_v45  ;;  %v1364_v22 = vsel %vm1281_vm3, %v1363_v24, %v1362_v54  ;;  %v7276_v28 = vand.u32 2147483647, %v7266_v40 }
 0x1db   : > { %v939_v51 = vsub.s32 32, %v938_v55  ;;  %v943_v61 = vsub.s32 4294967266, %v938_v55  ;;  %v7279_v0 = vand.u32 2147483647, %v7275_v26  ;;  %4317 = vsinq.f32 %v646_v45 }
 0x1dc   : > { %vm5374_vm6 = vcmp.le.f32.partialorder %v7276_v28, 0.7853982  ;;  %v850_v30 = vsub.s32 4, %v7282_v33  ;;  %v746_v15 = vsel %vm663_vm14, %v745_v48, %v744_v3  ;;  %v940_v21 = vshll.u32 %v5318_v17, %v938_v55 }
 0x1dd   : > { %vm5380_vm7 = vcmp.le.f32.partialorder %v7279_v0, 0.7853982  ;;  %v852_v29 = vsel %vm5374_vm6, %v7266_v40, %v849_v18  ;;  %v941_v2 = vshrl.u32 %v923_v31, %v939_v51  ;;  %v944_v11 = vadd.s32 127, %v943_v61  ;;  %v5401_v9 = vpop.eup %4307 }
 0x1de   : > { %v1261_v60 = vsel %vm1178_vm2, %v1260_v57, %v1259_v5  ;;  %v1367_v41 = vsel %vm5380_vm7, %v7275_v26, %v1364_v22  ;;  %v748_v42 = vsel %vm663_vm14, %v747_v1, %v5236_v63  ;;  %v647_v59 = vsel %vm5346_vm0, 0, %v645_v19 }
 0x1df   : > { %v942_v54 = vor.u32 %v941_v2, %v940_v21  ;;  %v945_v17 = vshll.u32 %v944_v11, 23  ;;  %4319 = vcosq.f32 %v852_v29  ;;  %v1159_v7 = vsub.s32 4, %v7283_v8  ;;  %v5404_v37 = vpop.eup %4309 }
 0x1e0   : > { %v7284_v20 = vand.u32 2147483647, %v7274_v25  ;;  %v749_v63 = vsel %vm5353_vm1, %v7265_v35, %v746_v15  ;;  %v953_v5 = vsub.s32 4, %v5304_v27  ;;  %4321 = vsinq.f32 %v852_v29  ;;  %v5416_v3 = vpop.eup %4311 }
 0x1e1   : > { %4323 = vcosq.f32 %v1367_v41  ;;  %vm869_vm9 = vcmp.lt.s32.totalorder %v4800_v53, 0  ;;  %v946_v23 = vor.u32 4788187, %v945_v17  ;;  %v851_v50 = vsel %vm766_vm15, %v850_v30, %v7282_v33  ;;  %v5422_v12 = vpop.eup %4313 }
 0x1e2   : > { %vm5408_vm5 = vcmp.le.f32.partialorder %v7284_v20, 0.7853982  ;;  %4325 = vsinq.f32 %v1367_v41  ;;  %v750_v62 = vsel %vm5353_vm1, 0, %v748_v42  ;;  %v5429_v24 = vand.u32 3, %v647_v59 }
 0x1e3   : > { %v1264_v46 = vsel %vm5408_vm5, %v7274_v25, %v1261_v60  ;;  %4327 = vcosq.f32 %v749_v63  ;;  %v947_v6 = vand.u32 2147483647, %v946_v23  ;;  %v949_v34 = vcvt.s32.f32 %v942_v54  ;;  %v7289_v60 = vld [vmem:[#allocation11_spill] sm:$0xff] }
 0x1e4   : > { %v1160_v45 = vsel %vm1075_vm11, %v1159_v7, %v7283_v8  ;;  %v4316_v18 = vpop.eup %4315  ;;  %4329 = vsinq.f32 %v749_v63  ;;  %v954_v57 = vsel %vm869_vm9, %v953_v5, %v5304_v27  ;;  %v853_v48 = vsel %vm5374_vm6, 0, %v851_v50 }
 0x1e5   : > { %v1365_v58 = vsub.s32 4, %v5177_v52  ;;  %4331 = vcosq.f32 %v1264_v46  ;;  %v950_v1 = vmul.f32 %v949_v34, %v947_v6  ;;  %v4318_v31 = vpop.eup %4317  ;;  %v5440_v55 = vand.u32 3, %v750_v62 }
 0x1e6   : > { %4333 = vsinq.f32 %v1264_v46  ;;  %vm5444_vm11 = vcmp.le.f32.partialorder %v867_v39, 0.7853982  ;;  %v5450_v51 = vand.u32 3, %v853_v48  ;;  %v1162_v61 = vsel %vm5331_vm13, 0, %v1160_v45 }
 0x1e7   : > { %v951_v22 = vxor.u32 2147483648, %v950_v1  ;;  %v956_v27 = vsel %vm5444_vm11, 0, %v954_v57  ;;  %vm652_vm12 = vcmp.lt.s32.totalorder %v5429_v24, 2  ;;  %v657_v28 = vxor.u32 2147483648, %v4316_v18 }
 0x1e8   : > { %v1366_v43 = vsel %vm1281_vm3, %v1365_v58, %v5177_v52  ;;  %vm653_vm14 = vcmp.eq.s32.totalorder %v5429_v24, 0  ;;  %v654_v33 = vxor.u32 2147483648, %v4318_v31  ;;  %v1262_v30 = vsub.s32 4, %v5106_v36 }
 0x1e9   : > { %v4320_v39 = vpop.eup %4319  ;;  %v952_v0 = vsel %vm869_vm9, %v951_v22, %v950_v1  ;;  %v7216_v29 = vmov 0.0   ;;  %v5466_v21 = vand.u32 3, %v956_v27  ;;  %vm656_vm13 = vcmp.eq.s32.totalorder %v5429_v24, 2 }
 0x1ea   : > { %1487 = vmatprep.mubr.f32.mxu1 %v7216_v29  ;;  %v4322_v4 = vpop.eup %4321  ;;  %v955_v15 = vsel %vm5444_vm11, %v4800_v53, %v952_v0  ;;  %v1166_v52 = vand.u32 3, %v1162_v61  ;;  %vm858_vm15 = vcmp.lt.s32.totalorder %v5450_v51, 2  ;;  %v1368_v11 = vsel %vm5380_vm7, 0, %v1366_v43 }
 0x1eb   : > { %v4324_v2 = vpop.eup %4323  ;;  %4335 = vcosq.f32 %v955_v15  ;;  %v1056_v41 = vsub.s32 4, %v7289_v60  ;;  %vm756_vm0 = vcmp.eq.s32.totalorder %v5440_v55, 0  ;;  %vm759_vm1 = vcmp.eq.s32.totalorder %v5440_v55, 2 }
 0x1ec   : > { %v4326_v42 = vpop.eup %4325  ;;  %4337 = vsinq.f32 %v955_v15  ;;  %v658_v59 = vsel %vm656_vm13, %v657_v28, %v4318_v31  ;;  %v1169_v54 = vxor.u32 2147483648, %v5422_v12  ;;  %v1172_v17 = vxor.u32 2147483648, %v5416_v3 }
 0x1ed   : > { %v4328_v8 = vpop.eup %4327  ;;  %v655_v7 = vsel %vm653_vm14, %v4316_v18, %v654_v33  ;;  %v860_v20 = vxor.u32 2147483648, %v4322_v4  ;;  %v863_v16 = vxor.u32 2147483648, %v4320_v39  ;;  %v1263_v63 = vsel %vm1178_vm2, %v1262_v30, %v5106_v36 }
 0x1ee   : > { %v4330_v5 = vpop.eup %4329  ;;  %vm856_vm3 = vweird.f32 %v7266_v40  ;;  %vm859_vm4 = vcmp.eq.s32.totalorder %v5450_v51, 0  ;;  %vm862_vm6 = vcmp.eq.s32.totalorder %v5450_v51, 2  ;;  %vm1168_vm7 = vcmp.eq.s32.totalorder %v1166_v52, 0 }
 0x1ef   : > { %v1372_v23 = vand.u32 3, %v1368_v11  ;;  %v4332_v50 = vpop.eup %4331  ;;  %vm755_vm9 = vcmp.lt.s32.totalorder %v5440_v55, 2  ;;  %vm1171_vm14 = vcmp.eq.s32.totalorder %v1166_v52, 2  ;;  %v1375_v46 = vxor.u32 2147483648, %v4326_v42 }
 0x1f0   : > { %v1378_v62 = vxor.u32 2147483648, %v4324_v2  ;;  %v1057_v36 = vsel %vm972_vm8, %v1056_v41, %v7289_v60  ;;  %v4334_v6 = vpop.eup %4333  ;;  %v659_v34 = vsel %vm652_vm12, %v655_v7, %v658_v59  ;;  %v1170_v45 = vsel %vm1168_vm7, %v5416_v3, %v1169_v54 }
 0x1f1   : > { %v1173_v18 = vsel %vm1171_vm14, %v1172_v17, %v5422_v12  ;;  %v1265_v57 = vsel %vm5408_vm5, 0, %v1263_v63  ;;  %v757_v48 = vxor.u32 2147483648, %v4330_v5  ;;  %v760_v58 = vxor.u32 2147483648, %v4328_v8 }
 0x1f2   : > { %vm961_vm13 = vcmp.lt.s32.totalorder %v5466_v21, 2  ;;  %v861_v1 = vsel %vm859_vm4, %v4320_v39, %v860_v20  ;;  %v864_v31 = vsel %vm862_vm6, %v863_v16, %v4322_v4  ;;  %vm753_vm8 = vweird.f32 %v7265_v35 }
 0x1f3   : > { %vm959_vm12 = vweird.f32 %v4800_v53  ;;  %vm1165_vm7 = vweird.f32 %v7260_v38  ;;  %vm1167_vm14 = vcmp.lt.s32.totalorder %v1166_v52, 2  ;;  %vm1374_vm2 = vcmp.eq.s32.totalorder %v1372_v23, 0 }
 0x1f4   : > { %vm1377_vm11 = vcmp.eq.s32.totalorder %v1372_v23, 2  ;;  %v1059_v10 = vsel %vm5312_vm10, 0, %v1057_v36  ;;  %vm650_vm5 = vweird.f32 %v7261_v32  ;;  %v1174_v3 = vsel %vm1167_vm14, %v1170_v45, %v1173_v18  ;;  %v1382_v32 = vld [vmem:[%s7165_s3] sm:$0xff] }
 0x1f5   : > { %v1376_v12 = vsel %vm1374_vm2, %v4324_v2, %v1375_v46  ;;  %v1379_v24 = vsel %vm1377_vm11, %v1378_v62, %v4326_v42  ;;  %v1269_v19 = vand.u32 3, %v1265_v57  ;;  %v865_v22 = vsel %vm858_vm15, %v861_v1, %v864_v31  ;;  %v4336_v28 = vpop.eup %4335 }
 0x1f6   : > { %vm1371_vm4 = vweird.f32 %v7275_v26  ;;  %v1272_v27 = vxor.u32 2147483648, %v4334_v6  ;;  %v1275_v61 = vxor.u32 2147483648, %v4332_v50  ;;  %v758_v43 = vsel %vm756_vm0, %v4328_v8, %v757_v48  ;;  %v4338_v0 = vpop.eup %4337 }
 0x1f7   : > { %v761_v47 = vsel %vm759_vm1, %v760_v58, %v4330_v5  ;;  %vm1373_vm10 = vcmp.lt.s32.totalorder %v1372_v23, 2  ;;  %v1063_v39 = vand.u32 3, %v1059_v10  ;;  %v966_v33 = vxor.u32 2147483648, %v4336_v28  ;;  %v1393_v5 = vpop.permute.xlu0 %1392 }
 0x1f8   : > { %v1380_v30 = vsel %vm1373_vm10, %v1376_v12, %v1379_v24  ;;  %v1066_v4 = vxor.u32 2147483648, %v5404_v37  ;;  %v1069_v51 = vxor.u32 2147483648, %v5401_v9  ;;  %v963_v15 = vxor.u32 2147483648, %v4338_v0 }
 0x1f9   : > { %v866_v52 = vsel %vm856_vm3, nan, %v865_v22  ;;  %vm1271_vm15 = vcmp.eq.s32.totalorder %v1269_v19, 0  ;;  %vm1274_vm6 = vcmp.eq.s32.totalorder %v1269_v19, 2  ;;  %v762_v2 = vsel %vm755_vm9, %v758_v43, %v761_v47 }
 0x1fa   : > { %vm7290_vm0 = vcmp.eq.s32.totalorder %v5466_v21, 2  ;;  %v1273_v60 = vsel %vm1271_vm15, %v4332_v50, %v1272_v27  ;;  %v1276_v41 = vsel %vm1274_vm6, %v1275_v61, %v4334_v6  ;;  %vm7291_vm1 = vcmp.eq.s32.totalorder %v5466_v21, 0 }
 0x1fb   : > { %v967_v11 = vsel %vm7290_vm0, %v966_v33, %v4338_v0  ;;  %v964_v42 = vsel %vm7291_vm1, %v4336_v28, %v963_v15  ;;  %v1381_v59 = vsel %vm1371_vm4, nan, %v1380_v30  ;;  %vm1065_vm11 = vcmp.eq.s32.totalorder %v1063_v39, 0 }
 0x1fc   : > { %vm1068_vm2 = vcmp.eq.s32.totalorder %v1063_v39, 2  ;;  %v968_v40 = vsel %vm961_vm13, %v964_v42, %v967_v11  ;;  %v1067_v54 = vsel %vm1065_vm11, %v5401_v9, %v1066_v4  ;;  %vm1270_vm3 = vcmp.lt.s32.totalorder %v1269_v19, 2 }
 0x1fd   : > { %v1070_v55 = vsel %vm1068_vm2, %v1069_v51, %v5404_v37  ;;  %v763_v17 = vsel %vm753_vm8, nan, %v762_v2  ;;  %v969_v8 = vsel %vm959_vm12, nan, %v968_v40  ;;  %v1175_v26 = vsel %vm1165_vm7, nan, %v1174_v3  ;;  %v1385_v37 = vld [vmem:[%s7165_s3 + $0x18] sm:$0xff] }
 0x1fe   : > { %v1277_v7 = vsel %vm1270_vm3, %v1273_v60, %v1276_v41  ;;  %v4089_v20 = vpack.c.bf16 %v969_v8, %v763_v17  ;;  %v660_v21 = vsel %vm650_vm5, nan, %v659_v34  ;;  %v4093_v16 = vpack.c.bf16 %v1381_v59, %v1175_v26  ;;  %v1398_v34 = vpop.permute.xlu1 %1397 }
 0x1ff   : > { %vm1064_vm9 = vcmp.lt.s32.totalorder %v1063_v39, 2  ;;  %v4091_v9 = vpack.c.bf16 %v866_v52, %v660_v21  ;;  %vm1268_vm13 = vweird.f32 %v7274_v25  ;;  %vm1062_vm8 = vweird.f32 %v7254_v13  ;;  %v1383_v25 = vld [vmem:[%s7165_s3 + $0x8] sm:$0xff]  ;;  %v1384_v13 = vld [vmem:[%s7165_s3 + $0x10] sm:$0xff] }
 0x200   : > { %v1071_v63 = vsel %vm1064_vm9, %v1067_v54, %v1070_v55  ;;  %4090 = vmatprep.subr.bf16.mxu1 %v4089_v20  ;;  %v1278_v35 = vsel %vm1268_vm13, nan, %v1277_v7  ;;  %vm1410_vm12 = vcmask 261120   ;;  %v7292_v20 = vmov 920167782  }
 0x201   : > { %4092 = vmatpush1.bf16.msra.mxu1 %v4091_v9  ;;  %v1072_v53 = vsel %vm1062_vm8, nan, %v1071_v63 }
 0x202   : > { %4094 = vmatprep.subr.bf16.mxu1 %v4093_v16  ;;  %v4095_v38 = vpack.c.bf16 %v1278_v35, %v1072_v53 }
 0x205   : > { %4096 = vmatpush1.bf16.msra.mxu1 %v4095_v38  ;;  %v7293_v38 = vmov 1326507024  }
 0x208   : > { %3899 = vmatmul.mubr.msk.f32.vlgmr.msra.gmra.mrb[0].mxu1 %vm1410_vm12, %v1382_v32 }
 0x209   : > { %1493 = vmatprep.mubr.f32.mxu1 %v7216_v29 }
 0x20c   : > { %3900 = vmatmul.mubr.msk.f32.gmra.mrb[2].mxu1 %vm1410_vm12, %v1383_v25 }
 0x20d   : > { %1499 = vmatprep.mubr.f32.mxu1 %v7216_v29 }
 0x210   : > { %3901 = vmatmul.mubr.msk.f32.gmra.mrb[4].mxu1 %vm1410_vm12, %v1384_v13 }
 0x211   : > { %1505 = vmatprep.mubr.f32.mxu1 %v7216_v29 }
 0x214   : > { %3902 = vmatmul.mubr.msk.f32.gmra.mrb[6].mxu1 %vm1410_vm12, %v1385_v37 }
 0x215   : > { %2442 = vmatprep.mubr.f32.mxu1 %v7216_v29 }
 0x2db   : > { %v1489_v23 = vpop.f32.mrb[0].mxu1 }
 0x2dc   : > { %v5561_v50 = vadd.f32 %v1489_v23, %v1393_v5  ;;  %v1491_v46 = vpop.f32.mrb[1].mxu1 }
 0x2dd   : > { %v5563_v62 = vadd.f32 %v1491_v46, %v1393_v5 }
 0x2de   : > { %v1512_v36 = vand.u32 2147483647, %v5561_v50  ;;  %v1515_v6 = vand.u32 2139095040, %v5561_v50 }
 0x2df   : > { %v1615_v45 = vand.u32 2147483647, %v5563_v62  ;;  %v1618_v18 = vand.u32 2139095040, %v5563_v62  ;;  %v1495_v57 = vpop.f32.mrb[2].mxu1 }
 0x2e0   : > { %v1516_v48 = vshrl.u32 %v1515_v6, 23  ;;  %v1519_v58 = vand.u32 8388607, %v1512_v36  ;;  %v5571_v1 = vadd.f32 %v1495_v57, %v1398_v34  ;;  %v1497_v31 = vpop.f32.mrb[3].mxu1 }
 0x2e1   : > { %v1619_v10 = vshrl.u32 %v1618_v18, 23  ;;  %v1622_v3 = vand.u32 8388607, %v1615_v45  ;;  %v5583_v2 = vadd.f32 %v1497_v31, %v1398_v34 }
 0x2e2   : > { %v3903_v12 = vadd.s32 4294967169, %v1516_v48  ;;  %v1721_v19 = vand.u32 2139095040, %v5571_v1  ;;  %v1520_v27 = vor.u32 8388608, %v1519_v58  ;;  %v1718_v47 = vand.u32 2147483647, %v5571_v1 }
 0x2e3   : > { %v3907_v24 = vadd.s32 4294967169, %v1619_v10  ;;  %v5576_v22 = vpop.f32.mrb[4].mxu1  ;;  %v1623_v28 = vor.u32 8388608, %v1622_v3 }
 0x2e4   : > { %v1522_v61 = vadd.s32 1, %v3903_v12  ;;  %v1722_v39 = vshrl.u32 %v1721_v19, 23  ;;  %v5579_v0 = vpop.f32.mrb[5].mxu1  ;;  %v5587_v60 = vshll.u32 %v1520_v27, 8  ;;  %v5595_v59 = vand.u32 8388607, %v1718_v47 }
 0x2e5   : > { %v1625_v43 = vadd.s32 1, %v3907_v24  ;;  %v5591_v42 = vshll.u32 %v1623_v28, 8 }
 0x2e6   : > { %vm1523_vm7 = vcmp.gt.s32.totalorder %v1522_v61, 0  ;;  %v3911_v30 = vadd.s32 4294967169, %v1722_v39 }
 0x2e7   : > { %v1524_v33 = vsel %vm1523_vm7, %v1522_v61, 0  ;;  %vm1626_vm14 = vcmp.gt.s32.totalorder %v1625_v43, 0  ;;  %v5581_v4 = vpop.f32.mrb[6].mxu1 }
 0x2e8   : > { %v1525_v51 = vshrl.u32 %v1524_v33, 5  ;;  %v1526_v15 = vand.u32 31, %v1524_v33  ;;  %v1627_v52 = vsel %vm1626_vm14, %v1625_v43, 0  ;;  %v5585_v11 = vpop.f32.mrb[7].mxu1  ;;  %v5598_v17 = vadd.s32 1, %v3911_v30 }
 0x2e9   : > { %v5589_v41 = vshrl.u32 %v1627_v52, 5  ;;  %v1629_v55 = vand.u32 31, %v1627_v52 }
 0x2ea   : > { %v1527_v40 = vsub.s32 32, %v1526_v15  ;;  %v1529_v54 = vshll.u32 %v7248_v14, %v1526_v15  ;;  %v1532_v8 = vshll.u32 %v7249_v56, %v1526_v15  ;;  %v1535_v26 = vshll.u32 %v7250_v49, %v1526_v15 }
 0x2eb   : > { %v1538_v7 = vshll.u32 %v7243_v44, %v1526_v15  ;;  %v1541_v21 = vshll.u32 %v7292_v20, %v1526_v15  ;;  %vm1544_vm5 = vcmp.lt.s32.totalorder %v1525_v51, 1  ;;  %vm1545_vm4 = vcmp.lt.s32.totalorder %v1525_v51, 2 }
 0x2ec   : > { %v1530_v16 = vshrl.u32 %v7249_v56, %v1527_v40  ;;  %v1533_v9 = vshrl.u32 %v7250_v49, %v1527_v40  ;;  %v1536_v63 = vshrl.u32 %v7243_v44, %v1527_v40  ;;  %v1528_v35 = vshrl.u32 %v7248_v14, %v1527_v40 }
 0x2ed   : > { %v1539_v53 = vshrl.u32 %v7292_v20, %v1527_v40  ;;  %v1542_v32 = vshrl.u32 %v7293_v38, %v1527_v40  ;;  %v1630_v5 = vsub.s32 32, %v1629_v55  ;;  %vm1546_vm10 = vcmp.lt.s32.totalorder %v1525_v51, 3 }
 0x2ee   : > { %v1531_v25 = vor.u32 %v1530_v16, %v1529_v54  ;;  %v1534_v13 = vor.u32 %v1533_v9, %v1532_v8  ;;  %v1537_v37 = vor.u32 %v1536_v63, %v1535_v26  ;;  %vm1547_vm15 = vcmp.lt.s32.totalorder %v1525_v51, 4 }
 0x2ef   : > { %v1540_v23 = vor.u32 %v1539_v53, %v1538_v7  ;;  %v1543_v46 = vor.u32 %v1542_v32, %v1541_v21  ;;  %v1632_v10 = vshll.u32 %v7248_v14, %v1629_v55  ;;  %v1633_v24 = vshrl.u32 %v7249_v56, %v1630_v5 }
 0x2f0   : > { %v1548_v6 = vsel %vm1544_vm5, %v1528_v35, %v1531_v25  ;;  %v1549_v34 = vsel %vm1547_vm15, %v1537_v37, 2102212464  ;;  %v1552_v18 = vsel %vm1544_vm5, %v1531_v25, %v1534_v13  ;;  %v1556_v57 = vsel %vm1544_vm5, %v1534_v13, %v1537_v37 }
 0x2f1   : > { %v1550_v48 = vsel %vm1546_vm10, %v1534_v13, %v1549_v34  ;;  %v1553_v58 = vsel %vm1547_vm15, %v1540_v23, 920167782  ;;  %v1557_v31 = vsel %vm1547_vm15, %v1543_v46, 1326507024  ;;  %v1635_v19 = vshll.u32 %v7249_v56, %v1629_v55 }
 0x2f2   : > { %v1554_v3 = vsel %vm1546_vm10, %v1537_v37, %v1553_v58  ;;  %v1558_v12 = vsel %vm1546_vm10, %v1540_v23, %v1557_v31  ;;  %v1551_v27 = vsel %vm1545_vm4, %v1548_v6, %v1550_v48  ;;  %v1636_v43 = vshrl.u32 %v7250_v49, %v1630_v5 }
 0x2f3   : > { %v1555_v61 = vsel %vm1545_vm4, %v1552_v18, %v1554_v3  ;;  %v1559_v28 = vsel %vm1545_vm4, %v1556_v57, %v1558_v12  ;;  %v1634_v52 = vor.u32 %v1633_v24, %v1632_v10  ;;  %v1638_v54 = vshll.u32 %v7250_v49, %v1629_v55 }
 0x2f4   : > { %v5621_v39 = vmul.u32.u64.low %v5587_v60, %v1559_v28  ;;  %v5622_v33 = vmul.u32.u64.high %v5587_v60, %v1559_v28, %v5621_v39  ;;  %v5625_v30 = vmul.u32.u64.low %v5587_v60, %v1555_v61  ;;  %v5626_v15 = vmul.u32.u64.high %v5587_v60, %v1555_v61, %v5625_v30 }
 0x2f5   : > { %v1637_v40 = vor.u32 %v1636_v43, %v1635_v19  ;;  %v1639_v8 = vshrl.u32 %v7243_v44, %v1630_v5  ;;  %v1631_v51 = vshrl.u32 %v7248_v14, %v1630_v5  ;;  %v1641_v26 = vshll.u32 %v7243_v44, %v1629_v55 }
 0x2f6   : > { %v1642_v7 = vshrl.u32 %v7292_v20, %v1630_v5  ;;  %v1645_v21 = vshrl.u32 %v7293_v38, %v1630_v5  ;;  %v1567_v16 = vmul.u32 %v5587_v60, %v1551_v27  ;;  %v1644_v63 = vshll.u32 %v7292_v20, %v1629_v55 }
 0x2f7   : > { %v1640_v9 = vor.u32 %v1639_v8, %v1638_v54  ;;  %vm1647_vm6 = vcmp.lt.s32.totalorder %v5589_v41, 1  ;;  %vm1569_vm0 = vc.u32 %v5622_v33, %v5625_v30  ;;  %v1570_v35 = vadd.s32 1, %v5626_v15 }
 0x2f8   : > { %v1643_v53 = vor.u32 %v1642_v7, %v1641_v26  ;;  %vm1648_vm1 = vcmp.lt.s32.totalorder %v5589_v41, 2  ;;  %v1646_v32 = vor.u32 %v1645_v21, %v1644_v63  ;;  %vm1649_vm11 = vcmp.lt.s32.totalorder %v5589_v41, 3 }
 0x2f9   : > { %vm1650_vm2 = vcmp.lt.s32.totalorder %v5589_v41, 4  ;;  %v1655_v25 = vsel %vm1647_vm6, %v1634_v52, %v1637_v40  ;;  %v1571_v60 = vsel %vm1569_vm0, %v1570_v35, %v5626_v15  ;;  %v1659_v37 = vsel %vm1647_vm6, %v1637_v40, %v1640_v9 }
 0x2fa   : > { %v1652_v13 = vsel %vm1650_vm2, %v1640_v9, 2102212464  ;;  %v1656_v55 = vsel %vm1650_vm2, %v1643_v53, 920167782  ;;  %v1572_v5 = vadd.s32 %v1571_v60, %v1567_v16  ;;  %v1651_v23 = vsel %vm1647_vm6, %v1631_v51, %v1634_v52 }
 0x2fb   : > { %v1657_v46 = vsel %vm1649_vm11, %v1640_v9, %v1656_v55  ;;  %v1660_v6 = vsel %vm1650_vm2, %v1646_v32, 1326507024  ;;  %v1653_v34 = vsel %vm1649_vm11, %v1637_v40, %v1652_v13  ;;  %vm1729_vm3 = vcmp.gt.s32.totalorder %v5598_v17, 0 }
 0x2fc   : > { %v1658_v18 = vsel %vm1648_vm1, %v1655_v25, %v1657_v46  ;;  %v1661_v57 = vsel %vm1649_vm11, %v1643_v53, %v1660_v6  ;;  %v1573_v48 = vadd.s32 536870912, %v1572_v5  ;;  %v1730_v24 = vsel %vm1729_vm3, %v5598_v17, 0 }
 0x2fd   : > { %v1662_v58 = vsel %vm1648_vm1, %v1659_v37, %v1661_v57  ;;  %v5651_v31 = vmul.u32.u64.low %v5591_v42, %v1658_v18  ;;  %v5652_v10 = vmul.u32.u64.high %v5591_v42, %v1658_v18, %v5651_v31  ;;  %v1824_v19 = vand.u32 2139095040, %v5583_v2 }
 0x2fe   : > { %v5656_v3 = vmul.u32.u64.low %v5591_v42, %v1662_v58  ;;  %v5657_v12 = vmul.u32.u64.high %v5591_v42, %v1662_v58, %v5656_v3  ;;  %v5661_v27 = vshrl.u32 %v1573_v48, 30  ;;  %v1654_v61 = vsel %vm1648_vm1, %v1651_v23, %v1653_v34 }
 0x2ff   : > { %v1732_v28 = vand.u32 31, %v1730_v24  ;;  %v1673_v39 = vadd.s32 1, %v5652_v10  ;;  %v1670_v52 = vmul.u32 %v5591_v42, %v1654_v61  ;;  %v1726_v17 = vor.u32 8388608, %v5595_v59 }
 0x300   : > { %v1575_v43 = vshll.u32 %v5661_v27, 30  ;;  %vm1672_vm9 = vc.u32 %v5657_v12, %v5651_v31  ;;  %v1825_v40 = vshrl.u32 %v1824_v19, 23  ;;  %v1731_v41 = vshrl.u32 %v1730_v24, 5 }
 0x301   : > { %v1733_v15 = vsub.s32 32, %v1732_v28  ;;  %v1674_v8 = vsel %vm1672_vm9, %v1673_v39, %v5652_v10  ;;  %v1735_v51 = vshll.u32 %v7248_v14, %v1732_v28  ;;  %v1738_v21 = vshll.u32 %v7249_v56, %v1732_v28 }
 0x302   : > { %v5671_v54 = vsub.s32 %v1572_v5, %v1575_v43  ;;  %v1675_v26 = vadd.s32 %v1674_v8, %v1670_v52  ;;  %v1741_v9 = vshll.u32 %v7250_v49, %v1732_v28  ;;  %v1744_v63 = vshll.u32 %v7243_v44, %v1732_v28 }
 0x303   : > { %v1736_v7 = vshrl.u32 %v7249_v56, %v1733_v15  ;;  %v1739_v42 = vshrl.u32 %v7250_v49, %v1733_v15  ;;  %v1742_v59 = vshrl.u32 %v7243_v44, %v1733_v15  ;;  %v1745_v25 = vshrl.u32 %v7292_v20, %v1733_v15 }
 0x304   : > { %v1578_v16 = vsub.s32 0, %v5671_v54  ;;  %v1676_v35 = vadd.s32 536870912, %v1675_v26  ;;  %v1747_v55 = vshll.u32 %v7292_v20, %v1732_v28  ;;  %v1748_v37 = vshrl.u32 %v7293_v38, %v1733_v15 }
 0x305   : > { %v1737_v53 = vor.u32 %v1736_v7, %v1735_v51  ;;  %v1740_v32 = vor.u32 %v1739_v42, %v1738_v21  ;;  %v1743_v13 = vor.u32 %v1742_v59, %v1741_v9  ;;  %v1746_v23 = vor.u32 %v1745_v25, %v1744_v63 }
 0x306   : > { %v3904_v60 = vmin.u32 %v1578_v16, %v5671_v54  ;;  %v5686_v5 = vshrl.u32 %v1676_v35, 30  ;;  %v1766_v46 = vshll.u32 %v1726_v17, 8  ;;  %v1821_v6 = vand.u32 2147483647, %v5583_v2 }
 0x307   : > { %v1749_v18 = vor.u32 %v1748_v37, %v1747_v55  ;;  %vm1750_vm13 = vcmp.lt.s32.totalorder %v1731_v41, 1  ;;  %v3915_v57 = vadd.s32 4294967169, %v1825_v40  ;;  %vm1751_vm8 = vcmp.lt.s32.totalorder %v1731_v41, 2 }
 0x308   : > { %v1580_v34 = vclz %v3904_v60  ;;  %v1678_v48 = vshll.u32 %v5686_v5, 30  ;;  %vm1753_vm7 = vcmp.lt.s32.totalorder %v1731_v41, 4  ;;  %v1758_v58 = vsel %vm1750_vm13, %v1737_v53, %v1740_v32 }
 0x309   : > { %vm1752_vm14 = vcmp.lt.s32.totalorder %v1731_v41, 3  ;;  %v1759_v3 = vsel %vm1753_vm7, %v1746_v23, 920167782  ;;  %v1762_v24 = vsel %vm1750_vm13, %v1740_v32, %v1743_v13  ;;  %v1755_v61 = vsel %vm1753_vm7, %v1743_v13, 2102212464 }
 0x30a   : > { %v3905_v10 = vadd.s32 4294967294, %v1580_v34  ;;  %v5692_v19 = vsub.s32 %v1675_v26, %v1678_v48  ;;  %v1760_v28 = vsel %vm1752_vm14, %v1743_v13, %v1759_v3  ;;  %v1763_v43 = vsel %vm1753_vm7, %v1749_v18, 1326507024 }
 0x30b   : > { %v1734_v39 = vshrl.u32 %v7248_v14, %v1733_v15  ;;  %v1761_v52 = vsel %vm1751_vm8, %v1758_v58, %v1760_v28  ;;  %v1764_v17 = vsel %vm1752_vm14, %v1746_v23, %v1763_v43  ;;  %v1831_v7 = vadd.s32 1, %v3915_v57 }
 0x30c   : > { %vm3906_vm5 = vcmp.lt.s32.totalorder %v3905_v10, 0  ;;  %v1681_v8 = vsub.s32 0, %v5692_v19  ;;  %v1765_v51 = vsel %vm1751_vm8, %v1762_v24, %v1764_v17  ;;  %v1756_v42 = vsel %vm1752_vm14, %v1740_v32, %v1755_v61  ;;  %v1403_v24 = vpop.permute.xlu0 %1402 }
 0x30d   : > { %v1583_v40 = vsel %vm3906_vm5, 0, %v3905_v10  ;;  %v1754_v26 = vsel %vm1750_vm13, %v1734_v39, %v1737_v53  ;;  %v5703_v9 = vmul.u32.u64.low %v1766_v46, %v1765_v51  ;;  %v5704_v59 = vmul.u32.u64.high %v1766_v46, %v1765_v51, %v5703_v9 }
 0x30e   : > { %v1588_v21 = vsub.s32 4294967266, %v1583_v40  ;;  %v3908_v16 = vmin.u32 %v1681_v8, %v5692_v19  ;;  %vm1832_vm4 = vcmp.gt.s32.totalorder %v1831_v7, 0  ;;  %v1584_v25 = vsub.s32 32, %v1583_v40 }
 0x30f   : > { %v5706_v63 = vmul.u32.u64.low %v1766_v46, %v1761_v52  ;;  %v5707_v35 = vmul.u32.u64.high %v1766_v46, %v1761_v52, %v5706_v63  ;;  %v1828_v13 = vand.u32 8388607, %v1821_v6  ;;  %v1833_v55 = vsel %vm1832_vm4, %v1831_v7, 0 }
 0x310   : > { %v1589_v15 = vadd.s32 127, %v1588_v21  ;;  %v1683_v60 = vclz %v3908_v16  ;;  %v1757_v53 = vsel %vm1751_vm8, %v1754_v26, %v1756_v42  ;;  %v1835_v32 = vand.u32 31, %v1833_v55 }
 0x311   : > { %v1568_v37 = vadd.s32 %v5625_v30, %v5622_v33  ;;  %vm1775_vm10 = vc.u32 %v5704_v59, %v5706_v63  ;;  %v1776_v18 = vadd.s32 1, %v5707_v35  ;;  %v1773_v48 = vmul.u32 %v1766_v46, %v1757_v53 }
 0x312   : > { %v3909_v23 = vadd.s32 4294967294, %v1683_v60  ;;  %v1590_v34 = vshll.u32 %v1589_v15, 23  ;;  %v1829_v58 = vor.u32 8388608, %v1828_v13  ;;  %v1836_v3 = vsub.s32 32, %v1835_v32 }
 0x313   : > { %v1586_v57 = vshrl.u32 %v1568_v37, %v1584_v25  ;;  %v1777_v41 = vsel %vm1775_vm10, %v1776_v18, %v5707_v35  ;;  %v1585_v61 = vshll.u32 %v5671_v54, %v1583_v40  ;;  %v1671_v28 = vadd.s32 %v5651_v31, %v5657_v12 }
 0x314   : > { %vm3910_vm15 = vcmp.lt.s32.totalorder %v3909_v23, 0  ;;  %v1778_v33 = vadd.s32 %v1777_v41, %v1773_v48  ;;  %v1591_v30 = vor.u32 4788187, %v1590_v34  ;;  %v5725_v43 = vadd.f32 %v5576_v22, %v1403_v24 }
 0x315   : > { %v5718_v10 = vsel %vm3910_vm15, 0, %v3909_v23  ;;  %v5728_v39 = vadd.f32 %v5579_v0, %v1403_v24  ;;  %v1587_v46 = vor.u32 %v1586_v57, %v1585_v61  ;;  %v5731_v8 = vshll.u32 %v1829_v58, 8 }
 0x316   : > { %v1691_v52 = vsub.s32 4294967266, %v5718_v10  ;;  %v1779_v17 = vadd.s32 536870912, %v1778_v33  ;;  %v1834_v51 = vshrl.u32 %v1833_v55, 5  ;;  %v1838_v54 = vshll.u32 %v7248_v14, %v1835_v32 }
 0x317   : > { %v1839_v40 = vshrl.u32 %v7249_v56, %v1836_v3  ;;  %v1842_v7 = vshrl.u32 %v7250_v49, %v1836_v3  ;;  %v1841_v22 = vshll.u32 %v7249_v56, %v1835_v32  ;;  %v1845_v0 = vshrl.u32 %v7243_v44, %v1836_v3 }
 0x318   : > { %v5736_v31 = vshrl.u32 %v1779_v17, 30  ;;  %v1848_v12 = vshrl.u32 %v7292_v20, %v1836_v3  ;;  %v1592_v21 = vand.u32 2147483647, %v1591_v30  ;;  %v1687_v26 = vsub.s32 32, %v5718_v10 }
 0x319   : > { %v1847_v42 = vshll.u32 %v7243_v44, %v1835_v32  ;;  %v1851_v16 = vshrl.u32 %v7293_v38, %v1836_v3  ;;  %v1594_v9 = vcvt.s32.f32 %v1587_v46  ;;  %v1692_v15 = vadd.s32 127, %v1691_v52 }
 0x31a   : > { %v1781_v35 = vshll.u32 %v5736_v31, 30  ;;  %v1844_v25 = vshll.u32 %v7250_v49, %v1835_v32  ;;  %v1840_v60 = vor.u32 %v1839_v40, %v1838_v54  ;;  %v1843_v13 = vor.u32 %v1842_v7, %v1841_v22 }
 0x31b   : > { %v1849_v55 = vor.u32 %v1848_v12, %v1847_v42  ;;  %v1850_v53 = vshll.u32 %v7292_v20, %v1835_v32  ;;  %v1837_v23 = vshrl.u32 %v7248_v14, %v1836_v3  ;;  %v7220_v18 = vand.u32 2147483647, %v5725_v43 }
 0x31c   : > { %v5747_v37 = vsub.s32 %v1778_v33, %v1781_v35  ;;  %v1846_v34 = vor.u32 %v1845_v0, %v1844_v25  ;;  %v1595_v57 = vmul.f32 %v1594_v9, %v1592_v21  ;;  %v1688_v48 = vshll.u32 %v5692_v19, %v5718_v10 }
 0x31d   : > { %v1689_v58 = vshrl.u32 %v1671_v28, %v1687_v26  ;;  %v1852_v41 = vor.u32 %v1851_v16, %v1850_v53  ;;  %v1693_v24 = vshll.u32 %v1692_v15, 23  ;;  %vm1853_vm6 = vcmp.lt.s32.totalorder %v1834_v51, 1 }
 0x31e   : > { %v1784_v61 = vsub.s32 0, %v5747_v37  ;;  %vm1856_vm0 = vcmp.lt.s32.totalorder %v1834_v51, 4  ;;  %vm1854_vm1 = vcmp.lt.s32.totalorder %v1834_v51, 2  ;;  %vm1855_vm11 = vcmp.lt.s32.totalorder %v1834_v51, 3 }
 0x31f   : > { %v1861_v32 = vsel %vm1853_vm6, %v1840_v60, %v1843_v13  ;;  %v1862_v33 = vsel %vm1856_vm0, %v1849_v55, 920167782  ;;  %v1858_v30 = vsel %vm1856_vm0, %v1846_v34, 2102212464  ;;  %v1865_v52 = vsel %vm1853_vm6, %v1843_v13, %v1846_v34 }
 0x320   : > { %v3912_v3 = vmin.u32 %v1784_v61, %v5747_v37  ;;  %v1863_v46 = vsel %vm1855_vm11, %v1846_v34, %v1862_v33  ;;  %v1596_v17 = vxor.u32 2147483648, %v1595_v57  ;;  %v1866_v10 = vsel %vm1856_vm0, %v1852_v41, 1326507024 }
 0x321   : > { %v1864_v19 = vsel %vm1854_vm1, %v1861_v32, %v1863_v46  ;;  %v1927_v28 = vand.u32 2139095040, %v5725_v43  ;;  %v1694_v54 = vor.u32 4788187, %v1693_v24  ;;  %v1857_v7 = vsel %vm1853_vm6, %v1837_v23, %v1840_v60 }
 0x322   : > { %v1786_v40 = vclz %v3912_v3  ;;  %v1867_v22 = vsel %vm1855_vm11, %v1849_v55, %v1866_v10  ;;  %v1859_v0 = vsel %vm1855_vm11, %v1843_v13, %v1858_v30  ;;  %v1690_v42 = vor.u32 %v1689_v58, %v1688_v48 }
 0x323   : > { %v1868_v12 = vsel %vm1854_vm1, %v1865_v52, %v1867_v22  ;;  %v5762_v21 = vmul.u32.u64.low %v5731_v8, %v1864_v19  ;;  %v5763_v26 = vmul.u32.u64.high %v5731_v8, %v1864_v19, %v5762_v21  ;;  %vm1514_vm2 = vcmp.lt.s32.totalorder %v5561_v50, 0 }
 0x324   : > { %v3913_v16 = vadd.s32 4294967294, %v1786_v40  ;;  %v5767_v9 = vmul.u32.u64.low %v5731_v8, %v1868_v12  ;;  %v5768_v15 = vmul.u32.u64.high %v5731_v8, %v1868_v12, %v5767_v9  ;;  %v1928_v35 = vshrl.u32 %v1927_v28, 23 }
 0x325   : > { %v1695_v25 = vand.u32 2147483647, %v1694_v54  ;;  %v1860_v60 = vsel %vm1854_vm1, %v1857_v7, %v1859_v0  ;;  %v1931_v13 = vand.u32 8388607, %v7220_v18  ;;  %v1597_v55 = vsel %vm1514_vm2, %v1596_v17, %v1595_v57 }
 0x326   : > { %vm3914_vm3 = vcmp.lt.s32.totalorder %v3913_v16, 0  ;;  %v1879_v53 = vadd.s32 1, %v5763_v26  ;;  %v3919_v23 = vadd.s32 4294967169, %v1928_v35  ;;  %v1697_v34 = vcvt.s32.f32 %v1690_v42 }
 0x327   : > { %v5777_v48 = vsel %vm3914_vm3, 0, %v3913_v16  ;;  %v2030_v58 = vand.u32 2139095040, %v5728_v39  ;;  %vm5782_vm9 = vcmp.le.f32.partialorder %v1512_v36, 0.7853982  ;;  %v1876_v51 = vmul.u32 %v5731_v8, %v1860_v60  ;;  %v5797_v36 = vpop.permute.xlu1 %1407 }
 0x328   : > { %vm1878_vm13 = vc.u32 %v5768_v15, %v5762_v21  ;;  %v1934_v57 = vadd.s32 1, %v3919_v23  ;;  %v5792_v24 = vsel %vm5782_vm9, %v5561_v50, %v1597_v55  ;;  %v5794_v61 = vmul.f32 %v1697_v34, %v1695_v25 }
 0x329   : > { %v1880_v32 = vsel %vm1878_vm13, %v1879_v53, %v5763_v26  ;;  %v1932_v33 = vor.u32 8388608, %v1931_v13  ;;  %v1794_v3 = vsub.s32 4294967266, %v5777_v48  ;;  %v1598_v8 = vsub.s32 4, %v5661_v27 }
 0x32a   : > { %v1881_v30 = vadd.s32 %v1880_v32, %v1876_v51  ;;  %vm1935_vm8 = vcmp.gt.s32.totalorder %v1934_v57, 0  ;;  %v2031_v52 = vshrl.u32 %v2030_v58, 23  ;;  %v5803_v17 = vadd.f32 %v5581_v4, %v5797_v36 }
 0x32b   : > { %v1936_v46 = vsel %vm1935_vm8, %v1934_v57, 0  ;;  %4339 = vcosq.f32 %v5792_v24  ;;  %v1774_v19 = vadd.s32 %v5706_v63, %v5704_v59  ;;  %v1699_v54 = vxor.u32 2147483648, %v5794_v61 }
 0x32c   : > { %v1882_v10 = vadd.s32 536870912, %v1881_v30  ;;  %v1938_v28 = vand.u32 31, %v1936_v46  ;;  %v1790_v40 = vsub.s32 32, %v5777_v48  ;;  %v5810_v7 = vshll.u32 %v1932_v33, 8 }
 0x32d   : > { %v7219_v22 = vand.u32 2147483647, %v5728_v39  ;;  %v1791_v0 = vshll.u32 %v5747_v37, %v5777_v48  ;;  %v1795_v4 = vadd.s32 127, %v1794_v3  ;;  %v1937_v42 = vshrl.u32 %v1936_v46, 5 }
 0x32e   : > { %v5815_v12 = vshrl.u32 %v1882_v10, 30  ;;  %v1939_v26 = vsub.s32 32, %v1938_v28  ;;  %v1941_v59 = vshll.u32 %v7248_v14, %v1938_v28  ;;  %v1944_v63 = vshll.u32 %v7249_v56, %v1938_v28 }
 0x32f   : > { %v3923_v16 = vadd.s32 4294967169, %v2031_v52  ;;  %v1947_v60 = vshll.u32 %v7250_v49, %v1938_v28  ;;  %v1950_v13 = vshll.u32 %v7243_v44, %v1938_v28  ;;  %v1953_v58 = vshll.u32 %v7292_v20, %v1938_v28 }
 0x330   : > { %v1884_v9 = vshll.u32 %v5815_v12, 30  ;;  %v1942_v35 = vshrl.u32 %v7249_v56, %v1939_v26  ;;  %v1945_v25 = vshrl.u32 %v7250_v49, %v1939_v26  ;;  %v1948_v37 = vshrl.u32 %v7243_v44, %v1939_v26 }
 0x331   : > { %v1951_v55 = vshrl.u32 %v7292_v20, %v1939_v26  ;;  %v1954_v53 = vshrl.u32 %v7293_v38, %v1939_v26  ;;  %v1792_v51 = vshrl.u32 %v1774_v19, %v1790_v40  ;;  %v5832_v33 = vand.u32 8388607, %v7219_v22 }
 0x332   : > { %v5827_v23 = vsub.s32 %v1881_v30, %v1884_v9  ;;  %v1943_v34 = vor.u32 %v1942_v35, %v1941_v59  ;;  %v1946_v48 = vor.u32 %v1945_v25, %v1944_v63  ;;  %v1949_v57 = vor.u32 %v1948_v37, %v1947_v60 }
 0x333   : > { %v1952_v32 = vor.u32 %v1951_v55, %v1950_v13  ;;  %v1796_v3 = vshll.u32 %v1795_v4, 23  ;;  %v1955_v52 = vor.u32 %v1954_v53, %v1953_v58  ;;  %vm1956_vm7 = vcmp.lt.s32.totalorder %v1937_v42, 1 }
 0x334   : > { %v1887_v46 = vsub.s32 0, %v5827_v23  ;;  %v1940_v10 = vshrl.u32 %v7248_v14, %v1939_v26  ;;  %vm1959_vm14 = vcmp.lt.s32.totalorder %v1937_v42, 4  ;;  %v1964_v30 = vsel %vm1956_vm7, %v1943_v34, %v1946_v48 }
 0x335   : > { %v2037_v59 = vadd.s32 1, %v3923_v16  ;;  %v5836_v63 = vpop.eup %4339  ;;  %vm1958_vm5 = vcmp.lt.s32.totalorder %v1937_v42, 3  ;;  %v1961_v28 = vsel %vm1959_vm14, %v1949_v57, 2102212464  ;;  %v1965_v40 = vsel %vm1959_vm14, %v1952_v32, 920167782 }
 0x336   : > { %v3916_v19 = vmin.u32 %v1887_v46, %v5827_v23  ;;  %v1793_v9 = vor.u32 %v1792_v51, %v1791_v0  ;;  %vm1957_vm4 = vcmp.lt.s32.totalorder %v1937_v42, 2  ;;  %v1966_v35 = vsel %vm1958_vm5, %v1949_v57, %v1965_v40 }
 0x337   : > { %v1968_v4 = vsel %vm1956_vm7, %v1946_v48, %v1949_v57  ;;  %v1960_v60 = vsel %vm1956_vm7, %v1940_v10, %v1943_v34  ;;  %v1967_v37 = vsel %vm1957_vm4, %v1964_v30, %v1966_v35  ;;  %v1969_v13 = vsel %vm1959_vm14, %v1955_v52, 1326507024 }
 0x338   : > { %v1889_v25 = vclz %v3916_v19  ;;  %v1962_v26 = vsel %vm1958_vm5, %v1946_v48, %v1961_v28  ;;  %v1970_v55 = vsel %vm1958_vm5, %v1952_v32, %v1969_v13  ;;  %v1797_v58 = vor.u32 4788187, %v1796_v3 }
 0x339   : > { %v5841_v16 = vmul.u32.u64.low %v5810_v7, %v1967_v37  ;;  %v5842_v53 = vmul.u32.u64.high %v5810_v7, %v1967_v37, %v5841_v16  ;;  %v1971_v29 = vsel %vm1957_vm4, %v1968_v4, %v1970_v55  ;;  %vm2038_vm10 = vcmp.gt.s32.totalorder %v2037_v59, 0 }
 0x33a   : > { %v3917_v46 = vadd.s32 4294967294, %v1889_v25  ;;  %v5847_v0 = vmul.u32.u64.low %v5810_v7, %v1971_v29  ;;  %v5848_v51 = vmul.u32.u64.high %v5810_v7, %v1971_v29, %v5847_v0  ;;  %v2039_v34 = vsel %vm2038_vm10, %v2037_v59, 0 }
 0x33b   : > { %v7218_v57 = vand.u32 2147483647, %v5803_v17  ;;  %v1877_v48 = vadd.s32 %v5762_v21, %v5768_v15  ;;  %v1963_v32 = vsel %vm1957_vm4, %v1960_v60, %v1962_v26  ;;  %v2041_v52 = vand.u32 31, %v2039_v34 }
 0x33c   : > { %vm3918_vm15 = vcmp.lt.s32.totalorder %v3917_v46, 0  ;;  %v1800_v10 = vcvt.s32.f32 %v1793_v9  ;;  %v1982_v30 = vadd.s32 1, %v5842_v53  ;;  %v2035_v19 = vor.u32 8388608, %v5832_v33 }
 0x33d   : > { %v1892_v3 = vsel %vm3918_vm15, 0, %v3917_v46  ;;  %v1798_v28 = vand.u32 2147483647, %v1797_v58  ;;  %v2042_v35 = vsub.s32 32, %v2041_v52  ;;  %v1979_v59 = vmul.u32 %v5810_v7, %v1963_v32 }
 0x33e   : > { %v1893_v40 = vsub.s32 32, %v1892_v3  ;;  %v1897_v29 = vsub.s32 4294967266, %v1892_v3  ;;  %vm1981_vm6 = vc.u32 %v5848_v51, %v5841_v16  ;;  %v5859_v21 = vshrl.u32 %v2039_v34, 5 }
 0x33f   : > { %v2133_v15 = vand.u32 2139095040, %v5803_v17  ;;  %v1894_v42 = vshll.u32 %v5827_v23, %v1892_v3  ;;  %v1983_v25 = vsel %vm1981_vm6, %v1982_v30, %v5842_v53  ;;  %v2044_v60 = vshll.u32 %v7248_v14, %v2041_v52 }
 0x340   : > { %v1895_v9 = vshrl.u32 %v1877_v48, %v1893_v40  ;;  %v1898_v4 = vadd.s32 127, %v1897_v29  ;;  %v1984_v33 = vadd.s32 %v1983_v25, %v1979_v59  ;;  %v2045_v37 = vshrl.u32 %v7249_v56, %v2042_v35 }
 0x341   : > { %v2048_v7 = vshrl.u32 %v7250_v49, %v2042_v35  ;;  %v2047_v26 = vshll.u32 %v7249_v56, %v2041_v52  ;;  %v2050_v55 = vshll.u32 %v7250_v49, %v2041_v52  ;;  %v2051_v58 = vshrl.u32 %v7243_v44, %v2042_v35 }
 0x342   : > { %v1899_v13 = vshll.u32 %v1898_v4, 23  ;;  %v1896_v46 = vor.u32 %v1895_v9, %v1894_v42  ;;  %v1985_v23 = vadd.s32 536870912, %v1984_v33  ;;  %v2053_v0 = vshll.u32 %v7243_v44, %v2041_v52 }
 0x343   : > { %v2054_v53 = vshrl.u32 %v7292_v20, %v2042_v35  ;;  %v2046_v48 = vor.u32 %v2045_v37, %v2044_v60  ;;  %v2049_v32 = vor.u32 %v2048_v7, %v2047_v26  ;;  %v2052_v3 = vor.u32 %v2051_v58, %v2050_v55 }
 0x344   : > { %v1900_v34 = vor.u32 4788187, %v1899_v13  ;;  %vm1617_vm0 = vcmp.lt.s32.totalorder %v5563_v62, 0  ;;  %v5873_v30 = vshrl.u32 %v1985_v23, 30  ;;  %v2056_v29 = vshll.u32 %v7292_v20, %v2041_v52 }
 0x345   : > { %v2055_v40 = vor.u32 %v2054_v53, %v2053_v0  ;;  %v2057_v59 = vshrl.u32 %v7293_v38, %v2042_v35  ;;  %v1801_v4 = vmul.f32 %v1800_v10, %v1798_v28  ;;  %v2043_v42 = vshrl.u32 %v7248_v14, %v2042_v35 }
 0x346   : > { %vm2059_vm1 = vcmp.lt.s32.totalorder %v5859_v21, 1  ;;  %v2134_v9 = vshrl.u32 %v2133_v15, 23  ;;  %v1901_v25 = vand.u32 2147483647, %v1900_v34  ;;  %v1987_v60 = vshll.u32 %v5873_v30, 30 }
 0x347   : > { %v2058_v37 = vor.u32 %v2057_v59, %v2056_v29  ;;  %vm2062_vm11 = vcmp.lt.s32.totalorder %v5859_v21, 4  ;;  %vm5883_vm3 = vcmp.le.f32.partialorder %v1615_v45, 0.7853982  ;;  %vm1720_vm13 = vcmp.lt.s32.totalorder %v5571_v1, 0 }
 0x348   : > { %v1903_v52 = vcvt.s32.f32 %v1896_v46  ;;  %vm2061_vm8 = vcmp.lt.s32.totalorder %v5859_v21, 3  ;;  %v2067_v10 = vsel %vm2059_vm1, %v2046_v48, %v2049_v32  ;;  %v2068_v28 = vsel %vm2062_vm11, %v2055_v40, 920167782 }
 0x349   : > { %v5893_v35 = vsub.s32 %v1984_v33, %v1987_v60  ;;  %vm2060_vm7 = vcmp.lt.s32.totalorder %v5859_v21, 2  ;;  %v2064_v45 = vsel %vm2062_vm11, %v2052_v3, 2102212464  ;;  %v2069_v15 = vsel %vm2061_vm8, %v2052_v3, %v2068_v28 }
 0x34a   : > { %v1802_v13 = vxor.u32 2147483648, %v1801_v4  ;;  %vm1823_vm14 = vcmp.lt.s32.totalorder %v5583_v2, 0  ;;  %v2063_v26 = vsel %vm2059_vm1, %v2043_v42, %v2046_v48  ;;  %v2070_v55 = vsel %vm2060_vm7, %v2067_v10, %v2069_v15 }
 0x34b   : > { %v2075_v58 = vshll.u32 %v2035_v19, 8  ;;  %v1904_v33 = vmul.f32 %v1903_v52, %v1901_v25  ;;  %v1990_v46 = vsub.s32 0, %v5893_v35  ;;  %v2071_v23 = vsel %vm2059_vm1, %v2049_v32, %v2052_v3 }
 0x34c   : > { %v2072_v0 = vsel %vm2062_vm11, %v2058_v37, 1326507024  ;;  %vm5912_vm5 = vcmp.le.f32.partialorder %v1718_v47, 0.7853982  ;;  %v2065_v34 = vsel %vm2061_vm8, %v2049_v32, %v2064_v45  ;;  %v3927_v42 = vadd.s32 4294967169, %v2134_v9 }
 0x34d   : > { %v2073_v19 = vsel %vm2061_vm8, %v2055_v40, %v2072_v0  ;;  %v5920_v48 = vmul.u32.u64.low %v2075_v58, %v2070_v55  ;;  %v5921_v29 = vmul.u32.u64.high %v2075_v58, %v2070_v55, %v5920_v48  ;;  %v3920_v3 = vmin.u32 %v1990_v46, %v5893_v35 }
 0x34e   : > { %v2074_v59 = vsel %vm2060_vm7, %v2071_v23, %v2073_v19  ;;  %v2137_v47 = vand.u32 8388607, %v7218_v57  ;;  %v1700_v32 = vsel %vm1617_vm0, %v1699_v54, %v5794_v61  ;;  %v5939_v60 = vadd.f32 %v5585_v11, %v5797_v36 }
 0x34f   : > { %v5934_v40 = vmul.u32.u64.low %v2075_v58, %v2074_v59  ;;  %v5935_v25 = vmul.u32.u64.high %v2075_v58, %v2074_v59, %v5934_v40  ;;  %v1905_v37 = vxor.u32 2147483648, %v1904_v33  ;;  %v1992_v52 = vclz %v3920_v3 }
 0x350   : > { %v2066_v9 = vsel %vm2060_vm7, %v2063_v26, %v2065_v34  ;;  %v2140_v10 = vadd.s32 1, %v3927_v42  ;;  %v5948_v28 = vsel %vm1514_vm2, %v1598_v8, %v5661_v27  ;;  %4341 = vsinq.f32 %v5792_v24 }
 0x351   : > { %v1804_v61 = vsub.s32 4, %v5736_v31  ;;  %v2085_v11 = vadd.s32 1, %v5921_v29  ;;  %v1703_v36 = vsel %vm5883_vm3, %v5563_v62, %v1700_v32  ;;  %v1803_v54 = vsel %vm1720_vm13, %v1802_v13, %v1801_v4 }
 0x352   : > { %v2138_v21 = vor.u32 8388608, %v2137_v47  ;;  %vm2141_vm4 = vcmp.gt.s32.totalorder %v2140_v10, 0  ;;  %v3921_v45 = vadd.s32 4294967294, %v1992_v52  ;;  %v2082_v15 = vmul.u32 %v2075_v58, %v2066_v9 }
 0x353   : > { %vm2084_vm2 = vc.u32 %v5935_v25, %v5920_v48  ;;  %v2142_v27 = vsel %vm2141_vm4, %v2140_v10, 0  ;;  %v1906_v24 = vsel %vm1823_vm14, %v1905_v37, %v1904_v33  ;;  %v2236_v55 = vand.u32 2139095040, %v5939_v60 }
 0x354   : > { %v2086_v8 = vsel %vm2084_vm2, %v2085_v11, %v5921_v29  ;;  %v2144_v26 = vand.u32 31, %v2142_v27  ;;  %4343 = vcosq.f32 %v1703_v36  ;;  %vm5969_vm10 = vcmp.le.f32.partialorder %v1821_v6, 0.7853982 }
 0x355   : > { %v2087_v58 = vadd.s32 %v2086_v8, %v2082_v15  ;;  %4345 = vsinq.f32 %v1703_v36  ;;  %v5976_v33 = vsel %vm1720_vm13, %v1804_v61, %v5736_v31  ;;  %v5981_v46 = vsel %vm5912_vm5, %v5571_v1, %v1803_v54 }
 0x356   : > { %v2145_v23 = vsub.s32 32, %v2144_v26  ;;  %v5986_v6 = vsel %vm5969_vm10, %v5583_v2, %v1906_v24  ;;  %vm3922_vm15 = vcmp.lt.s32.totalorder %v3921_v45, 0  ;;  %v5988_v34 = vshll.u32 %v2138_v21, 8 }
 0x357   : > { %v2088_v0 = vadd.s32 536870912, %v2087_v58  ;;  %v2147_v19 = vshll.u32 %v7248_v14, %v2144_v26  ;;  %v2150_v29 = vshll.u32 %v7249_v56, %v2144_v26  ;;  %v2237_v3 = vshrl.u32 %v2236_v55, 23 }
 0x358   : > { %v2148_v31 = vshrl.u32 %v7249_v56, %v2145_v23  ;;  %v2151_v42 = vshrl.u32 %v7250_v49, %v2145_v23  ;;  %v2153_v47 = vshll.u32 %v7250_v49, %v2144_v26  ;;  %v2154_v32 = vshrl.u32 %v7243_v44, %v2145_v23 }
 0x359   : > { %v5993_v59 = vshrl.u32 %v2088_v0, 30  ;;  %v5998_v40 = vsel %vm3922_vm15, 0, %v3921_v45  ;;  %v2143_v37 = vshrl.u32 %v2142_v27, 5  ;;  %v2156_v52 = vshll.u32 %v7243_v44, %v2144_v26 }
 0x35a   : > { %v2157_v9 = vshrl.u32 %v7292_v20, %v2145_v23  ;;  %v6002_v10 = vpop.eup %4341  ;;  %v2149_v11 = vor.u32 %v2148_v31, %v2147_v19  ;;  %v2152_v36 = vor.u32 %v2151_v42, %v2150_v29  ;;  %v2155_v54 = vor.u32 %v2154_v32, %v2153_v47 }
 0x35b   : > { %v2090_v61 = vshll.u32 %v5993_v59, 30  ;;  %v2159_v15 = vshll.u32 %v7292_v20, %v2144_v26  ;;  %v2160_v24 = vshrl.u32 %v7293_v38, %v2145_v23  ;;  %v2000_v27 = vsub.s32 4294967266, %v5998_v40 }
 0x35c   : > { %v2158_v21 = vor.u32 %v2157_v9, %v2156_v52  ;;  %v2146_v55 = vshrl.u32 %v7248_v14, %v2145_v23  ;;  %v3931_v0 = vadd.s32 4294967169, %v2237_v3  ;;  %vm2162_vm6 = vcmp.lt.s32.totalorder %v2143_v37, 1 }
 0x35d   : > { %v6009_v8 = vsub.s32 %v2087_v58, %v2090_v61  ;;  %v2161_v57 = vor.u32 %v2160_v24, %v2159_v15  ;;  %vm2164_vm1 = vcmp.lt.s32.totalorder %v2143_v37, 3  ;;  %vm2165_vm11 = vcmp.lt.s32.totalorder %v2143_v37, 4 }
 0x35e   : > { %v6012_v19 = vpop.eup %4343  ;;  %v2167_v26 = vsel %vm2165_vm11, %v2155_v54, 2102212464  ;;  %v2170_v29 = vsel %vm2162_vm6, %v2149_v11, %v2152_v36  ;;  %v2171_v42 = vsel %vm2165_vm11, %v2158_v21, 920167782  ;;  %v1996_v32 = vsub.s32 32, %v5998_v40 }
 0x35f   : > { %v2093_v31 = vsub.s32 0, %v6009_v8  ;;  %v6015_v47 = vpop.eup %4345  ;;  %vm2163_vm13 = vcmp.lt.s32.totalorder %v2143_v37, 2  ;;  %v2172_v58 = vsel %vm2164_vm1, %v2155_v54, %v2171_v42  ;;  %v2174_v23 = vsel %vm2162_vm6, %v2152_v36, %v2155_v54 }
 0x360   : > { %v2166_v52 = vsel %vm2162_vm6, %v2146_v55, %v2149_v11  ;;  %v2173_v9 = vsel %vm2163_vm13, %v2170_v29, %v2172_v58  ;;  %v2175_v61 = vsel %vm2165_vm11, %v2161_v57, 1326507024  ;;  %v2168_v15 = vsel %vm2164_vm1, %v2152_v36, %v2167_v26 }
 0x361   : > { %v3924_v3 = vmin.u32 %v2093_v31, %v6009_v8  ;;  %v2176_v24 = vsel %vm2164_vm1, %v2158_v21, %v2175_v61  ;;  %v6024_v22 = vmul.u32.u64.low %v5988_v34, %v2173_v9  ;;  %v6025_v18 = vmul.u32.u64.high %v5988_v34, %v2173_v9, %v6024_v22 }
 0x362   : > { %v2001_v4 = vadd.s32 127, %v2000_v27  ;;  %v2177_v42 = vsel %vm2163_vm13, %v2174_v23, %v2176_v24  ;;  %v2243_v54 = vadd.s32 1, %v3931_v0  ;;  %4347 = vcosq.f32 %v5981_v46 }
 0x363   : > { %v2095_v45 = vclz %v3924_v3  ;;  %v6031_v11 = vmul.u32.u64.low %v5988_v34, %v2177_v42  ;;  %v6032_v55 = vmul.u32.u64.high %v5988_v34, %v2177_v42, %v6031_v11  ;;  %v1701_v57 = vsub.s32 4, %v5686_v5 }
 0x364   : > { %v1980_v36 = vadd.s32 %v5841_v16, %v5848_v51  ;;  %v2169_v31 = vsel %vm2163_vm13, %v2166_v52, %v2168_v15  ;;  %vm2244_vm8 = vcmp.gt.s32.totalorder %v2243_v54, 0  ;;  %4349 = vcosq.f32 %v5986_v6 }
 0x365   : > { %v3925_v21 = vadd.s32 4294967294, %v2095_v45  ;;  %v2188_v27 = vadd.s32 1, %v6025_v18  ;;  %v7302_v0 = vand.u32 2147483647, %v5939_v60  ;;  %v2245_v29 = vsel %vm2244_vm8, %v2243_v54, 0 }
 0x366   : > { %v1998_v58 = vshrl.u32 %v1980_v36, %v1996_v32  ;;  %v2002_v23 = vshll.u32 %v2001_v4, 23  ;;  %v2247_v3 = vand.u32 31, %v2245_v29  ;;  %v2185_v16 = vmul.u32 %v5988_v34, %v2169_v31 }
 0x367   : > { %v2240_v26 = vand.u32 8388607, %v7302_v0  ;;  %vm3926_vm7 = vcmp.lt.s32.totalorder %v3925_v21, 0  ;;  %vm2187_vm4 = vc.u32 %v6032_v55, %v6024_v22  ;;  %v1702_v51 = vsel %vm1617_vm0, %v1701_v57, %v5686_v5 }
 0x368   : > { %v6042_v9 = vsel %vm3926_vm7, 0, %v3925_v21  ;;  %4351 = vsinq.f32 %v5986_v6  ;;  %v1997_v4 = vshll.u32 %v5893_v35, %v5998_v40  ;;  %v2189_v45 = vsel %vm2187_vm4, %v2188_v27, %v6025_v18 }
 0x369   : > { %v2083_v34 = vadd.s32 %v5920_v48, %v5935_v25  ;;  %v2190_v32 = vadd.s32 %v2189_v45, %v2185_v16  ;;  %v2241_v52 = vor.u32 8388608, %v2240_v26  ;;  %v2248_v61 = vsub.s32 32, %v2247_v3 }
 0x36a   : > { %v6059_v15 = vor.u32 %v1998_v58, %v1997_v4  ;;  %v6061_v5 = vor.u32 4788187, %v2002_v23  ;;  %v2103_v24 = vsub.s32 4294967266, %v6042_v9  ;;  %v1704_v6 = vsel %vm5883_vm3, 0, %v1702_v51 }
 0x36b   : > { %v2191_v42 = vadd.s32 536870912, %v2190_v32  ;;  %v2250_v35 = vshll.u32 %v7248_v14, %v2247_v3  ;;  %v2251_v18 = vshrl.u32 %v7249_v56, %v2248_v61  ;;  %v2254_v40 = vshrl.u32 %v7250_v49, %v2248_v61 }
 0x36c   : > { %v2253_v48 = vshll.u32 %v7249_v56, %v2247_v3  ;;  %v2256_v25 = vshll.u32 %v7250_v49, %v2247_v3  ;;  %v2257_v54 = vshrl.u32 %v7243_v44, %v2248_v61  ;;  %v2260_v11 = vshrl.u32 %v7292_v20, %v2248_v61  ;;  %v6073_v57 = vpop.eup %4347 }
 0x36d   : > { %v6075_v36 = vshrl.u32 %v2191_v42, 30  ;;  %v2246_v7 = vshrl.u32 %v2245_v29, 5  ;;  %v2259_v21 = vshll.u32 %v7243_v44, %v2247_v3  ;;  %v6078_v31 = vshll.u32 %v2241_v52, 8 }
 0x36e   : > { %v2252_v27 = vor.u32 %v2251_v18, %v2250_v35  ;;  %v2255_v0 = vor.u32 %v2254_v40, %v2253_v48  ;;  %v2258_v26 = vor.u32 %v2257_v54, %v2256_v25  ;;  %v6080_v58 = vand.u32 3, %v1704_v6  ;;  %v6082_v23 = vpop.eup %4349 }
 0x36f   : > { %v2193_v16 = vshll.u32 %v6075_v36, 30  ;;  %v2261_v51 = vor.u32 %v2260_v11, %v2259_v21  ;;  %v2262_v4 = vshll.u32 %v7292_v20, %v2247_v3  ;;  %v2263_v45 = vshrl.u32 %v7293_v38, %v2248_v61 }
 0x370   : > { %v2099_v29 = vsub.s32 32, %v6042_v9  ;;  %v2100_v52 = vshll.u32 %v6009_v8, %v6042_v9  ;;  %v2104_v42 = vadd.s32 127, %v2103_v24  ;;  %v2249_v35 = vshrl.u32 %v7248_v14, %v2248_v61 }
 0x371   : > { %v6091_v18 = vsub.s32 %v2190_v32, %v2193_v16  ;;  %v2264_v6 = vor.u32 %v2263_v45, %v2262_v4  ;;  %vm2265_vm0 = vcmp.lt.s32.totalorder %v2246_v7, 1  ;;  %vm2268_vm3 = vcmp.lt.s32.totalorder %v2246_v7, 4 }
 0x372   : > { %v6093_v40 = vpop.eup %4351  ;;  %vm2267_vm2 = vcmp.lt.s32.totalorder %v2246_v7, 3  ;;  %v2269_v48 = vsel %vm2265_vm0, %v2249_v35, %v2252_v27  ;;  %v2270_v3 = vsel %vm2268_vm3, %v2258_v26, 2102212464  ;;  %v2273_v25 = vsel %vm2265_vm0, %v2252_v27, %v2255_v0 }
 0x373   : > { %v2196_v54 = vsub.s32 0, %v6091_v18  ;;  %v2271_v11 = vsel %vm2267_vm2, %v2255_v0, %v2270_v3  ;;  %v2274_v21 = vsel %vm2268_vm3, %v2261_v51, 920167782  ;;  %v2277_v37 = vsel %vm2265_vm0, %v2255_v0, %v2258_v26 }
 0x374   : > { %v2101_v8 = vshrl.u32 %v2083_v34, %v2099_v29  ;;  %vm2266_vm15 = vcmp.lt.s32.totalorder %v2246_v7, 2  ;;  %v2275_v9 = vsel %vm2267_vm2, %v2258_v26, %v2274_v21  ;;  %v2278_v61 = vsel %vm2268_vm3, %v2264_v6, 1326507024 }
 0x375   : > { %v2105_v32 = vshll.u32 %v2104_v42, 23  ;;  %v3928_v24 = vmin.u32 %v2196_v54, %v6091_v18  ;;  %v2276_v16 = vsel %vm2266_vm15, %v2273_v25, %v2275_v9  ;;  %v2279_v4 = vsel %vm2267_vm2, %v2261_v51, %v2278_v61 }
 0x376   : > { %v2272_v45 = vsel %vm2266_vm15, %v2269_v48, %v2271_v11  ;;  %v2280_v38 = vsel %vm2266_vm15, %v2277_v37, %v2279_v4  ;;  %v6098_v35 = vmul.u32.u64.low %v6078_v31, %v2276_v16  ;;  %v6099_v20 = vmul.u32.u64.high %v6078_v31, %v2276_v16, %v6098_v35 }
 0x377   : > { %4353 = vsinq.f32 %v5981_v46  ;;  %v2198_v27 = vclz %v3928_v24  ;;  %v6104_v34 = vmul.u32.u64.low %v6078_v31, %v2280_v38  ;;  %v6105_v7 = vmul.u32.u64.high %v6078_v31, %v2280_v38, %v6104_v34 }
 0x378   : > { %v2004_v0 = vand.u32 2147483647, %v6061_v5  ;;  %v2006_v26 = vcvt.s32.f32 %v6059_v15  ;;  %v6109_v29 = vor.u32 %v2101_v8, %v2100_v52  ;;  %v1711_v37 = vxor.u32 2147483648, %v6015_v47 }
 0x379   : > { %v2106_v51 = vor.u32 4788187, %v2105_v32  ;;  %v3929_v42 = vadd.s32 4294967294, %v2198_v27  ;;  %v2288_v6 = vmul.u32 %v6078_v31, %v2272_v45  ;;  %vm1707_vm6 = vweird.f32 %v5563_v62 }
 0x37a   : > { %v1714_v46 = vxor.u32 2147483648, %v6012_v19  ;;  %v2291_v48 = vadd.s32 1, %v6099_v20  ;;  %vm1710_vm1 = vcmp.eq.s32.totalorder %v6080_v58, 0  ;;  %vm1713_vm11 = vcmp.eq.s32.totalorder %v6080_v58, 2 }
 0x37b   : > { %v1907_v38 = vsub.s32 4, %v5815_v12  ;;  %vm3930_vm13 = vcmp.lt.s32.totalorder %v3929_v42, 0  ;;  %vm2290_vm8 = vc.u32 %v6105_v7, %v6098_v35  ;;  %v1712_v52 = vsel %vm1710_vm1, %v6012_v19, %v1711_v37 }
 0x37c   : > { %v1715_v31 = vsel %vm1713_vm11, %v1714_v46, %v6015_v47  ;;  %v2186_v3 = vadd.s32 %v6024_v22, %v6032_v55  ;;  %v2201_v25 = vsel %vm3930_vm13, 0, %v3929_v42  ;;  %v2292_v54 = vsel %vm2290_vm8, %v2291_v48, %v6099_v20 }
 0x37d   : > { %v1908_v11 = vsel %vm1823_vm14, %v1907_v38, %v5815_v12  ;;  %v2202_v21 = vsub.s32 32, %v2201_v25  ;;  %v2206_v8 = vsub.s32 4294967266, %v2201_v25  ;;  %v2293_v9 = vadd.s32 %v2292_v54, %v2288_v6 }
 0x37e   : > { %vm1709_vm7 = vcmp.lt.s32.totalorder %v6080_v58, 2  ;;  %v2107_v61 = vand.u32 2147483647, %v2106_v51  ;;  %v2109_v19 = vcvt.s32.f32 %v6109_v29  ;;  %v1910_v47 = vsel %vm5969_vm10, 0, %v1908_v11 }
 0x37f   : > { %v1716_v32 = vsel %vm1709_vm7, %v1712_v52, %v1715_v31  ;;  %v2207_v22 = vadd.s32 127, %v2206_v8  ;;  %v2294_v55 = vadd.s32 536870912, %v2293_v9  ;;  %v1914_v24 = vand.u32 3, %v1910_v47 }
 0x380   : > { %v1917_v20 = vxor.u32 2147483648, %v6093_v40  ;;  %v2204_v16 = vshrl.u32 %v2186_v3, %v2202_v21  ;;  %v1920_v12 = vxor.u32 2147483648, %v6082_v23  ;;  %v7303_v4 = vsel %vm5782_vm9, 0, %v5948_v28 }
 0x381   : > { %v1605_v58 = vand.u32 3, %v7303_v4  ;;  %v1608_v45 = vxor.u32 2147483648, %v6002_v10  ;;  %v4354_v27 = vpop.eup %4353  ;;  %v2203_v34 = vshll.u32 %v6091_v18, %v2201_v25  ;;  %v2208_v13 = vshll.u32 %v2207_v22, 23 }
 0x382   : > { %v6141_v29 = vshrl.u32 %v2294_v55, 30  ;;  %vm1913_vm14 = vweird.f32 %v5583_v2  ;;  %v1717_v37 = vsel %vm1707_vm6, nan, %v1716_v32  ;;  %vm1916_vm10 = vcmp.eq.s32.totalorder %v1914_v24, 0 }
 0x383   : > { %vm1919_vm4 = vcmp.eq.s32.totalorder %v1914_v24, 2  ;;  %v1611_v41 = vxor.u32 2147483648, %v5836_v63  ;;  %v2209_v51 = vor.u32 4788187, %v2208_v13  ;;  %v1918_v42 = vsel %vm1916_vm10, %v6082_v23, %v1917_v20 }
 0x384   : > { %v2296_v28 = vshll.u32 %v6141_v29, 30  ;;  %vm1607_vm9 = vcmp.eq.s32.totalorder %v1605_v58, 0  ;;  %v2205_v6 = vor.u32 %v2204_v16, %v2203_v34  ;;  %vm1915_vm0 = vcmp.lt.s32.totalorder %v1914_v24, 2 }
 0x385   : > { %v1921_v18 = vsel %vm1919_vm4, %v1920_v12, %v6093_v40  ;;  %v1609_v46 = vsel %vm1607_vm9, %v5836_v63, %v1608_v45  ;;  %v2210_v48 = vand.u32 2147483647, %v2209_v51  ;;  %vm1610_vm3 = vcmp.eq.s32.totalorder %v1605_v58, 2 }
 0x386   : > { %v2297_v38 = vsub.s32 %v2293_v9, %v2296_v28  ;;  %v1922_v62 = vsel %vm1915_vm0, %v1918_v42, %v1921_v18  ;;  %v1612_v31 = vsel %vm1610_vm3, %v1611_v41, %v6002_v10  ;;  %v7304_v23 = vsel %vm5912_vm5, 0, %v5976_v33 }
 0x387   : > { %v1923_v52 = vsel %vm1913_vm14, nan, %v1922_v62  ;;  %v1811_v3 = vand.u32 3, %v7304_v23  ;;  %v1814_v25 = vxor.u32 2147483648, %v4354_v27  ;;  %v2007_v63 = vmul.f32 %v2006_v26, %v2004_v0 }
 0x388   : > { %v2110_v40 = vmul.f32 %v2109_v19, %v2107_v61  ;;  %v2299_v54 = vsub.s32 0, %v2297_v38  ;;  %v4097_v11 = vpack.c.bf16 %v1923_v52, %v1717_v37  ;;  %v2212_v21 = vcvt.s32.f32 %v2205_v6 }
 0x389   : > { %vm1606_vm2 = vcmp.lt.s32.totalorder %v1605_v58, 2  ;;  %vm1813_vm15 = vcmp.eq.s32.totalorder %v1811_v3, 0  ;;  %v1817_v2 = vxor.u32 2147483648, %v6073_v57  ;;  %vm1816_vm5 = vcmp.eq.s32.totalorder %v1811_v3, 2 }
 0x38a   : > { %v3932_v10 = vmin.u32 %v2299_v54, %v2297_v38  ;;  %4098 = vmatprep.subr.bf16.mxu1 %v4097_v11  ;;  %v1613_v53 = vsel %vm1606_vm2, %v1609_v46, %v1612_v31  ;;  %v1815_v33 = vsel %vm1813_vm15, %v6073_v57, %v1814_v25  ;;  %v2213_v8 = vmul.f32 %v2212_v21, %v2210_v48 }
 0x38b   : > { %vm1812_vm6 = vcmp.lt.s32.totalorder %v1811_v3, 2  ;;  %v1818_v5 = vsel %vm1816_vm5, %v1817_v2, %v4354_v27  ;;  %vm1604_vm1 = vweird.f32 %v5561_v50  ;;  %vm1810_vm11 = vweird.f32 %v5571_v1 }
 0x38c   : > { %v2301_v9 = vclz %v3932_v10  ;;  %v1819_v15 = vsel %vm1812_vm6, %v1815_v33, %v1818_v5  ;;  %v2008_v0 = vxor.u32 2147483648, %v2007_v63  ;;  %v1614_v26 = vsel %vm1604_vm1, nan, %v1613_v53 }
 0x38d   : > { %v1820_v61 = vsel %vm1810_vm11, nan, %v1819_v15  ;;  %v2111_v19 = vxor.u32 2147483648, %v2110_v40  ;;  %v2214_v22 = vxor.u32 2147483648, %v2213_v8  ;;  %vm1926_vm13 = vcmp.lt.s32.totalorder %v5725_v43, 0 }
 0x38e   : > { %v3933_v32 = vadd.s32 4294967294, %v2301_v9  ;;  %v4099_v47 = vpack.c.bf16 %v1820_v61, %v1614_v26  ;;  %v2009_v57 = vsel %vm1926_vm13, %v2008_v0, %v2007_v63  ;;  %vm2029_vm7 = vcmp.lt.s32.totalorder %v5728_v39, 0 }
 0x38f   : > { %vm2132_vm14 = vcmp.lt.s32.totalorder %v5803_v17, 0  ;;  %v2112_v1 = vsel %vm2029_vm7, %v2111_v19, %v2110_v40  ;;  %v2289_v55 = vadd.s32 %v6098_v35, %v6105_v7  ;;  %v7305_v16 = vand.u32 2147483647, %v5725_v43 }
 0x390   : > { %vm3934_vm8 = vcmp.lt.s32.totalorder %v3933_v32, 0  ;;  %4100 = vmatpush1.bf16.msra.mxu1 %v4099_v47  ;;  %v7308_v4 = vand.u32 2147483647, %v5728_v39  ;;  %v2215_v45 = vsel %vm2132_vm14, %v2214_v22, %v2213_v8  ;;  %v7311_v37 = vand.u32 2147483647, %v5803_v17 }
 0x391   : > { %v2304_v50 = vsel %vm3934_vm8, 0, %v3933_v32  ;;  %vm6177_vm10 = vcmp.le.f32.partialorder %v7305_v16, 0.7853982  ;;  %v2216_v48 = vsub.s32 4, %v6075_v36  ;;  %v2113_v62 = vsub.s32 4, %v5993_v59 }
 0x392   : > { %v2305_v24 = vsub.s32 32, %v2304_v50  ;;  %v2309_v20 = vsub.s32 4294967266, %v2304_v50  ;;  %vm6183_vm4 = vcmp.le.f32.partialorder %v7308_v4, 0.7853982  ;;  %v2012_v35 = vsel %vm6177_vm10, %v5725_v43, %v2009_v57 }
 0x393   : > { %v2306_v7 = vshll.u32 %v2297_v38, %v2304_v50  ;;  %v2115_v13 = vsel %vm6183_vm4, %v5728_v39, %v2112_v1  ;;  %vm6197_vm9 = vcmp.le.f32.partialorder %v7311_v37, 0.7853982  ;;  %4355 = vcosq.f32 %v2012_v35 }
 0x394   : > { %v2307_v27 = vshrl.u32 %v2289_v55, %v2305_v24  ;;  %v2310_v34 = vadd.s32 127, %v2309_v20  ;;  %v2218_v51 = vsel %vm6197_vm9, %v5803_v17, %v2215_v45  ;;  %4357 = vcosq.f32 %v2115_v13 }
 0x395   : > { %4359 = vcosq.f32 %v2218_v51  ;;  %v2010_v52 = vsub.s32 4, %v5873_v30  ;;  %vm2235_vm0 = vcmp.lt.s32.totalorder %v5939_v60, 0  ;;  %v2217_v23 = vsel %vm2132_vm14, %v2216_v48, %v6075_v36  ;;  %v3935_v48 = vld [vmem:[%s7165_s3 + $0x20] sm:$0xff] }
 0x396   : > { %v2308_v28 = vor.u32 %v2307_v27, %v2306_v7  ;;  %v2311_v42 = vshll.u32 %v2310_v34, 23  ;;  %4361 = vsinq.f32 %v2218_v51  ;;  %v7314_v3 = vand.u32 2147483647, %v5939_v60 }
 0x397   : > { %4363 = vsinq.f32 %v2115_v13  ;;  %v2319_v40 = vsub.s32 4, %v6141_v29  ;;  %v2114_v36 = vsel %vm2029_vm7, %v2113_v62, %v5993_v59  ;;  %v2011_v2 = vsel %vm1926_vm13, %v2010_v52, %v5873_v30 }
 0x398   : > { %v2312_v6 = vor.u32 4788187, %v2311_v42  ;;  %v2315_v46 = vcvt.s32.f32 %v2308_v28  ;;  %4365 = vsinq.f32 %v2012_v35  ;;  %vm6213_vm3 = vcmp.le.f32.partialorder %v7314_v3, 0.7853982 }
 0x399   : > { %v2219_v53 = vsel %vm6197_vm9, 0, %v2217_v23  ;;  %v2116_v8 = vsel %vm6183_vm4, 0, %v2114_v36  ;;  %v2320_v5 = vsel %vm2235_vm0, %v2319_v40, %v6141_v29  ;;  %v2013_v9 = vsel %vm6177_vm10, 0, %v2011_v2 }
 0x39a   : > { %v2313_v18 = vand.u32 2147483647, %v2312_v6  ;;  %v2223_v30 = vand.u32 3, %v2219_v53  ;;  %v2120_v0 = vand.u32 3, %v2116_v8  ;;  %v2322_v26 = vsel %vm6213_vm3, 0, %v2320_v5 }
 0x39b   : > { %v2017_v22 = vand.u32 3, %v2013_v9  ;;  %v2326_v1 = vand.u32 3, %v2322_v26  ;;  %vm2222_vm9 = vweird.f32 %v5803_v17  ;;  %v3936_v17 = vld [vmem:[%s7165_s3 + $0x28] sm:$0xff] }
 0x39c   : > { %v2316_v38 = vmul.f32 %v2315_v46, %v2313_v18  ;;  %vm2225_vm2 = vcmp.eq.s32.totalorder %v2223_v30, 0  ;;  %vm2228_vm15 = vcmp.eq.s32.totalorder %v2223_v30, 2  ;;  %vm2122_vm5 = vcmp.eq.s32.totalorder %v2120_v0, 0 }
 0x39d   : > { %v4356_v54 = vpop.eup %4355  ;;  %vm2125_vm6 = vcmp.eq.s32.totalorder %v2120_v0, 2  ;;  %vm2019_vm1 = vcmp.eq.s32.totalorder %v2017_v22, 0  ;;  %vm2022_vm11 = vcmp.eq.s32.totalorder %v2017_v22, 2  ;;  %vm2224_vm13 = vcmp.lt.s32.totalorder %v2223_v30, 2 }
 0x39e   : > { %v2317_v31 = vxor.u32 2147483648, %v2316_v38  ;;  %v4358_v21 = vpop.eup %4357  ;;  %v2023_v50 = vxor.u32 2147483648, %v4356_v54  ;;  %vm2121_vm8 = vcmp.lt.s32.totalorder %v2120_v0, 2  ;;  %vm2331_vm7 = vcmp.eq.s32.totalorder %v2326_v1, 2 }
 0x39f   : > { %v4360_v10 = vpop.eup %4359  ;;  %v2126_v47 = vxor.u32 2147483648, %v4358_v21  ;;  %vm2328_vm14 = vcmp.eq.s32.totalorder %v2326_v1, 0  ;;  %vm2018_vm10 = vcmp.lt.s32.totalorder %v2017_v22, 2  ;;  %vm2327_vm4 = vcmp.lt.s32.totalorder %v2326_v1, 2 }
 0x3a0   : > { %v2318_v63 = vsel %vm2235_vm0, %v2317_v31, %v2316_v38  ;;  %v4362_v33 = vpop.eup %4361  ;;  %v2229_v19 = vxor.u32 2147483648, %v4360_v10  ;;  %vm2119_vm0 = vweird.f32 %v5728_v39  ;;  %v7317_v39 = vmov 0.0   ;;  %v2349_v38 = vpop.permute.xlu0 %2348 }
 0x3a1   : > { %v2321_v11 = vsel %vm6213_vm3, %v5939_v60, %v2318_v63  ;;  %v4364_v59 = vpop.eup %4363  ;;  %v2226_v61 = vxor.u32 2147483648, %v4362_v33  ;;  %vm2325_vm3 = vweird.f32 %v5939_v60  ;;  %v3938_v60 = vld [vmem:[%s7165_s3 + $0x38] sm:$0xff]  ;;  %v2354_v63 = vpop.permute.xlu1 %2353 }
 0x3a2   : > { %4367 = vcosq.f32 %v2321_v11  ;;  %v4366_v15 = vpop.eup %4365  ;;  %v2123_v32 = vxor.u32 2147483648, %v4364_v59  ;;  %v2230_v55 = vsel %vm2228_vm15, %v2229_v19, %v4362_v33  ;;  %v2127_v16 = vsel %vm2125_vm6, %v2126_v47, %v4364_v59 }
 0x3a3   : > { %4369 = vsinq.f32 %v2321_v11  ;;  %v2020_v57 = vxor.u32 2147483648, %v4366_v15  ;;  %v2227_v29 = vsel %vm2225_vm2, %v4360_v10, %v2226_v61  ;;  %v2024_v45 = vsel %vm2022_vm11, %v2023_v50, %v4366_v15 }
 0x3a4   : > { %v2124_v20 = vsel %vm2122_vm5, %v4358_v21, %v2123_v32  ;;  %v2231_v7 = vsel %vm2224_vm13, %v2227_v29, %v2230_v55  ;;  %vm2016_vm2 = vweird.f32 %v5725_v43  ;;  %v3937_v43 = vld [vmem:[%s7165_s3 + $0x30] sm:$0xff] }
 0x3a5   : > { %v2021_v58 = vsel %vm2019_vm1, %v4356_v54, %v2020_v57  ;;  %v2128_v27 = vsel %vm2121_vm8, %v2124_v20, %v2127_v16  ;;  %v2232_v51 = vsel %vm2222_vm9, nan, %v2231_v7 }
 0x3a6   : > { %v2025_v37 = vsel %vm2018_vm10, %v2021_v58, %v2024_v45  ;;  %v2129_v28 = vsel %vm2119_vm0, nan, %v2128_v27 }
 0x3a7   : > { %v2026_v18 = vsel %vm2016_vm2, nan, %v2025_v37  ;;  %v7318_v37 = vmov 920167782  }
 0x3a8   : > { %v4103_v46 = vpack.c.bf16 %v2232_v51, %v2026_v18 }
 0x3ac   : > { %v4368_v24 = vpop.eup %4367 }
 0x3ad   : > { %v4370_v12 = vpop.eup %4369  ;;  %v2332_v4 = vxor.u32 2147483648, %v4368_v24 }
 0x3ae   : > { %v2329_v35 = vxor.u32 2147483648, %v4370_v12 }
 0x3af   : > { %v2333_v34 = vsel %vm2331_vm7, %v2332_v4, %v4370_v12 }
 0x3b0   : > { %v2330_v13 = vsel %vm2328_vm14, %v4368_v24, %v2329_v35 }
 0x3b1   : > { %v2334_v41 = vsel %vm2327_vm4, %v2330_v13, %v2333_v34 }
 0x3b2   : > { %v2335_v42 = vsel %vm2325_vm3, nan, %v2334_v41 }
 0x3b3   : > { %v4101_v6 = vpack.c.bf16 %v2335_v42, %v2129_v28 }
 0x3b5   : > { %4102 = vmatprep.subr.bf16.mxu1 %v4101_v6 }
 0x3b6   : > { %4104 = vmatpush1.bf16.msra.mxu1 %v4103_v46  ;;  %v7319_v46 = vmov 1326507024  }
 0x3b9   : > { %3943 = vmatmul.mubr.msk.f32.vlgmr.msra.gmra.mrb[8].mxu1 %vm1410_vm12, %v3935_v48 }
 0x3ba   : > { %2448 = vmatprep.mubr.f32.mxu1 %v7317_v39 }
 0x3bd   : > { %3944 = vmatmul.mubr.msk.f32.gmra.mrb[10].mxu1 %vm1410_vm12, %v3936_v17 }
 0x3be   : > { %2454 = vmatprep.mubr.f32.mxu1 %v7317_v39 }
 0x3c1   : > { %3945 = vmatmul.mubr.msk.f32.gmra.mrb[12].mxu1 %vm1410_vm12, %v3937_v43 }
 0x3c2   : > { %2460 = vmatprep.mubr.f32.mxu1 %v7317_v39 }
 0x3c5   : > { %3946 = vmatmul.mubr.msk.f32.gmra.mrb[14].mxu1 %vm1410_vm12, %v3938_v60 }
 0x3c6   : > { %3375 = vmatprep.mubr.f32.mxu1 %v7317_v39 }
 0x48c   : > { %v2444_v62 = vpop.f32.mrb[8].mxu1 }
 0x48d   : > { %v6264_v52 = vadd.f32 %v2444_v62, %v2349_v38  ;;  %v2446_v31 = vpop.f32.mrb[9].mxu1 }
 0x48e   : > { %v6266_v23 = vadd.f32 %v2446_v31, %v2349_v38 }
 0x48f   : > { %v2467_v3 = vand.u32 2147483647, %v6264_v52  ;;  %v2470_v25 = vand.u32 2139095040, %v6264_v52 }
 0x490   : > { %v2570_v40 = vand.u32 2147483647, %v6266_v23  ;;  %v2573_v54 = vand.u32 2139095040, %v6266_v23  ;;  %v2450_v11 = vpop.f32.mrb[10].mxu1 }
 0x491   : > { %v2471_v36 = vshrl.u32 %v2470_v25, 23  ;;  %v2474_v21 = vand.u32 8388607, %v2467_v3  ;;  %v6274_v2 = vadd.f32 %v2450_v11, %v2354_v63  ;;  %v2452_v10 = vpop.f32.mrb[11].mxu1 }
 0x492   : > { %v2574_v53 = vshrl.u32 %v2573_v54, 23  ;;  %v2577_v33 = vand.u32 8388607, %v2570_v40  ;;  %v6286_v55 = vadd.f32 %v2452_v10, %v2354_v63 }
 0x493   : > { %v3947_v8 = vadd.s32 4294967169, %v2471_v36  ;;  %v2676_v59 = vand.u32 2139095040, %v6274_v2  ;;  %v2475_v15 = vor.u32 8388608, %v2474_v21  ;;  %v2673_v61 = vand.u32 2147483647, %v6274_v2 }
 0x494   : > { %v3951_v5 = vadd.s32 4294967169, %v2574_v53  ;;  %v6279_v9 = vpop.f32.mrb[12].mxu1  ;;  %v2578_v0 = vor.u32 8388608, %v2577_v33 }
 0x495   : > { %v2477_v30 = vadd.s32 1, %v3947_v8  ;;  %v2677_v19 = vshrl.u32 %v2676_v59, 23  ;;  %v6282_v32 = vpop.f32.mrb[13].mxu1  ;;  %v6290_v20 = vshll.u32 %v2475_v15, 8  ;;  %v6298_v4 = vand.u32 8388607, %v2673_v61 }
 0x496   : > { %v2580_v26 = vadd.s32 1, %v3951_v5  ;;  %v6294_v12 = vshll.u32 %v2578_v0, 8 }
 0x497   : > { %vm2478_vm15 = vcmp.gt.s32.totalorder %v2477_v30, 0  ;;  %v3955_v22 = vadd.s32 4294967169, %v2677_v19 }
 0x498   : > { %v2479_v47 = vsel %vm2478_vm15, %v2477_v30, 0  ;;  %vm2581_vm5 = vcmp.gt.s32.totalorder %v2580_v26, 0  ;;  %v6284_v57 = vpop.f32.mrb[14].mxu1 }
 0x499   : > { %v2480_v50 = vshrl.u32 %v2479_v47, 5  ;;  %v2481_v1 = vand.u32 31, %v2479_v47  ;;  %v2582_v29 = vsel %vm2581_vm5, %v2580_v26, 0  ;;  %v6288_v24 = vpop.f32.mrb[15].mxu1  ;;  %v6301_v7 = vadd.s32 1, %v3955_v22 }
 0x49a   : > { %v6292_v16 = vshrl.u32 %v2582_v29, 5  ;;  %v2584_v35 = vand.u32 31, %v2582_v29 }
 0x49b   : > { %v2482_v58 = vsub.s32 32, %v2481_v1  ;;  %v2484_v45 = vshll.u32 %v7248_v14, %v2481_v1  ;;  %v2487_v27 = vshll.u32 %v7249_v56, %v2481_v1  ;;  %v2490_v34 = vshll.u32 %v7250_v49, %v2481_v1 }
 0x49c   : > { %v2493_v13 = vshll.u32 %v7243_v44, %v2481_v1  ;;  %v2496_v41 = vshll.u32 %v7318_v37, %v2481_v1  ;;  %vm2499_vm6 = vcmp.lt.s32.totalorder %v2480_v50, 1  ;;  %vm2500_vm1 = vcmp.lt.s32.totalorder %v2480_v50, 2 }
 0x49d   : > { %v2485_v51 = vshrl.u32 %v7249_v56, %v2482_v58  ;;  %v2488_v28 = vshrl.u32 %v7250_v49, %v2482_v58  ;;  %v2491_v42 = vshrl.u32 %v7243_v44, %v2482_v58  ;;  %v2483_v6 = vshrl.u32 %v7248_v14, %v2482_v58 }
 0x49e   : > { %v2494_v18 = vshrl.u32 %v7318_v37, %v2482_v58  ;;  %v2497_v48 = vshrl.u32 %v7319_v46, %v2482_v58  ;;  %v2585_v38 = vsub.s32 32, %v2584_v35  ;;  %vm2501_vm11 = vcmp.lt.s32.totalorder %v2480_v50, 3 }
 0x49f   : > { %v2486_v17 = vor.u32 %v2485_v51, %v2484_v45  ;;  %v2489_v43 = vor.u32 %v2488_v28, %v2487_v27  ;;  %v2492_v60 = vor.u32 %v2491_v42, %v2490_v34  ;;  %vm2502_vm13 = vcmp.lt.s32.totalorder %v2480_v50, 4 }
 0x4a0   : > { %v2495_v62 = vor.u32 %v2494_v18, %v2493_v13  ;;  %v2498_v31 = vor.u32 %v2497_v48, %v2496_v41  ;;  %v2587_v53 = vshll.u32 %v7248_v14, %v2584_v35  ;;  %v2588_v5 = vshrl.u32 %v7249_v56, %v2585_v38 }
 0x4a1   : > { %v2503_v25 = vsel %vm2499_vm6, %v2483_v6, %v2486_v17  ;;  %v2504_v63 = vsel %vm2502_vm13, %v2492_v60, 2102212464  ;;  %v2507_v54 = vsel %vm2499_vm6, %v2486_v17, %v2489_v43  ;;  %v2511_v11 = vsel %vm2499_vm6, %v2489_v43, %v2492_v60 }
 0x4a2   : > { %v2505_v36 = vsel %vm2501_vm11, %v2489_v43, %v2504_v63  ;;  %v2508_v21 = vsel %vm2502_vm13, %v2495_v62, 920167782  ;;  %v2512_v10 = vsel %vm2502_vm13, %v2498_v31, 1326507024  ;;  %v2590_v59 = vshll.u32 %v7249_v56, %v2584_v35 }
 0x4a3   : > { %v2509_v33 = vsel %vm2501_vm11, %v2492_v60, %v2508_v21  ;;  %v2513_v8 = vsel %vm2501_vm11, %v2495_v62, %v2512_v10  ;;  %v2506_v15 = vsel %vm2500_vm1, %v2503_v25, %v2505_v36  ;;  %v2591_v26 = vshrl.u32 %v7250_v49, %v2585_v38 }
 0x4a4   : > { %v2510_v30 = vsel %vm2500_vm1, %v2507_v54, %v2509_v33  ;;  %v2514_v0 = vsel %vm2500_vm1, %v2511_v11, %v2513_v8  ;;  %v2589_v29 = vor.u32 %v2588_v5, %v2587_v53  ;;  %v2593_v45 = vshll.u32 %v7250_v49, %v2584_v35 }
 0x4a5   : > { %v6324_v19 = vmul.u32.u64.low %v6290_v20, %v2514_v0  ;;  %v6325_v47 = vmul.u32.u64.high %v6290_v20, %v2514_v0, %v6324_v19  ;;  %v6328_v22 = vmul.u32.u64.low %v6290_v20, %v2510_v30  ;;  %v6329_v1 = vmul.u32.u64.high %v6290_v20, %v2510_v30, %v6328_v22 }
 0x4a6   : > { %v2592_v58 = vor.u32 %v2591_v26, %v2590_v59  ;;  %v2594_v27 = vshrl.u32 %v7243_v44, %v2585_v38  ;;  %v2586_v50 = vshrl.u32 %v7248_v14, %v2585_v38  ;;  %v2596_v34 = vshll.u32 %v7243_v44, %v2584_v35 }
 0x4a7   : > { %v2597_v13 = vshrl.u32 %v7318_v37, %v2585_v38  ;;  %v2600_v41 = vshrl.u32 %v7319_v46, %v2585_v38  ;;  %v2522_v51 = vmul.u32 %v6290_v20, %v2506_v15  ;;  %v2599_v42 = vshll.u32 %v7318_v37, %v2584_v35 }
 0x4a8   : > { %v2595_v28 = vor.u32 %v2594_v27, %v2593_v45  ;;  %vm2602_vm8 = vcmp.lt.s32.totalorder %v6292_v16, 1  ;;  %vm2524_vm7 = vc.u32 %v6325_v47, %v6328_v22  ;;  %v2525_v6 = vadd.s32 1, %v6329_v1 }
 0x4a9   : > { %v2598_v18 = vor.u32 %v2597_v13, %v2596_v34  ;;  %vm2603_vm14 = vcmp.lt.s32.totalorder %v6292_v16, 2  ;;  %v2601_v48 = vor.u32 %v2600_v41, %v2599_v42  ;;  %vm2604_vm10 = vcmp.lt.s32.totalorder %v6292_v16, 3 }
 0x4aa   : > { %vm2605_vm4 = vcmp.lt.s32.totalorder %v6292_v16, 4  ;;  %v2610_v17 = vsel %vm2602_vm8, %v2589_v29, %v2592_v58  ;;  %v2526_v20 = vsel %vm2524_vm7, %v2525_v6, %v6329_v1  ;;  %v2614_v60 = vsel %vm2602_vm8, %v2592_v58, %v2595_v28 }
 0x4ab   : > { %v2607_v43 = vsel %vm2605_vm4, %v2595_v28, 2102212464  ;;  %v2611_v35 = vsel %vm2605_vm4, %v2598_v18, 920167782  ;;  %v2527_v38 = vadd.s32 %v2526_v20, %v2522_v51  ;;  %v2606_v62 = vsel %vm2602_vm8, %v2586_v50, %v2589_v29 }
 0x4ac   : > { %v2612_v31 = vsel %vm2604_vm10, %v2595_v28, %v2611_v35  ;;  %v2615_v25 = vsel %vm2605_vm4, %v2601_v48, 1326507024  ;;  %v2608_v63 = vsel %vm2604_vm10, %v2592_v58, %v2607_v43  ;;  %vm2684_vm9 = vcmp.gt.s32.totalorder %v6301_v7, 0 }
 0x4ad   : > { %v2613_v54 = vsel %vm2603_vm14, %v2610_v17, %v2612_v31  ;;  %v2616_v11 = vsel %vm2604_vm10, %v2598_v18, %v2615_v25  ;;  %v2528_v36 = vadd.s32 536870912, %v2527_v38  ;;  %v2685_v5 = vsel %vm2684_vm9, %v6301_v7, 0 }
 0x4ae   : > { %v2617_v21 = vsel %vm2603_vm14, %v2614_v60, %v2616_v11  ;;  %v6354_v10 = vmul.u32.u64.low %v6294_v12, %v2613_v54  ;;  %v6355_v53 = vmul.u32.u64.high %v6294_v12, %v2613_v54, %v6354_v10  ;;  %v2779_v59 = vand.u32 2139095040, %v6286_v55 }
 0x4af   : > { %v6359_v33 = vmul.u32.u64.low %v6294_v12, %v2617_v21  ;;  %v6360_v8 = vmul.u32.u64.high %v6294_v12, %v2617_v21, %v6359_v33  ;;  %v6364_v15 = vshrl.u32 %v2528_v36, 30  ;;  %v2609_v30 = vsel %vm2603_vm14, %v2606_v62, %v2608_v63 }
 0x4b0   : > { %v2687_v0 = vand.u32 31, %v2685_v5  ;;  %v2628_v19 = vadd.s32 1, %v6355_v53  ;;  %v2625_v29 = vmul.u32 %v6294_v12, %v2609_v30  ;;  %v2681_v7 = vor.u32 8388608, %v6298_v4 }
 0x4b1   : > { %v2530_v26 = vshll.u32 %v6364_v15, 30  ;;  %vm2627_vm0 = vc.u32 %v6360_v8, %v6354_v10  ;;  %v2780_v58 = vshrl.u32 %v2779_v59, 23  ;;  %v2686_v16 = vshrl.u32 %v2685_v5, 5 }
 0x4b2   : > { %v2688_v1 = vsub.s32 32, %v2687_v0  ;;  %v2629_v27 = vsel %vm2627_vm0, %v2628_v19, %v6355_v53  ;;  %v2690_v50 = vshll.u32 %v7248_v14, %v2687_v0  ;;  %v2693_v41 = vshll.u32 %v7249_v56, %v2687_v0 }
 0x4b3   : > { %v6374_v45 = vsub.s32 %v2527_v38, %v2530_v26  ;;  %v2630_v34 = vadd.s32 %v2629_v27, %v2625_v29  ;;  %v2696_v28 = vshll.u32 %v7250_v49, %v2687_v0  ;;  %v2699_v42 = vshll.u32 %v7243_v44, %v2687_v0 }
 0x4b4   : > { %v2691_v13 = vshrl.u32 %v7249_v56, %v2688_v1  ;;  %v2694_v12 = vshrl.u32 %v7250_v49, %v2688_v1  ;;  %v2697_v4 = vshrl.u32 %v7243_v44, %v2688_v1  ;;  %v2700_v17 = vshrl.u32 %v7318_v37, %v2688_v1 }
 0x4b5   : > { %v2533_v51 = vsub.s32 0, %v6374_v45  ;;  %v2631_v6 = vadd.s32 536870912, %v2630_v34  ;;  %v2702_v35 = vshll.u32 %v7318_v37, %v2687_v0  ;;  %v2703_v60 = vshrl.u32 %v7319_v46, %v2688_v1 }
 0x4b6   : > { %v2692_v18 = vor.u32 %v2691_v13, %v2690_v50  ;;  %v2695_v48 = vor.u32 %v2694_v12, %v2693_v41  ;;  %v2698_v43 = vor.u32 %v2697_v4, %v2696_v28  ;;  %v2701_v62 = vor.u32 %v2700_v17, %v2699_v42 }
 0x4b7   : > { %v3948_v20 = vmin.u32 %v2533_v51, %v6374_v45  ;;  %v6389_v38 = vshrl.u32 %v2631_v6, 30  ;;  %v2721_v31 = vshll.u32 %v2681_v7, 8  ;;  %v2776_v25 = vand.u32 2147483647, %v6286_v55 }
 0x4b8   : > { %v2704_v54 = vor.u32 %v2703_v60, %v2702_v35  ;;  %vm2705_vm3 = vcmp.lt.s32.totalorder %v2686_v16, 1  ;;  %v3959_v11 = vadd.s32 4294967169, %v2780_v58  ;;  %vm2706_vm2 = vcmp.lt.s32.totalorder %v2686_v16, 2 }
 0x4b9   : > { %v2535_v63 = vclz %v3948_v20  ;;  %v2633_v36 = vshll.u32 %v6389_v38, 30  ;;  %vm2708_vm15 = vcmp.lt.s32.totalorder %v2686_v16, 4  ;;  %v2713_v21 = vsel %vm2705_vm3, %v2692_v18, %v2695_v48 }
 0x4ba   : > { %vm2707_vm5 = vcmp.lt.s32.totalorder %v2686_v16, 3  ;;  %v2714_v33 = vsel %vm2708_vm15, %v2701_v62, 920167782  ;;  %v2717_v5 = vsel %vm2705_vm3, %v2695_v48, %v2698_v43  ;;  %v2710_v30 = vsel %vm2708_vm15, %v2698_v43, 2102212464 }
 0x4bb   : > { %v3949_v53 = vadd.s32 4294967294, %v2535_v63  ;;  %v6395_v59 = vsub.s32 %v2630_v34, %v2633_v36  ;;  %v2715_v0 = vsel %vm2707_vm5, %v2698_v43, %v2714_v33  ;;  %v2718_v26 = vsel %vm2708_vm15, %v2704_v54, 1326507024 }
 0x4bc   : > { %v2689_v19 = vshrl.u32 %v7248_v14, %v2688_v1  ;;  %v2716_v29 = vsel %vm2706_vm2, %v2713_v21, %v2715_v0  ;;  %v2719_v7 = vsel %vm2707_vm5, %v2701_v62, %v2718_v26  ;;  %v2786_v13 = vadd.s32 1, %v3959_v11 }
 0x4bd   : > { %vm3950_vm6 = vcmp.lt.s32.totalorder %v3949_v53, 0  ;;  %v2636_v27 = vsub.s32 0, %v6395_v59  ;;  %v2720_v50 = vsel %vm2706_vm2, %v2717_v5, %v2719_v7  ;;  %v2711_v12 = vsel %vm2707_vm5, %v2695_v48, %v2710_v30  ;;  %v2359_v5 = vpop.permute.xlu0 %2358 }
 0x4be   : > { %v2538_v58 = vsel %vm3950_vm6, 0, %v3949_v53  ;;  %v2709_v34 = vsel %vm2705_vm3, %v2689_v19, %v2692_v18  ;;  %v6406_v28 = vmul.u32.u64.low %v2721_v31, %v2720_v50  ;;  %v6407_v4 = vmul.u32.u64.high %v2721_v31, %v2720_v50, %v6406_v28 }
 0x4bf   : > { %v2543_v41 = vsub.s32 4294967266, %v2538_v58  ;;  %v3952_v51 = vmin.u32 %v2636_v27, %v6395_v59  ;;  %vm2787_vm1 = vcmp.gt.s32.totalorder %v2786_v13, 0  ;;  %v2539_v17 = vsub.s32 32, %v2538_v58 }
 0x4c0   : > { %v6409_v42 = vmul.u32.u64.low %v2721_v31, %v2716_v29  ;;  %v6410_v6 = vmul.u32.u64.high %v2721_v31, %v2716_v29, %v6409_v42  ;;  %v2783_v43 = vand.u32 8388607, %v2776_v25  ;;  %v2788_v35 = vsel %vm2787_vm1, %v2786_v13, 0 }
 0x4c1   : > { %v2544_v1 = vadd.s32 127, %v2543_v41  ;;  %v2638_v20 = vclz %v3952_v51  ;;  %v2712_v18 = vsel %vm2706_vm2, %v2709_v34, %v2711_v12  ;;  %v2790_v48 = vand.u32 31, %v2788_v35 }
 0x4c2   : > { %v2523_v60 = vadd.s32 %v6328_v22, %v6325_v47  ;;  %vm2730_vm11 = vc.u32 %v6407_v4, %v6409_v42  ;;  %v2731_v54 = vadd.s32 1, %v6410_v6  ;;  %v2728_v36 = vmul.u32 %v2721_v31, %v2712_v18 }
 0x4c3   : > { %v3953_v62 = vadd.s32 4294967294, %v2638_v20  ;;  %v2545_v63 = vshll.u32 %v2544_v1, 23  ;;  %v2784_v21 = vor.u32 8388608, %v2783_v43  ;;  %v2791_v33 = vsub.s32 32, %v2790_v48 }
 0x4c4   : > { %v2541_v11 = vshrl.u32 %v2523_v60, %v2539_v17  ;;  %v2732_v16 = vsel %vm2730_vm11, %v2731_v54, %v6410_v6  ;;  %v2540_v30 = vshll.u32 %v6374_v45, %v2538_v58  ;;  %v2626_v0 = vadd.s32 %v6354_v10, %v6360_v8 }
 0x4c5   : > { %vm3954_vm13 = vcmp.lt.s32.totalorder %v3953_v62, 0  ;;  %v2733_v47 = vadd.s32 %v2732_v16, %v2728_v36  ;;  %v2546_v22 = vor.u32 4788187, %v2545_v63  ;;  %v6428_v26 = vadd.f32 %v6279_v9, %v2359_v5 }
 0x4c6   : > { %v6421_v53 = vsel %vm3954_vm13, 0, %v3953_v62  ;;  %v6431_v19 = vadd.f32 %v6282_v32, %v2359_v5  ;;  %v2542_v31 = vor.u32 %v2541_v11, %v2540_v30  ;;  %v6434_v27 = vshll.u32 %v2784_v21, 8 }
 0x4c7   : > { %v2646_v29 = vsub.s32 4294967266, %v6421_v53  ;;  %v2734_v7 = vadd.s32 536870912, %v2733_v47  ;;  %v2789_v50 = vshrl.u32 %v2788_v35, 5  ;;  %v2793_v45 = vshll.u32 %v7248_v14, %v2790_v48 }
 0x4c8   : > { %v2794_v58 = vshrl.u32 %v7249_v56, %v2791_v33  ;;  %v2797_v13 = vshrl.u32 %v7250_v49, %v2791_v33  ;;  %v2796_v9 = vshll.u32 %v7249_v56, %v2790_v48  ;;  %v2800_v32 = vshrl.u32 %v7243_v44, %v2791_v33 }
 0x4c9   : > { %v6439_v10 = vshrl.u32 %v2734_v7, 30  ;;  %v2803_v8 = vshrl.u32 %v7318_v37, %v2791_v33  ;;  %v2547_v41 = vand.u32 2147483647, %v2546_v22  ;;  %v2642_v34 = vsub.s32 32, %v6421_v53 }
 0x4ca   : > { %v2802_v12 = vshll.u32 %v7243_v44, %v2790_v48  ;;  %v2806_v51 = vshrl.u32 %v7319_v46, %v2791_v33  ;;  %v2549_v28 = vcvt.s32.f32 %v2542_v31  ;;  %v2647_v1 = vadd.s32 127, %v2646_v29 }
 0x4cb   : > { %v2736_v6 = vshll.u32 %v6439_v10, 30  ;;  %v2799_v17 = vshll.u32 %v7250_v49, %v2790_v48  ;;  %v2795_v20 = vor.u32 %v2794_v58, %v2793_v45  ;;  %v2798_v43 = vor.u32 %v2797_v13, %v2796_v9 }
 0x4cc   : > { %v2804_v35 = vor.u32 %v2803_v8, %v2802_v12  ;;  %v2805_v18 = vshll.u32 %v7318_v37, %v2790_v48  ;;  %v2792_v62 = vshrl.u32 %v7248_v14, %v2791_v33  ;;  %v7225_v54 = vand.u32 2147483647, %v6428_v26 }
 0x4cd   : > { %v6450_v60 = vsub.s32 %v2733_v47, %v2736_v6  ;;  %v2801_v63 = vor.u32 %v2800_v32, %v2799_v17  ;;  %v2550_v11 = vmul.f32 %v2549_v28, %v2547_v41  ;;  %v2643_v36 = vshll.u32 %v6395_v59, %v6421_v53 }
 0x4ce   : > { %v2644_v21 = vshrl.u32 %v2626_v0, %v2642_v34  ;;  %v2807_v16 = vor.u32 %v2806_v51, %v2805_v18  ;;  %v2648_v5 = vshll.u32 %v2647_v1, 23  ;;  %vm2808_vm8 = vcmp.lt.s32.totalorder %v2789_v50, 1 }
 0x4cf   : > { %v2739_v30 = vsub.s32 0, %v6450_v60  ;;  %vm2811_vm7 = vcmp.lt.s32.totalorder %v2789_v50, 4  ;;  %vm2809_vm14 = vcmp.lt.s32.totalorder %v2789_v50, 2  ;;  %vm2810_vm10 = vcmp.lt.s32.totalorder %v2789_v50, 3 }
 0x4d0   : > { %v2816_v48 = vsel %vm2808_vm8, %v2795_v20, %v2798_v43  ;;  %v2817_v47 = vsel %vm2811_vm7, %v2804_v35, 920167782  ;;  %v2813_v22 = vsel %vm2811_vm7, %v2801_v63, 2102212464  ;;  %v2820_v29 = vsel %vm2808_vm8, %v2798_v43, %v2801_v63 }
 0x4d1   : > { %v3956_v33 = vmin.u32 %v2739_v30, %v6450_v60  ;;  %v2818_v31 = vsel %vm2810_vm10, %v2801_v63, %v2817_v47  ;;  %v2551_v7 = vxor.u32 2147483648, %v2550_v11  ;;  %v2821_v53 = vsel %vm2811_vm7, %v2807_v16, 1326507024 }
 0x4d2   : > { %v2819_v59 = vsel %vm2809_vm14, %v2816_v48, %v2818_v31  ;;  %v2882_v0 = vand.u32 2139095040, %v6428_v26  ;;  %v2649_v45 = vor.u32 4788187, %v2648_v5  ;;  %v2812_v13 = vsel %vm2808_vm8, %v2792_v62, %v2795_v20 }
 0x4d3   : > { %v2741_v58 = vclz %v3956_v33  ;;  %v2822_v9 = vsel %vm2810_vm10, %v2804_v35, %v2821_v53  ;;  %v2814_v32 = vsel %vm2810_vm10, %v2798_v43, %v2813_v22  ;;  %v2645_v12 = vor.u32 %v2644_v21, %v2643_v36 }
 0x4d4   : > { %v2823_v8 = vsel %vm2809_vm14, %v2820_v29, %v2822_v9  ;;  %v6465_v41 = vmul.u32.u64.low %v6434_v27, %v2819_v59  ;;  %v6466_v34 = vmul.u32.u64.high %v6434_v27, %v2819_v59, %v6465_v41  ;;  %vm2469_vm4 = vcmp.lt.s32.totalorder %v6264_v52, 0 }
 0x4d5   : > { %v3957_v51 = vadd.s32 4294967294, %v2741_v58  ;;  %v6470_v28 = vmul.u32.u64.low %v6434_v27, %v2823_v8  ;;  %v6471_v1 = vmul.u32.u64.high %v6434_v27, %v2823_v8, %v6470_v28  ;;  %v2883_v6 = vshrl.u32 %v2882_v0, 23 }
 0x4d6   : > { %v2650_v17 = vand.u32 2147483647, %v2649_v45  ;;  %v2815_v20 = vsel %vm2809_vm14, %v2812_v13, %v2814_v32  ;;  %v2886_v43 = vand.u32 8388607, %v7225_v54  ;;  %v2552_v35 = vsel %vm2469_vm4, %v2551_v7, %v2550_v11 }
 0x4d7   : > { %vm3958_vm9 = vcmp.lt.s32.totalorder %v3957_v51, 0  ;;  %v2834_v18 = vadd.s32 1, %v6466_v34  ;;  %v3963_v62 = vadd.s32 4294967169, %v2883_v6  ;;  %v2652_v63 = vcvt.s32.f32 %v2645_v12 }
 0x4d8   : > { %v6480_v36 = vsel %vm3958_vm9, 0, %v3957_v51  ;;  %v2985_v21 = vand.u32 2139095040, %v6431_v19  ;;  %vm6485_vm0 = vcmp.le.f32.partialorder %v2467_v3, 0.7853982  ;;  %v2831_v50 = vmul.u32 %v6434_v27, %v2815_v20  ;;  %v6500_v3 = vpop.permute.xlu1 %2363 }
 0x4d9   : > { %vm2833_vm3 = vc.u32 %v6471_v1, %v6465_v41  ;;  %v2889_v11 = vadd.s32 1, %v3963_v62  ;;  %v6495_v5 = vsel %vm6485_vm0, %v6264_v52, %v2552_v35  ;;  %v6497_v30 = vmul.f32 %v2652_v63, %v2650_v17 }
 0x4da   : > { %v2835_v48 = vsel %vm2833_vm3, %v2834_v18, %v6466_v34  ;;  %v2887_v47 = vor.u32 8388608, %v2886_v43  ;;  %v2749_v33 = vsub.s32 4294967266, %v6480_v36  ;;  %v2553_v27 = vsub.s32 4, %v6364_v15 }
 0x4db   : > { %v2836_v22 = vadd.s32 %v2835_v48, %v2831_v50  ;;  %vm2890_vm2 = vcmp.gt.s32.totalorder %v2889_v11, 0  ;;  %v2986_v29 = vshrl.u32 %v2985_v21, 23  ;;  %v6506_v7 = vadd.f32 %v6284_v57, %v6500_v3 }
 0x4dc   : > { %v2891_v31 = vsel %vm2890_vm2, %v2889_v11, 0  ;;  %4371 = vcosq.f32 %v6495_v5  ;;  %v2729_v59 = vadd.s32 %v6409_v42, %v6407_v4  ;;  %v2654_v45 = vxor.u32 2147483648, %v6497_v30 }
 0x4dd   : > { %v2837_v53 = vadd.s32 536870912, %v2836_v22  ;;  %v2893_v0 = vand.u32 31, %v2891_v31  ;;  %v2745_v58 = vsub.s32 32, %v6480_v36  ;;  %v6513_v13 = vshll.u32 %v2887_v47, 8 }
 0x4de   : > { %v7223_v9 = vand.u32 2147483647, %v6431_v19  ;;  %v2746_v32 = vshll.u32 %v6450_v60, %v6480_v36  ;;  %v2750_v57 = vadd.s32 127, %v2749_v33  ;;  %v2892_v12 = vshrl.u32 %v2891_v31, 5 }
 0x4df   : > { %v6518_v8 = vshrl.u32 %v2837_v53, 30  ;;  %v2894_v34 = vsub.s32 32, %v2893_v0  ;;  %v2896_v4 = vshll.u32 %v7248_v14, %v2893_v0  ;;  %v2899_v42 = vshll.u32 %v7249_v56, %v2893_v0 }
 0x4e0   : > { %v3967_v51 = vadd.s32 4294967169, %v2986_v29  ;;  %v2902_v20 = vshll.u32 %v7250_v49, %v2893_v0  ;;  %v2905_v43 = vshll.u32 %v7243_v44, %v2893_v0  ;;  %v2908_v21 = vshll.u32 %v7318_v37, %v2893_v0 }
 0x4e1   : > { %v2839_v28 = vshll.u32 %v6518_v8, 30  ;;  %v2897_v6 = vshrl.u32 %v7249_v56, %v2894_v34  ;;  %v2900_v17 = vshrl.u32 %v7250_v49, %v2894_v34  ;;  %v2903_v60 = vshrl.u32 %v7243_v44, %v2894_v34 }
 0x4e2   : > { %v2906_v35 = vshrl.u32 %v7318_v37, %v2894_v34  ;;  %v2909_v18 = vshrl.u32 %v7319_v46, %v2894_v34  ;;  %v2747_v50 = vshrl.u32 %v2729_v59, %v2745_v58  ;;  %v6535_v47 = vand.u32 8388607, %v7223_v9 }
 0x4e3   : > { %v6530_v62 = vsub.s32 %v2836_v22, %v2839_v28  ;;  %v2898_v63 = vor.u32 %v2897_v6, %v2896_v4  ;;  %v2901_v36 = vor.u32 %v2900_v17, %v2899_v42  ;;  %v2904_v11 = vor.u32 %v2903_v60, %v2902_v20 }
 0x4e4   : > { %v2907_v48 = vor.u32 %v2906_v35, %v2905_v43  ;;  %v2751_v33 = vshll.u32 %v2750_v57, 23  ;;  %v2910_v29 = vor.u32 %v2909_v18, %v2908_v21  ;;  %vm2911_vm15 = vcmp.lt.s32.totalorder %v2892_v12, 1 }
 0x4e5   : > { %v2842_v31 = vsub.s32 0, %v6530_v62  ;;  %v2895_v53 = vshrl.u32 %v7248_v14, %v2894_v34  ;;  %vm2914_vm5 = vcmp.lt.s32.totalorder %v2892_v12, 4  ;;  %v2919_v22 = vsel %vm2911_vm15, %v2898_v63, %v2901_v36 }
 0x4e6   : > { %v2992_v4 = vadd.s32 1, %v3967_v51  ;;  %v6539_v42 = vpop.eup %4371  ;;  %vm2913_vm6 = vcmp.lt.s32.totalorder %v2892_v12, 3  ;;  %v2916_v0 = vsel %vm2914_vm5, %v2904_v11, 2102212464  ;;  %v2920_v58 = vsel %vm2914_vm5, %v2907_v48, 920167782 }
 0x4e7   : > { %v3960_v59 = vmin.u32 %v2842_v31, %v6530_v62  ;;  %v2748_v28 = vor.u32 %v2747_v50, %v2746_v32  ;;  %vm2912_vm1 = vcmp.lt.s32.totalorder %v2892_v12, 2  ;;  %v2921_v6 = vsel %vm2913_vm6, %v2904_v11, %v2920_v58 }
 0x4e8   : > { %v2923_v57 = vsel %vm2911_vm15, %v2901_v36, %v2904_v11  ;;  %v2915_v20 = vsel %vm2911_vm15, %v2895_v53, %v2898_v63  ;;  %v2922_v60 = vsel %vm2912_vm1, %v2919_v22, %v2921_v6  ;;  %v2924_v43 = vsel %vm2914_vm5, %v2910_v29, 1326507024 }
 0x4e9   : > { %v2844_v17 = vclz %v3960_v59  ;;  %v2917_v34 = vsel %vm2913_vm6, %v2901_v36, %v2916_v0  ;;  %v2925_v35 = vsel %vm2913_vm6, %v2907_v48, %v2924_v43  ;;  %v2752_v21 = vor.u32 4788187, %v2751_v33 }
 0x4ea   : > { %v6544_v51 = vmul.u32.u64.low %v6513_v13, %v2922_v60  ;;  %v6545_v18 = vmul.u32.u64.high %v6513_v13, %v2922_v60, %v6544_v51  ;;  %v2926_v9 = vsel %vm2912_vm1, %v2923_v57, %v2925_v35  ;;  %vm2993_vm11 = vcmp.gt.s32.totalorder %v2992_v4, 0 }
 0x4eb   : > { %v3961_v31 = vadd.s32 4294967294, %v2844_v17  ;;  %v6550_v32 = vmul.u32.u64.low %v6513_v13, %v2926_v9  ;;  %v6551_v50 = vmul.u32.u64.high %v6513_v13, %v2926_v9, %v6550_v32  ;;  %v2994_v63 = vsel %vm2993_vm11, %v2992_v4, 0 }
 0x4ec   : > { %v7224_v11 = vand.u32 2147483647, %v6506_v7  ;;  %v2832_v36 = vadd.s32 %v6465_v41, %v6471_v1  ;;  %v2918_v48 = vsel %vm2912_vm1, %v2915_v20, %v2917_v34  ;;  %v2996_v29 = vand.u32 31, %v2994_v63 }
 0x4ed   : > { %vm3962_vm13 = vcmp.lt.s32.totalorder %v3961_v31, 0  ;;  %v2755_v53 = vcvt.s32.f32 %v2748_v28  ;;  %v2937_v22 = vadd.s32 1, %v6545_v18  ;;  %v2990_v59 = vor.u32 8388608, %v6535_v47 }
 0x4ee   : > { %v2847_v33 = vsel %vm3962_vm13, 0, %v3961_v31  ;;  %v2753_v0 = vand.u32 2147483647, %v2752_v21  ;;  %v2997_v6 = vsub.s32 32, %v2996_v29  ;;  %v2934_v4 = vmul.u32 %v6513_v13, %v2918_v48 }
 0x4ef   : > { %v2848_v58 = vsub.s32 32, %v2847_v33  ;;  %v2852_v9 = vsub.s32 4294967266, %v2847_v33  ;;  %vm2936_vm8 = vc.u32 %v6551_v50, %v6544_v51  ;;  %v6562_v41 = vshrl.u32 %v2994_v63, 5 }
 0x4f0   : > { %v3088_v1 = vand.u32 2139095040, %v6506_v7  ;;  %v2849_v12 = vshll.u32 %v6530_v62, %v2847_v33  ;;  %v2938_v17 = vsel %vm2936_vm8, %v2937_v22, %v6545_v18  ;;  %v2999_v20 = vshll.u32 %v7248_v14, %v2996_v29 }
 0x4f1   : > { %v2850_v28 = vshrl.u32 %v2832_v36, %v2848_v58  ;;  %v2853_v57 = vadd.s32 127, %v2852_v9  ;;  %v2939_v47 = vadd.s32 %v2938_v17, %v2934_v4  ;;  %v3000_v60 = vshrl.u32 %v7249_v56, %v2997_v6 }
 0x4f2   : > { %v3003_v13 = vshrl.u32 %v7250_v49, %v2997_v6  ;;  %v3002_v34 = vshll.u32 %v7249_v56, %v2996_v29  ;;  %v3005_v35 = vshll.u32 %v7250_v49, %v2996_v29  ;;  %v3006_v21 = vshrl.u32 %v7243_v44, %v2997_v6 }
 0x4f3   : > { %v2854_v43 = vshll.u32 %v2853_v57, 23  ;;  %v2851_v31 = vor.u32 %v2850_v28, %v2849_v12  ;;  %v2940_v62 = vadd.s32 536870912, %v2939_v47  ;;  %v3008_v32 = vshll.u32 %v7243_v44, %v2996_v29 }
 0x4f4   : > { %v3009_v18 = vshrl.u32 %v7318_v37, %v2997_v6  ;;  %v3001_v36 = vor.u32 %v3000_v60, %v2999_v20  ;;  %v3004_v48 = vor.u32 %v3003_v13, %v3002_v34  ;;  %v3007_v33 = vor.u32 %v3006_v21, %v3005_v35 }
 0x4f5   : > { %v2855_v63 = vor.u32 4788187, %v2854_v43  ;;  %vm2572_vm7 = vcmp.lt.s32.totalorder %v6266_v23, 0  ;;  %v6576_v22 = vshrl.u32 %v2940_v62, 30  ;;  %v3011_v9 = vshll.u32 %v7318_v37, %v2996_v29 }
 0x4f6   : > { %v3010_v58 = vor.u32 %v3009_v18, %v3008_v32  ;;  %v3012_v4 = vshrl.u32 %v7319_v46, %v2997_v6  ;;  %v2756_v57 = vmul.f32 %v2755_v53, %v2753_v0  ;;  %v2998_v12 = vshrl.u32 %v7248_v14, %v2997_v6 }
 0x4f7   : > { %vm3014_vm14 = vcmp.lt.s32.totalorder %v6562_v41, 1  ;;  %v3089_v28 = vshrl.u32 %v3088_v1, 23  ;;  %v2856_v17 = vand.u32 2147483647, %v2855_v63  ;;  %v2942_v20 = vshll.u32 %v6576_v22, 30 }
 0x4f8   : > { %v3013_v60 = vor.u32 %v3012_v4, %v3011_v9  ;;  %vm3017_vm10 = vcmp.lt.s32.totalorder %v6562_v41, 4  ;;  %vm6586_vm9 = vcmp.le.f32.partialorder %v2570_v40, 0.7853982  ;;  %vm2675_vm3 = vcmp.lt.s32.totalorder %v6274_v2, 0 }
 0x4f9   : > { %v2858_v29 = vcvt.s32.f32 %v2851_v31  ;;  %vm3016_vm2 = vcmp.lt.s32.totalorder %v6562_v41, 3  ;;  %v3022_v53 = vsel %vm3014_vm14, %v3001_v36, %v3004_v48  ;;  %v3023_v0 = vsel %vm3017_vm10, %v3010_v58, 920167782 }
 0x4fa   : > { %v6596_v6 = vsub.s32 %v2939_v47, %v2942_v20  ;;  %vm3015_vm15 = vcmp.lt.s32.totalorder %v6562_v41, 2  ;;  %v3019_v40 = vsel %vm3017_vm10, %v3007_v33, 2102212464  ;;  %v3024_v1 = vsel %vm3016_vm2, %v3007_v33, %v3023_v0 }
 0x4fb   : > { %v2757_v43 = vxor.u32 2147483648, %v2756_v57  ;;  %vm2778_vm5 = vcmp.lt.s32.totalorder %v6286_v55, 0  ;;  %v3018_v34 = vsel %vm3014_vm14, %v2998_v12, %v3001_v36  ;;  %v3025_v35 = vsel %vm3015_vm15, %v3022_v53, %v3024_v1 }
 0x4fc   : > { %v3030_v21 = vshll.u32 %v2990_v59, 8  ;;  %v2859_v47 = vmul.f32 %v2858_v29, %v2856_v17  ;;  %v2945_v31 = vsub.s32 0, %v6596_v6  ;;  %v3026_v62 = vsel %vm3014_vm14, %v3004_v48, %v3007_v33 }
 0x4fd   : > { %v3027_v32 = vsel %vm3017_vm10, %v3013_v60, 1326507024  ;;  %vm6615_vm6 = vcmp.le.f32.partialorder %v2673_v61, 0.7853982  ;;  %v3020_v63 = vsel %vm3016_vm2, %v3004_v48, %v3019_v40  ;;  %v3971_v12 = vadd.s32 4294967169, %v3089_v28 }
 0x4fe   : > { %v3028_v59 = vsel %vm3016_vm2, %v3010_v58, %v3027_v32  ;;  %v6623_v36 = vmul.u32.u64.low %v3030_v21, %v3025_v35  ;;  %v6624_v9 = vmul.u32.u64.high %v3030_v21, %v3025_v35, %v6623_v36  ;;  %v3964_v33 = vmin.u32 %v2945_v31, %v6596_v6 }
 0x4ff   : > { %v3029_v4 = vsel %vm3015_vm15, %v3026_v62, %v3028_v59  ;;  %v3092_v61 = vand.u32 8388607, %v7224_v11  ;;  %v2655_v48 = vsel %vm2572_vm7, %v2654_v45, %v6497_v30  ;;  %v6642_v20 = vadd.f32 %v6288_v24, %v6500_v3 }
 0x500   : > { %v6637_v58 = vmul.u32.u64.low %v3030_v21, %v3029_v4  ;;  %v6638_v17 = vmul.u32.u64.high %v3030_v21, %v3029_v4, %v6637_v58  ;;  %v2860_v60 = vxor.u32 2147483648, %v2859_v47  ;;  %v2947_v29 = vclz %v3964_v33 }
 0x501   : > { %v3021_v28 = vsel %vm3015_vm15, %v3018_v34, %v3020_v63  ;;  %v3095_v53 = vadd.s32 1, %v3971_v12  ;;  %v6651_v0 = vsel %vm2469_vm4, %v2553_v27, %v6364_v15  ;;  %4373 = vsinq.f32 %v6495_v5 }
 0x502   : > { %v2759_v30 = vsub.s32 4, %v6439_v10  ;;  %v3040_v24 = vadd.s32 1, %v6624_v9  ;;  %v2658_v3 = vsel %vm6586_vm9, %v6266_v23, %v2655_v48  ;;  %v2758_v45 = vsel %vm2675_vm3, %v2757_v43, %v2756_v57 }
 0x503   : > { %v3093_v41 = vor.u32 8388608, %v3092_v61  ;;  %vm3096_vm1 = vcmp.gt.s32.totalorder %v3095_v53, 0  ;;  %v3965_v40 = vadd.s32 4294967294, %v2947_v29  ;;  %v3037_v1 = vmul.u32 %v3030_v21, %v3021_v28 }
 0x504   : > { %vm3039_vm4 = vc.u32 %v6638_v17, %v6623_v36  ;;  %v3097_v15 = vsel %vm3096_vm1, %v3095_v53, 0  ;;  %v2861_v5 = vsel %vm2778_vm5, %v2860_v60, %v2859_v47  ;;  %v3191_v35 = vand.u32 2139095040, %v6642_v20 }
 0x505   : > { %v3041_v27 = vsel %vm3039_vm4, %v3040_v24, %v6624_v9  ;;  %v3099_v34 = vand.u32 31, %v3097_v15  ;;  %4375 = vcosq.f32 %v2658_v3  ;;  %vm6672_vm11 = vcmp.le.f32.partialorder %v2776_v25, 0.7853982 }
 0x506   : > { %v3042_v21 = vadd.s32 %v3041_v27, %v3037_v1  ;;  %4377 = vsinq.f32 %v2658_v3  ;;  %v6679_v47 = vsel %vm2675_vm3, %v2759_v30, %v6439_v10  ;;  %v6684_v31 = vsel %vm6615_vm6, %v6274_v2, %v2758_v45 }
 0x507   : > { %v3100_v62 = vsub.s32 32, %v3099_v34  ;;  %v6689_v25 = vsel %vm6672_vm11, %v6286_v55, %v2861_v5  ;;  %vm3966_vm13 = vcmp.lt.s32.totalorder %v3965_v40, 0  ;;  %v6691_v63 = vshll.u32 %v3093_v41, 8 }
 0x508   : > { %v3043_v32 = vadd.s32 536870912, %v3042_v21  ;;  %v3102_v59 = vshll.u32 %v7248_v14, %v3099_v34  ;;  %v3105_v9 = vshll.u32 %v7249_v56, %v3099_v34  ;;  %v3192_v33 = vshrl.u32 %v3191_v35, 23 }
 0x509   : > { %v3103_v10 = vshrl.u32 %v7249_v56, %v3100_v62  ;;  %v3106_v12 = vshrl.u32 %v7250_v49, %v3100_v62  ;;  %v3108_v61 = vshll.u32 %v7250_v49, %v3099_v34  ;;  %v3109_v48 = vshrl.u32 %v7243_v44, %v3100_v62 }
 0x50a   : > { %v6696_v4 = vshrl.u32 %v3043_v32, 30  ;;  %v6701_v58 = vsel %vm3966_vm13, 0, %v3965_v40  ;;  %v3098_v60 = vshrl.u32 %v3097_v15, 5  ;;  %v3111_v29 = vshll.u32 %v7243_v44, %v3099_v34 }
 0x50b   : > { %v3112_v28 = vshrl.u32 %v7318_v37, %v3100_v62  ;;  %v6705_v53 = vpop.eup %4373  ;;  %v3104_v24 = vor.u32 %v3103_v10, %v3102_v59  ;;  %v3107_v3 = vor.u32 %v3106_v12, %v3105_v9  ;;  %v3110_v45 = vor.u32 %v3109_v48, %v3108_v61 }
 0x50c   : > { %v3045_v30 = vshll.u32 %v6696_v4, 30  ;;  %v3114_v1 = vshll.u32 %v7318_v37, %v3099_v34  ;;  %v3115_v5 = vshrl.u32 %v7319_v46, %v3100_v62  ;;  %v2955_v15 = vsub.s32 4294967266, %v6701_v58 }
 0x50d   : > { %v3113_v41 = vor.u32 %v3112_v28, %v3111_v29  ;;  %v3101_v35 = vshrl.u32 %v7248_v14, %v3100_v62  ;;  %v3975_v32 = vadd.s32 4294967169, %v3192_v33  ;;  %vm3117_vm8 = vcmp.lt.s32.totalorder %v3098_v60, 1 }
 0x50e   : > { %v6712_v27 = vsub.s32 %v3042_v21, %v3045_v30  ;;  %v3116_v11 = vor.u32 %v3115_v5, %v3114_v1  ;;  %vm3119_vm14 = vcmp.lt.s32.totalorder %v3098_v60, 3  ;;  %vm3120_vm10 = vcmp.lt.s32.totalorder %v3098_v60, 4 }
 0x50f   : > { %v6715_v59 = vpop.eup %4375  ;;  %v3122_v34 = vsel %vm3120_vm10, %v3110_v45, 2102212464  ;;  %v3125_v9 = vsel %vm3117_vm8, %v3104_v24, %v3107_v3  ;;  %v3126_v12 = vsel %vm3120_vm10, %v3113_v41, 920167782  ;;  %v2951_v48 = vsub.s32 32, %v6701_v58 }
 0x510   : > { %v3048_v10 = vsub.s32 0, %v6712_v27  ;;  %v6718_v61 = vpop.eup %4377  ;;  %vm3118_vm3 = vcmp.lt.s32.totalorder %v3098_v60, 2  ;;  %v3127_v21 = vsel %vm3119_vm14, %v3110_v45, %v3126_v12  ;;  %v3129_v62 = vsel %vm3117_vm8, %v3107_v3, %v3110_v45 }
 0x511   : > { %v3121_v29 = vsel %vm3117_vm8, %v3101_v35, %v3104_v24  ;;  %v3128_v28 = vsel %vm3118_vm3, %v3125_v9, %v3127_v21  ;;  %v3130_v30 = vsel %vm3120_vm10, %v3116_v11, 1326507024  ;;  %v3123_v1 = vsel %vm3119_vm14, %v3107_v3, %v3122_v34 }
 0x512   : > { %v3968_v33 = vmin.u32 %v3048_v10, %v6712_v27  ;;  %v3131_v5 = vsel %vm3119_vm14, %v3113_v41, %v3130_v30  ;;  %v6727_v54 = vmul.u32.u64.low %v6691_v63, %v3128_v28  ;;  %v6728_v57 = vmul.u32.u64.high %v6691_v63, %v3128_v28, %v6727_v54 }
 0x513   : > { %v2956_v40 = vadd.s32 127, %v2955_v15  ;;  %v3132_v12 = vsel %vm3118_vm3, %v3129_v62, %v3131_v5  ;;  %v3198_v45 = vadd.s32 1, %v3975_v32  ;;  %4379 = vcosq.f32 %v6684_v31 }
 0x514   : > { %v3050_v39 = vclz %v3968_v33  ;;  %v6734_v24 = vmul.u32.u64.low %v6691_v63, %v3132_v12  ;;  %v6735_v35 = vmul.u32.u64.high %v6691_v63, %v3132_v12, %v6734_v24  ;;  %v2656_v11 = vsub.s32 4, %v6389_v38 }
 0x515   : > { %v2935_v3 = vadd.s32 %v6544_v51, %v6551_v50  ;;  %v3124_v10 = vsel %vm3118_vm3, %v3121_v29, %v3123_v1  ;;  %vm3199_vm2 = vcmp.gt.s32.totalorder %v3198_v45, 0  ;;  %4381 = vcosq.f32 %v6689_v25 }
 0x516   : > { %v3969_v41 = vadd.s32 4294967294, %v3050_v39  ;;  %v3143_v15 = vadd.s32 1, %v6728_v57  ;;  %v7328_v32 = vand.u32 2147483647, %v6642_v20  ;;  %v3200_v9 = vsel %vm3199_vm2, %v3198_v45, 0 }
 0x517   : > { %v2953_v21 = vshrl.u32 %v2935_v3, %v2951_v48  ;;  %v2957_v62 = vshll.u32 %v2956_v40, 23  ;;  %v3202_v33 = vand.u32 31, %v3200_v9  ;;  %v3140_v51 = vmul.u32 %v6691_v63, %v3124_v10 }
 0x518   : > { %v3195_v34 = vand.u32 8388607, %v7328_v32  ;;  %vm3970_vm15 = vcmp.lt.s32.totalorder %v3969_v41, 0  ;;  %vm3142_vm1 = vc.u32 %v6735_v35, %v6727_v54  ;;  %v2657_v39 = vsel %vm2572_vm7, %v2656_v11, %v6389_v38 }
 0x519   : > { %v6745_v28 = vsel %vm3970_vm15, 0, %v3969_v41  ;;  %v2762_v50 = vsel %vm6615_vm6, 0, %v6679_v47  ;;  %4383 = vsinq.f32 %v6689_v25  ;;  %v2952_v60 = vshll.u32 %v6596_v6, %v6701_v58 }
 0x51a   : > { %v3144_v40 = vsel %vm3142_vm1, %v3143_v15, %v6728_v57  ;;  %v3038_v63 = vadd.s32 %v6623_v36, %v6638_v17  ;;  %v3196_v29 = vor.u32 8388608, %v3195_v34  ;;  %v3203_v30 = vsub.s32 32, %v3202_v33 }
 0x51b   : > { %v3145_v48 = vadd.s32 %v3144_v40, %v3140_v51  ;;  %v6762_v1 = vor.u32 %v2953_v21, %v2952_v60  ;;  %v6764_v38 = vor.u32 4788187, %v2957_v62  ;;  %v3058_v5 = vsub.s32 4294967266, %v6745_v28 }
 0x51c   : > { %v2659_v25 = vsel %vm6586_vm9, 0, %v2657_v39  ;;  %v3205_v6 = vshll.u32 %v7248_v14, %v3202_v33  ;;  %v3206_v57 = vshrl.u32 %v7249_v56, %v3203_v30  ;;  %v3209_v58 = vshrl.u32 %v7250_v49, %v3203_v30 }
 0x51d   : > { %v3146_v12 = vadd.s32 536870912, %v3145_v48  ;;  %v3208_v36 = vshll.u32 %v7249_v56, %v3202_v33  ;;  %v3211_v17 = vshll.u32 %v7250_v49, %v3202_v33  ;;  %v3212_v45 = vshrl.u32 %v7243_v44, %v3203_v30  ;;  %v6776_v11 = vpop.eup %4379 }
 0x51e   : > { %v3215_v24 = vshrl.u32 %v7318_v37, %v3203_v30  ;;  %v3201_v13 = vshrl.u32 %v3200_v9, 5  ;;  %v3214_v41 = vshll.u32 %v7243_v44, %v3202_v33  ;;  %v6781_v10 = vshll.u32 %v3196_v29, 8 }
 0x51f   : > { %v6778_v3 = vshrl.u32 %v3146_v12, 30  ;;  %v3207_v15 = vor.u32 %v3206_v57, %v3205_v6  ;;  %v3210_v32 = vor.u32 %v3209_v58, %v3208_v36  ;;  %v3213_v34 = vor.u32 %v3212_v45, %v3211_v17  ;;  %v6785_v56 = vpop.eup %4381 }
 0x520   : > { %v6783_v21 = vand.u32 3, %v2659_v25  ;;  %v3216_v62 = vor.u32 %v3215_v24, %v3214_v41  ;;  %v3217_v51 = vshll.u32 %v7318_v37, %v3202_v33  ;;  %v3218_v39 = vshrl.u32 %v7319_v46, %v3203_v30 }
 0x521   : > { %v3148_v49 = vshll.u32 %v6778_v3, 30  ;;  %v3054_v9 = vsub.s32 32, %v6745_v28  ;;  %v3055_v44 = vshll.u32 %v6712_v27, %v6745_v28  ;;  %v3059_v60 = vadd.s32 127, %v3058_v5 }
 0x522   : > { %v3204_v40 = vshrl.u32 %v7248_v14, %v3203_v30  ;;  %v3219_v25 = vor.u32 %v3218_v39, %v3217_v51  ;;  %vm3220_vm7 = vcmp.lt.s32.totalorder %v3201_v13, 1  ;;  %vm3223_vm9 = vcmp.lt.s32.totalorder %v3201_v13, 4 }
 0x523   : > { %v6794_v29 = vsub.s32 %v3145_v48, %v3148_v49  ;;  %v6796_v12 = vpop.eup %4383  ;;  %vm3222_vm4 = vcmp.lt.s32.totalorder %v3201_v13, 3  ;;  %v3225_v37 = vsel %vm3223_vm9, %v3213_v34, 2102212464  ;;  %v3228_v33 = vsel %vm3220_vm7, %v3207_v15, %v3210_v32 }
 0x524   : > { %v3224_v6 = vsel %vm3220_vm7, %v3204_v40, %v3207_v15  ;;  %v3226_v57 = vsel %vm3222_vm4, %v3210_v32, %v3225_v37  ;;  %v3229_v58 = vsel %vm3223_vm9, %v3216_v62, 920167782  ;;  %v3232_v36 = vsel %vm3220_vm7, %v3210_v32, %v3213_v34 }
 0x525   : > { %v3151_v46 = vsub.s32 0, %v6794_v29  ;;  %v3056_v27 = vshrl.u32 %v3038_v63, %v3054_v9  ;;  %vm3221_vm13 = vcmp.lt.s32.totalorder %v3201_v13, 2  ;;  %v3230_v28 = vsel %vm3222_vm4, %v3213_v34, %v3229_v58 }
 0x526   : > { %v3233_v14 = vsel %vm3223_vm9, %v3219_v25, 1326507024  ;;  %v3060_v48 = vshll.u32 %v3059_v60, 23  ;;  %v3231_v5 = vsel %vm3221_vm13, %v3228_v33, %v3230_v28  ;;  %v3227_v45 = vsel %vm3221_vm13, %v3224_v6, %v3226_v57 }
 0x527   : > { %v3972_v30 = vmin.u32 %v3151_v46, %v6794_v29  ;;  %v3234_v17 = vsel %vm3222_vm4, %v3216_v62, %v3233_v14  ;;  %v6801_v41 = vmul.u32.u64.low %v6781_v10, %v3231_v5  ;;  %v6802_v49 = vmul.u32.u64.high %v6781_v10, %v3231_v5, %v6801_v41 }
 0x528   : > { %v3235_v24 = vsel %vm3221_vm13, %v3232_v36, %v3234_v17  ;;  %4385 = vsinq.f32 %v6684_v31  ;;  %v2959_v32 = vand.u32 2147483647, %v6764_v38  ;;  %v2961_v34 = vcvt.s32.f32 %v6762_v1 }
 0x529   : > { %v3153_v15 = vclz %v3972_v30  ;;  %v6807_v63 = vmul.u32.u64.low %v6781_v10, %v3235_v24  ;;  %v6808_v13 = vmul.u32.u64.high %v6781_v10, %v3235_v24, %v6807_v63  ;;  %v6812_v51 = vor.u32 %v3056_v27, %v3055_v44 }
 0x52a   : > { %v2666_v62 = vxor.u32 2147483648, %v6718_v61  ;;  %v3061_v39 = vor.u32 4788187, %v3060_v48  ;;  %v3243_v60 = vmul.u32 %v6781_v10, %v3227_v45  ;;  %vm2662_vm8 = vweird.f32 %v6266_v23 }
 0x52b   : > { %v3973_v9 = vadd.s32 4294967294, %v3153_v15  ;;  %v2669_v31 = vxor.u32 2147483648, %v6715_v59  ;;  %v3246_v40 = vadd.s32 1, %v6802_v49  ;;  %vm2665_vm14 = vcmp.eq.s32.totalorder %v6783_v21, 0 }
 0x52c   : > { %vm2668_vm10 = vcmp.eq.s32.totalorder %v6783_v21, 2  ;;  %v2862_v25 = vsub.s32 4, %v6518_v8  ;;  %vm3245_vm2 = vc.u32 %v6808_v13, %v6801_v41  ;;  %v2667_v44 = vsel %vm2665_vm14, %v6715_v59, %v2666_v62 }
 0x52d   : > { %vm3974_vm3 = vcmp.lt.s32.totalorder %v3973_v9, 0  ;;  %v2670_v10 = vsel %vm2668_vm10, %v2669_v31, %v6718_v61  ;;  %v3141_v6 = vadd.s32 %v6727_v54, %v6735_v35  ;;  %v3247_v33 = vsel %vm3245_vm2, %v3246_v40, %v6802_v49 }
 0x52e   : > { %v3156_v37 = vsel %vm3974_vm3, 0, %v3973_v9  ;;  %v2863_v46 = vsel %vm2778_vm5, %v2862_v25, %v6518_v8  ;;  %v3248_v36 = vadd.s32 %v3247_v33, %v3243_v60  ;;  %vm2664_vm15 = vcmp.lt.s32.totalorder %v6783_v21, 2 }
 0x52f   : > { %v3157_v57 = vsub.s32 32, %v3156_v37  ;;  %v3161_v58 = vsub.s32 4294967266, %v3156_v37  ;;  %v3062_v27 = vand.u32 2147483647, %v3061_v39  ;;  %v3064_v59 = vcvt.s32.f32 %v6812_v51 }
 0x530   : > { %v2671_v28 = vsel %vm2664_vm15, %v2667_v44, %v2670_v10  ;;  %v2865_v61 = vsel %vm6672_vm11, 0, %v2863_v46  ;;  %v3249_v35 = vadd.s32 536870912, %v3248_v36  ;;  %v2872_v48 = vxor.u32 2147483648, %v6796_v12 }
 0x531   : > { %v3162_v54 = vadd.s32 127, %v3161_v58  ;;  %v2869_v14 = vand.u32 3, %v2865_v61  ;;  %v3159_v30 = vshrl.u32 %v3141_v6, %v3157_v57  ;;  %v2875_v8 = vxor.u32 2147483648, %v6785_v56 }
 0x532   : > { %v7329_v5 = vsel %vm6485_vm0, 0, %v6651_v0  ;;  %v2563_v17 = vxor.u32 2147483648, %v6705_v53  ;;  %v4386_v45 = vpop.eup %4385  ;;  %v3158_v24 = vshll.u32 %v6794_v29, %v3156_v37  ;;  %v6844_v49 = vshrl.u32 %v3249_v35, 30 }
 0x533   : > { %v2560_v21 = vand.u32 3, %v7329_v5  ;;  %v3163_v43 = vshll.u32 %v3162_v54, 23  ;;  %vm2868_vm5 = vweird.f32 %v6286_v55  ;;  %v2672_v15 = vsel %vm2662_vm8, nan, %v2671_v28 }
 0x534   : > { %vm2871_vm11 = vcmp.eq.s32.totalorder %v2869_v14, 0  ;;  %vm2874_vm1 = vcmp.eq.s32.totalorder %v2869_v14, 2  ;;  %v2566_v16 = vxor.u32 2147483648, %v6539_v42  ;;  %v3251_v0 = vshll.u32 %v6844_v49, 30 }
 0x535   : > { %v3164_v63 = vor.u32 4788187, %v3163_v43  ;;  %v2873_v51 = vsel %vm2871_vm11, %v6785_v56, %v2872_v48  ;;  %vm2562_vm0 = vcmp.eq.s32.totalorder %v2560_v21, 0  ;;  %v3160_v62 = vor.u32 %v3159_v30, %v3158_v24 }
 0x536   : > { %vm2870_vm7 = vcmp.lt.s32.totalorder %v2869_v14, 2  ;;  %v2876_v29 = vsel %vm2874_vm1, %v2875_v8, %v6796_v12  ;;  %v2564_v39 = vsel %vm2562_vm0, %v6539_v42, %v2563_v17  ;;  %v3252_v60 = vsub.s32 %v3248_v36, %v3251_v0 }
 0x537   : > { %v3165_v9 = vand.u32 2147483647, %v3164_v63  ;;  %v2877_v23 = vsel %vm2870_vm7, %v2873_v51, %v2876_v29  ;;  %vm2565_vm9 = vcmp.eq.s32.totalorder %v2560_v21, 2  ;;  %v2766_v56 = vand.u32 3, %v2762_v50 }
 0x538   : > { %v2878_v31 = vsel %vm2868_vm5, nan, %v2877_v23  ;;  %v2567_v40 = vsel %vm2565_vm9, %v2566_v16, %v6705_v53  ;;  %v2769_v25 = vxor.u32 2147483648, %v4386_v45  ;;  %v2962_v42 = vmul.f32 %v2961_v34, %v2959_v32 }
 0x539   : > { %v3065_v12 = vmul.f32 %v3064_v59, %v3062_v27  ;;  %v3254_v44 = vsub.s32 0, %v3252_v60  ;;  %v4105_v10 = vpack.c.bf16 %v2878_v31, %v2672_v15  ;;  %v3167_v6 = vcvt.s32.f32 %v3160_v62 }
 0x53a   : > { %vm2561_vm4 = vcmp.lt.s32.totalorder %v2560_v21, 2  ;;  %vm2768_vm13 = vcmp.eq.s32.totalorder %v2766_v56, 0  ;;  %v2772_v55 = vxor.u32 2147483648, %v6776_v11  ;;  %vm2771_vm6 = vcmp.eq.s32.totalorder %v2766_v56, 2 }
 0x53b   : > { %v3976_v53 = vmin.u32 %v3254_v44, %v3252_v60  ;;  %4106 = vmatprep.subr.bf16.mxu1 %v4105_v10  ;;  %v2568_v18 = vsel %vm2561_vm4, %v2564_v39, %v2567_v40  ;;  %v2770_v47 = vsel %vm2768_vm13, %v6776_v11, %v2769_v25  ;;  %v3168_v50 = vmul.f32 %v3167_v6, %v3165_v9 }
 0x53c   : > { %vm2767_vm8 = vcmp.lt.s32.totalorder %v2766_v56, 2  ;;  %v2773_v38 = vsel %vm2771_vm6, %v2772_v55, %v4386_v45  ;;  %vm2559_vm14 = vweird.f32 %v6264_v52  ;;  %vm2765_vm10 = vweird.f32 %v6274_v2 }
 0x53d   : > { %v3256_v37 = vclz %v3976_v53  ;;  %v2774_v1 = vsel %vm2767_vm8, %v2770_v47, %v2773_v38  ;;  %v2963_v32 = vxor.u32 2147483648, %v2962_v42  ;;  %v2569_v34 = vsel %vm2559_vm14, nan, %v2568_v18 }
 0x53e   : > { %v2775_v33 = vsel %vm2765_vm10, nan, %v2774_v1  ;;  %v3066_v46 = vxor.u32 2147483648, %v3065_v12  ;;  %v3169_v36 = vxor.u32 2147483648, %v3168_v50  ;;  %vm2881_vm3 = vcmp.lt.s32.totalorder %v6428_v26, 0 }
 0x53f   : > { %v3977_v57 = vadd.s32 4294967294, %v3256_v37  ;;  %v4107_v58 = vpack.c.bf16 %v2775_v33, %v2569_v34  ;;  %v2964_v11 = vsel %vm2881_vm3, %v2963_v32, %v2962_v42  ;;  %vm2984_vm15 = vcmp.lt.s32.totalorder %v6431_v19, 0 }
 0x540   : > { %vm3087_vm5 = vcmp.lt.s32.totalorder %v6506_v7, 0  ;;  %v3067_v2 = vsel %vm2984_vm15, %v3066_v46, %v3065_v12  ;;  %v3244_v27 = vadd.s32 %v6801_v41, %v6808_v13  ;;  %v7330_v61 = vand.u32 2147483647, %v6428_v26 }
 0x541   : > { %vm3978_vm2 = vcmp.lt.s32.totalorder %v3977_v57, 0  ;;  %4108 = vmatpush1.bf16.msra.mxu1 %v4107_v58  ;;  %v7333_v35 = vand.u32 2147483647, %v6431_v19  ;;  %v3170_v48 = vsel %vm3087_vm5, %v3169_v36, %v3168_v50  ;;  %v7336_v21 = vand.u32 2147483647, %v6506_v7 }
 0x542   : > { %v3259_v52 = vsel %vm3978_vm2, 0, %v3977_v57  ;;  %vm6880_vm11 = vcmp.le.f32.partialorder %v7330_v61, 0.7853982  ;;  %v3171_v0 = vsub.s32 4, %v6778_v3  ;;  %v3068_v62 = vsub.s32 4, %v6696_v4 }
 0x543   : > { %v3260_v59 = vsub.s32 32, %v3259_v52  ;;  %v3264_v28 = vsub.s32 4294967266, %v3259_v52  ;;  %vm6886_vm1 = vcmp.le.f32.partialorder %v7333_v35, 0.7853982  ;;  %v2967_v41 = vsel %vm6880_vm11, %v6428_v26, %v2964_v11 }
 0x544   : > { %v3261_v13 = vshll.u32 %v3252_v60, %v3259_v52  ;;  %v3070_v5 = vsel %vm6886_vm1, %v6431_v19, %v3067_v2  ;;  %vm6900_vm0 = vcmp.le.f32.partialorder %v7336_v21, 0.7853982  ;;  %4387 = vcosq.f32 %v2967_v41 }
 0x545   : > { %v3262_v30 = vshrl.u32 %v3244_v27, %v3260_v59  ;;  %v3265_v8 = vadd.s32 127, %v3264_v28  ;;  %v3173_v45 = vsel %vm6900_vm0, %v6506_v7, %v3170_v48  ;;  %4389 = vcosq.f32 %v3070_v5 }
 0x546   : > { %4391 = vcosq.f32 %v3173_v45  ;;  %v2965_v29 = vsub.s32 4, %v6576_v22  ;;  %vm3190_vm7 = vcmp.lt.s32.totalorder %v6642_v20, 0  ;;  %v3172_v9 = vsel %vm3087_vm5, %v3171_v0, %v6778_v3  ;;  %v3303_v0 = vpop.permute.xlu1 %3302 }
 0x547   : > { %v3263_v24 = vor.u32 %v3262_v30, %v3261_v13  ;;  %v3266_v43 = vshll.u32 %v3265_v8, 23  ;;  %4393 = vsinq.f32 %v3173_v45  ;;  %v7339_v60 = vand.u32 2147483647, %v6642_v20 }
 0x548   : > { %4395 = vsinq.f32 %v3070_v5  ;;  %v3274_v40 = vsub.s32 4, %v6844_v49  ;;  %v3069_v3 = vsel %vm2984_vm15, %v3068_v62, %v6696_v4  ;;  %v2966_v12 = vsel %vm2881_vm3, %v2965_v29, %v6576_v22 }
 0x549   : > { %v3267_v15 = vor.u32 4788187, %v3266_v43  ;;  %v3270_v63 = vcvt.s32.f32 %v3263_v24  ;;  %4397 = vsinq.f32 %v2967_v41  ;;  %vm6916_vm9 = vcmp.le.f32.partialorder %v7339_v60, 0.7853982  ;;  %v3291_v43 = vld [vmem:[%s7167_s5] sm:$0xff] }
 0x54a   : > { %v3174_v10 = vsel %vm6900_vm0, 0, %v3172_v9  ;;  %v3071_v55 = vsel %vm6886_vm1, 0, %v3069_v3  ;;  %v3275_v53 = vsel %vm3190_vm7, %v3274_v40, %v6844_v49  ;;  %v2968_v18 = vsel %vm6880_vm11, 0, %v2966_v12 }
 0x54b   : > { %v3268_v16 = vand.u32 2147483647, %v3267_v15  ;;  %v3178_v22 = vand.u32 3, %v3174_v10  ;;  %v3075_v50 = vand.u32 3, %v3071_v55  ;;  %v3277_v38 = vsel %vm6916_vm9, 0, %v3275_v53 }
 0x54c   : > { %v2972_v33 = vand.u32 3, %v2968_v18  ;;  %v3281_v58 = vand.u32 3, %v3277_v38  ;;  %vm3177_vm0 = vweird.f32 %v6506_v7  ;;  %v3292_v7 = vld [vmem:[%s7167_s5 + $0x8] sm:$0xff] }
 0x54d   : > { %v3271_v51 = vmul.f32 %v3270_v63, %v3268_v16  ;;  %vm3180_vm4 = vcmp.eq.s32.totalorder %v3178_v22, 0  ;;  %vm3183_vm13 = vcmp.eq.s32.totalorder %v3178_v22, 2  ;;  %vm3077_vm6 = vcmp.eq.s32.totalorder %v3075_v50, 0 }
 0x54e   : > { %v4388_v56 = vpop.eup %4387  ;;  %vm3080_vm8 = vcmp.eq.s32.totalorder %v3075_v50, 2  ;;  %vm2974_vm14 = vcmp.eq.s32.totalorder %v2972_v33, 0  ;;  %vm2977_vm10 = vcmp.eq.s32.totalorder %v2972_v33, 2  ;;  %vm3179_vm3 = vcmp.lt.s32.totalorder %v3178_v22, 2 }
 0x54f   : > { %v3272_v39 = vxor.u32 2147483648, %v3271_v51  ;;  %v4390_v42 = vpop.eup %4389  ;;  %v2978_v57 = vxor.u32 2147483648, %v4388_v56  ;;  %vm3076_vm2 = vcmp.lt.s32.totalorder %v3075_v50, 2  ;;  %vm3286_vm15 = vcmp.eq.s32.totalorder %v3281_v58, 2 }
 0x550   : > { %v4392_v44 = vpop.eup %4391  ;;  %v3081_v34 = vxor.u32 2147483648, %v4390_v42  ;;  %vm3283_vm5 = vcmp.eq.s32.totalorder %v3281_v58, 0  ;;  %vm2973_vm11 = vcmp.lt.s32.totalorder %v2972_v33, 2  ;;  %vm3282_vm1 = vcmp.lt.s32.totalorder %v3281_v58, 2 }
 0x551   : > { %v3273_v31 = vsel %vm3190_vm7, %v3272_v39, %v3271_v51  ;;  %v4394_v6 = vpop.eup %4393  ;;  %v3184_v1 = vxor.u32 2147483648, %v4392_v44  ;;  %vm3074_vm7 = vweird.f32 %v6431_v19  ;;  %v7342_v19 = vmov 0.0  }
 0x552   : > { %v3276_v25 = vsel %vm6916_vm9, %v6642_v20, %v3273_v31  ;;  %v4396_v4 = vpop.eup %4395  ;;  %v3181_v37 = vxor.u32 2147483648, %v4394_v6  ;;  %vm3280_vm9 = vweird.f32 %v6642_v20 }
 0x553   : > { %4399 = vcosq.f32 %v3276_v25  ;;  %v4398_v47 = vpop.eup %4397  ;;  %v3078_v32 = vxor.u32 2147483648, %v4396_v4  ;;  %v3185_v36 = vsel %vm3183_vm13, %v3184_v1, %v4394_v6  ;;  %v3082_v2 = vsel %vm3080_vm8, %v3081_v34, %v4396_v4 }
 0x554   : > { %4401 = vsinq.f32 %v3276_v25  ;;  %v2975_v46 = vxor.u32 2147483648, %v4398_v47  ;;  %v3182_v49 = vsel %vm3180_vm4, %v4392_v44, %v3181_v37  ;;  %v2979_v61 = vsel %vm2977_vm10, %v2978_v57, %v4398_v47 }
 0x555   : > { %v3079_v52 = vsel %vm3077_vm6, %v4390_v42, %v3078_v32  ;;  %v3186_v35 = vsel %vm3179_vm3, %v3182_v49, %v3185_v36  ;;  %vm2971_vm4 = vweird.f32 %v6428_v26  ;;  %v3298_v26 = vpop.permute.xlu0 %3297  ;;  %vm3452_vm13 = vcmask 130048  }
 0x556   : > { %v2976_v28 = vsel %vm2974_vm14, %v4388_v56, %v2975_v46  ;;  %v3083_v14 = vsel %vm3076_vm2, %v3079_v52, %v3082_v2  ;;  %v3187_v8 = vsel %vm3177_vm0, nan, %v3186_v35 }
 0x557   : > { %v2980_v13 = vsel %vm2973_vm11, %v2976_v28, %v2979_v61  ;;  %v3084_v5 = vsel %vm3074_vm7, nan, %v3083_v14 }
 0x558   : > { %v2981_v45 = vsel %vm2971_vm4, nan, %v2980_v13 }
 0x559   : > { %v4111_v24 = vpack.c.bf16 %v3187_v8, %v2981_v45 }
 0x55d   : > { %v4400_v11 = vpop.eup %4399 }
 0x55e   : > { %v4402_v27 = vpop.eup %4401  ;;  %v3287_v59 = vxor.u32 2147483648, %v4400_v11 }
 0x55f   : > { %v3284_v54 = vxor.u32 2147483648, %v4402_v27 }
 0x560   : > { %v3288_v48 = vsel %vm3286_vm15, %v3287_v59, %v4402_v27 }
 0x561   : > { %v3285_v41 = vsel %vm3283_vm5, %v4400_v11, %v3284_v54 }
 0x562   : > { %v3289_v30 = vsel %vm3282_vm1, %v3285_v41, %v3288_v48 }
 0x563   : > { %v3290_v21 = vsel %vm3280_vm9, nan, %v3289_v30 }
 0x564   : > { %v4109_v17 = vpack.c.bf16 %v3290_v21, %v3084_v5 }
 0x566   : > { %4110 = vmatprep.subr.bf16.mxu1 %v4109_v17 }
 0x567   : > { %4112 = vmatpush1.bf16.msra.mxu1 %v4111_v24 }
 0x56a   : > { %3979 = vmatmul.mubr.msk.f32.vlgmr.msra.gmra.mrb[16].mxu1 %vm1410_vm12, %v3291_v43 }
 0x56b   : > { %3381 = vmatprep.mubr.f32.mxu1 %v7342_v19 }
 0x56e   : > { %3980 = vmatmul.mubr.msk.f32.gmra.mrb[18].mxu1 %vm1410_vm12, %v3292_v7 }
 0x63d   : > { %v3377_v20 = vpop.f32.mrb[16].mxu1 }
 0x63e   : > { %v3378_v15 = vadd.f32 %v3377_v20, %v3298_v26  ;;  %v3379_v16 = vpop.f32.mrb[17].mxu1 }
 0x63f   : > { %v3380_v63 = vadd.f32 %v3379_v16, %v3298_v26 }
 0x640   : > { %3388 = vxpose.xlu0.b32.start [1/2] (short) %v3378_v15, 128 }
 0x641   : > { %v3383_v51 = vpop.f32.mrb[18].mxu1  ;;  %3420 = vxpose.xlu1.b32.start [1/2] (short) %v3380_v63, 128 }
 0x642   : > { %v3384_v62 = vadd.f32 %v3383_v51, %v3303_v0  ;;  %v3385_v29 = vpop.f32.mrb[19].mxu1 }
 0x643   : > { %v3386_v39 = vadd.f32 %v3385_v29, %v3303_v0 }
 0x644   : > { %3389 = vxpose.xlu0.b32.end [2/2] (short) %v3384_v62, 128 }
 0x645   : > { %3421 = vxpose.xlu1.b32.end [2/2] (short) %v3386_v39, 128 }
 0x6c0   : > { %v3404_v9 = vpop.trf.xlu0 }
 0x6c1   : > { %v3436_v60 = vpop.trf.xlu1  ;;  %3453 = vst.msk [vmem:[%s6957_s11] sm:$0xff] %vm3452_vm13, %v3404_v9 }
 0x6c2   : > { %3469 = vst.msk [vmem:[%s6957_s11 + $0x80] sm:$0xff] %vm3452_vm13, %v3436_v60 }
 0x6c4   : > { %v3405_v23 = vpop.trf.xlu0 }
 0x6c5   : > { %v3437_v31 = vpop.trf.xlu1  ;;  %3454 = vst.msk [vmem:[%s6957_s11 + $0x8] sm:$0xff] %vm3452_vm13, %v3405_v23 }
 0x6c6   : > { %3470 = vst.msk [vmem:[%s6957_s11 + $0x88] sm:$0xff] %vm3452_vm13, %v3437_v31 }
 0x6c8   : > { %v3406_v40 = vpop.trf.xlu0 }
 0x6c9   : > { %v3438_v56 = vpop.trf.xlu1  ;;  %3455 = vst.msk [vmem:[%s6957_s11 + $0x10] sm:$0xff] %vm3452_vm13, %v3406_v40 }
 0x6ca   : > { %3471 = vst.msk [vmem:[%s6957_s11 + $0x90] sm:$0xff] %vm3452_vm13, %v3438_v56 }
 0x6cc   : > { %v3407_v25 = vpop.trf.xlu0 }
 0x6cd   : > { %v3439_v3 = vpop.trf.xlu1  ;;  %3456 = vst.msk [vmem:[%s6957_s11 + $0x18] sm:$0xff] %vm3452_vm13, %v3407_v25 }
 0x6ce   : > { %3472 = vst.msk [vmem:[%s6957_s11 + $0x98] sm:$0xff] %vm3452_vm13, %v3439_v3 }
 0x6d0   : > { %v3408_v42 = vpop.trf.xlu0 }
 0x6d1   : > { %v3440_v12 = vpop.trf.xlu1  ;;  %3457 = vst.msk [vmem:[%s6957_s11 + $0x20] sm:$0xff] %vm3452_vm13, %v3408_v42 }
 0x6d2   : > { %3473 = vst.msk [vmem:[%s6957_s11 + $0xa0] sm:$0xff] %vm3452_vm13, %v3440_v12 }
 0x6d4   : > { %v3409_v44 = vpop.trf.xlu0 }
 0x6d5   : > { %v3441_v10 = vpop.trf.xlu1  ;;  %3458 = vst.msk [vmem:[%s6957_s11 + $0x28] sm:$0xff] %vm3452_vm13, %v3409_v44 }
 0x6d6   : > { %3474 = vst.msk [vmem:[%s6957_s11 + $0xa8] sm:$0xff] %vm3452_vm13, %v3441_v10 }
 0x6d8   : > { %v3410_v6 = vpop.trf.xlu0 }
 0x6d9   : > { %v3442_v55 = vpop.trf.xlu1  ;;  %3459 = vst.msk [vmem:[%s6957_s11 + $0x30] sm:$0xff] %vm3452_vm13, %v3410_v6 }
 0x6da   : > { %3475 = vst.msk [vmem:[%s6957_s11 + $0xb0] sm:$0xff] %vm3452_vm13, %v3442_v55 }
 0x6dc   : > { %v3411_v53 = vpop.trf.xlu0 }
 0x6dd   : > { %v3443_v4 = vpop.trf.xlu1  ;;  %3460 = vst.msk [vmem:[%s6957_s11 + $0x38] sm:$0xff] %vm3452_vm13, %v3411_v53 }
 0x6de   : > { %3476 = vst.msk [vmem:[%s6957_s11 + $0xb8] sm:$0xff] %vm3452_vm13, %v3443_v4 }
 0x6e0   : > { %v3412_v18 = vpop.trf.xlu0 }
 0x6e1   : > { %v3444_v47 = vpop.trf.xlu1  ;;  %3461 = vst.msk [vmem:[%s6957_s11 + $0x40] sm:$0xff] %vm3452_vm13, %v3412_v18 }
 0x6e2   : > { %3477 = vst.msk [vmem:[%s6957_s11 + $0xc0] sm:$0xff] %vm3452_vm13, %v3444_v47 }
 0x6e4   : > { %v3413_v22 = vpop.trf.xlu0 }
 0x6e5   : > { %v3445_v50 = vpop.trf.xlu1  ;;  %3462 = vst.msk [vmem:[%s6957_s11 + $0x48] sm:$0xff] %vm3452_vm13, %v3413_v22 }
 0x6e6   : > { %3478 = vst.msk [vmem:[%s6957_s11 + $0xc8] sm:$0xff] %vm3452_vm13, %v3445_v50 }
 0x6e8   : > { %v3414_v38 = vpop.trf.xlu0 }
 0x6e9   : > { %v3446_v37 = vpop.trf.xlu1  ;;  %3463 = vst.msk [vmem:[%s6957_s11 + $0x50] sm:$0xff] %vm3452_vm13, %v3414_v38 }
 0x6ea   : > { %3479 = vst.msk [vmem:[%s6957_s11 + $0xd0] sm:$0xff] %vm3452_vm13, %v3446_v37 }
 0x6ec   : > { %v3415_v1 = vpop.trf.xlu0 }
 0x6ed   : > { %v3447_v32 = vpop.trf.xlu1  ;;  %3464 = vst.msk [vmem:[%s6957_s11 + $0x58] sm:$0xff] %vm3452_vm13, %v3415_v1 }
 0x6ee   : > { %3480 = vst.msk [vmem:[%s6957_s11 + $0xd8] sm:$0xff] %vm3452_vm13, %v3447_v32 }
 0x6f0   : > { %v3416_v34 = vpop.trf.xlu0 }
 0x6f1   : > { %v3448_v33 = vpop.trf.xlu1  ;;  %3465 = vst.msk [vmem:[%s6957_s11 + $0x60] sm:$0xff] %vm3452_vm13, %v3416_v34 }
 0x6f2   : > { %3481 = vst.msk [vmem:[%s6957_s11 + $0xe0] sm:$0xff] %vm3452_vm13, %v3448_v33 }
 0x6f4   : > { %v3417_v46 = vpop.trf.xlu0 }
 0x6f5   : > { %v3449_v57 = vpop.trf.xlu1  ;;  %3466 = vst.msk [vmem:[%s6957_s11 + $0x68] sm:$0xff] %vm3452_vm13, %v3417_v46 }
 0x6f6   : > { %3482 = vst.msk [vmem:[%s6957_s11 + $0xe8] sm:$0xff] %vm3452_vm13, %v3449_v57 }
 0x6f8   : > { %v3418_v58 = vpop.trf.xlu0  ;;  %3491 = sbr.rel (!%p4564_p4) target bundleno = 1847 (0x737), region = 52 }
 0x6f9   : > { %v3450_v49 = vpop.trf.xlu1  ;;  %3467 = vst.msk [vmem:[%s6957_s11 + $0x70] sm:$0xff] %vm3452_vm13, %v3418_v58 }
 0x6fa   : > { %3483 = vst.msk [vmem:[%s6957_s11 + $0xf0] sm:$0xff] %vm3452_vm13, %v3450_v49 }
 0x6fc   : > { %v3419_v36 = vpop.trf.xlu0 }
 0x6fd   : > { %v3451_v11 = vpop.trf.xlu1  ;;  %3468 = vst.msk [vmem:[%s6957_s11 + $0x78] sm:$0xff] %vm3452_vm13, %v3419_v36 }
 0x6fe   : > { %3484 = vst.msk [vmem:[%s6957_s11 + $0xf8] sm:$0xff] %vm3452_vm13, %v3451_v11 }
 0x6ff   : > { %s7352_s24 = smov (!%p3494_p8, %s3493_s24), 32 }
 0x700   : > { %s3983_s16 = sshll.u32 %s7352_s24, 7 }
 0x701   : > { %p3986_p9 = scmp.eq.s32.totalorder %s3983_s16, 0 }
 0x702   : > { %s7036_s17 = sshrl.u32 (!%p3986_p9), %s7352_s24, 5 }
 0x703   : > { %3502 = sbr.rel (%p3986_p9) target bundleno = 1847 (0x737), region = 56  ;;  %p3987_p10 = scmp.le.s32.totalorder (!%p3986_p9), %s7036_s17, 0 }
 0x70a   : > { %3780 = sbr.rel (%p3987_p10) target bundleno = 1826 (0x722), region = 134  ;;  %s7343_s27 = smov (!%p3987_p10), %s7030_s15 }
 0x70b   : > { %s7344_s9 = smov (!%p3987_p10), %s6957_s11  ;;  %s7045_s10 = smov (!%p3987_p10), 0  }
 0x70c   : > { %s7047_s18 = smov (!%p3987_p10), 0  }
 0x711 LB: >> { %v3626_v52 = vld [vmem:[%s4465_s9] sm:$0xff]  ;;  %v3628_v2 = vld [vmem:[%s4465_s9 + $0x8] sm:$0xff]  ;;  %v3630_v27 = vld [vmem:[%s4465_s9 + $0x10] sm:$0xff]  ;;  %s3690_s29 = sadd.s32 1, %s4469_s10  ;;  %s3620_s18 = sadd.s32 1, %s4473_s18   ;;  %s4473_s18 = sphi %s7047_s18, %s3620_s18   ;;  %s4469_s10 = sphi %s7045_s10, %s7347_s10   ;;  %s4465_s9 = sphi %s7344_s9, %s7346_s9   ;;  %s4461_s27 = sphi %s7343_s27, %s7345_s27  }
 0x712   : >> { %3627 = vst [vmem:[%s4461_s27] sm:$0xff] %v3626_v52  ;;  %3629 = vst [vmem:[%s4461_s27 + $0x8] sm:$0xff] %v3628_v2  ;;  %v3632_v59 = vld [vmem:[%s4465_s9 + $0x18] sm:$0xff]  ;;  %v3634_v28 = vld [vmem:[%s4465_s9 + $0x20] sm:$0xff]  ;;  %p3691_p11 = scmp.ge.s32.totalorder %s3690_s29, %s7036_s17  ;;  %p3619_p12 = scmp.ge.s32.totalorder %s3620_s18, %s7036_s17 }
 0x713   : >> { %3631 = vst [vmem:[%s4461_s27 + $0x10] sm:$0xff] %v3630_v27  ;;  %v3636_v61 = vld [vmem:[%s4465_s9 + $0x28] sm:$0xff]  ;;  %3633 = vst [vmem:[%s4461_s27 + $0x18] sm:$0xff] %v3632_v59  ;;  %v3638_v54 = vld [vmem:[%s4465_s9 + $0x30] sm:$0xff] }
 0x714   : >> { %3635 = vst [vmem:[%s4461_s27 + $0x20] sm:$0xff] %v3634_v28  ;;  %3637 = vst [vmem:[%s4461_s27 + $0x28] sm:$0xff] %v3636_v61  ;;  %v3640_v35 = vld [vmem:[%s4465_s9 + $0x38] sm:$0xff]  ;;  %v3642_v14 = vld [vmem:[%s4465_s9 + $0x40] sm:$0xff]  ;;  %s7354_s29 = smov (%p3691_p11, %s3690_s29), 0 }
 0x715   : >> { %3639 = vst [vmem:[%s4461_s27 + $0x30] sm:$0xff] %v3638_v54  ;;  %3641 = vst [vmem:[%s4461_s27 + $0x38] sm:$0xff] %v3640_v35  ;;  %v3644_v48 = vld [vmem:[%s4465_s9 + $0x48] sm:$0xff]  ;;  %v3646_v41 = vld [vmem:[%s4465_s9 + $0x50] sm:$0xff]  ;;  %s3988_s19 = sshll.u32 %s7354_s29, 8  ;;  %s7347_s10 = smov %s7354_s29 }
 0x716   : >> { %3643 = vst [vmem:[%s4461_s27 + $0x40] sm:$0xff] %v3642_v14  ;;  %v3648_v13 = vld [vmem:[%s4465_s9 + $0x58] sm:$0xff]  ;;  %3645 = vst [vmem:[%s4461_s27 + $0x48] sm:$0xff] %v3644_v48  ;;  %v3650_v30 = vld [vmem:[%s4465_s9 + $0x60] sm:$0xff]  ;;  %s7103_s20 = scalar_lea.vmem %s6957_s11, %s3988_s19 [#allocation2]   ;;  %s3696_s21 = scalar_lea.vmem %s7030_s15, %s3988_s19  }
 0x717   : >> { %3647 = vst [vmem:[%s4461_s27 + $0x50] sm:$0xff] %v3646_v41  ;;  %3649 = vst [vmem:[%s4461_s27 + $0x58] sm:$0xff] %v3648_v13  ;;  %v3652_v8 = vld [vmem:[%s4465_s9 + $0x68] sm:$0xff]  ;;  %v3654_v5 = vld [vmem:[%s4465_s9 + $0x70] sm:$0xff] }
 0x718   : >> { %3651 = vst [vmem:[%s4461_s27 + $0x60] sm:$0xff] %v3650_v30  ;;  %3653 = vst [vmem:[%s4461_s27 + $0x68] sm:$0xff] %v3652_v8  ;;  %v3656_v21 = vld [vmem:[%s4465_s9 + $0x78] sm:$0xff]  ;;  %v3658_v17 = vld [vmem:[%s4465_s9 + $0x80] sm:$0xff] }
 0x719   : >> { %3655 = vst [vmem:[%s4461_s27 + $0x70] sm:$0xff] %v3654_v5  ;;  %v3660_v45 = vld [vmem:[%s4465_s9 + $0x88] sm:$0xff]  ;;  %3657 = vst [vmem:[%s4461_s27 + $0x78] sm:$0xff] %v3656_v21  ;;  %v3662_v24 = vld [vmem:[%s4465_s9 + $0x90] sm:$0xff] }
 0x71a   : >> { %3659 = vst [vmem:[%s4461_s27 + $0x80] sm:$0xff] %v3658_v17  ;;  %3661 = vst [vmem:[%s4461_s27 + $0x88] sm:$0xff] %v3660_v45  ;;  %v3664_v43 = vld [vmem:[%s4465_s9 + $0x98] sm:$0xff]  ;;  %v3666_v19 = vld [vmem:[%s4465_s9 + $0xa0] sm:$0xff] }
 0x71b   : >> { %3663 = vst [vmem:[%s4461_s27 + $0x90] sm:$0xff] %v3662_v24  ;;  %3665 = vst [vmem:[%s4461_s27 + $0x98] sm:$0xff] %v3664_v43  ;;  %v3668_v7 = vld [vmem:[%s4465_s9 + $0xa8] sm:$0xff]  ;;  %v3670_v26 = vld [vmem:[%s4465_s9 + $0xb0] sm:$0xff]  ;;  %3622 = sbr.rel (!%p3619_p12) target bundleno = 1809 (0x711), region = 140 }
 0x71c   : >> { %3667 = vst [vmem:[%s4461_s27 + $0xa0] sm:$0xff] %v3666_v19  ;;  %v3672_v20 = vld [vmem:[%s4465_s9 + $0xb8] sm:$0xff]  ;;  %3669 = vst [vmem:[%s4461_s27 + $0xa8] sm:$0xff] %v3668_v7  ;;  %v3674_v15 = vld [vmem:[%s4465_s9 + $0xc0] sm:$0xff] }
 0x71d   : >> { %3671 = vst [vmem:[%s4461_s27 + $0xb0] sm:$0xff] %v3670_v26  ;;  %3673 = vst [vmem:[%s4461_s27 + $0xb8] sm:$0xff] %v3672_v20  ;;  %v3676_v16 = vld [vmem:[%s4465_s9 + $0xc8] sm:$0xff]  ;;  %v3678_v63 = vld [vmem:[%s4465_s9 + $0xd0] sm:$0xff] }
 0x71e   : >> { %3675 = vst [vmem:[%s4461_s27 + $0xc0] sm:$0xff] %v3674_v15  ;;  %3677 = vst [vmem:[%s4461_s27 + $0xc8] sm:$0xff] %v3676_v16  ;;  %v3680_v0 = vld [vmem:[%s4465_s9 + $0xd8] sm:$0xff]  ;;  %v3682_v51 = vld [vmem:[%s4465_s9 + $0xe0] sm:$0xff] }
 0x71f   : >> { %3679 = vst [vmem:[%s4461_s27 + $0xd0] sm:$0xff] %v3678_v63  ;;  %v3684_v62 = vld [vmem:[%s4465_s9 + $0xe8] sm:$0xff]  ;;  %3681 = vst [vmem:[%s4461_s27 + $0xd8] sm:$0xff] %v3680_v0  ;;  %v3686_v29 = vld [vmem:[%s4465_s9 + $0xf0] sm:$0xff] }
 0x720   : >> { %3683 = vst [vmem:[%s4461_s27 + $0xe0] sm:$0xff] %v3682_v51  ;;  %3685 = vst [vmem:[%s4461_s27 + $0xe8] sm:$0xff] %v3684_v62  ;;  %v3688_v39 = vld [vmem:[%s4465_s9 + $0xf8] sm:$0xff]  ;;  %s7346_s9 = smov %s7103_s20 }
 0x721   : >> { %3687 = vst [vmem:[%s4461_s27 + $0xf0] sm:$0xff] %v3686_v29  ;;  %3689 = vst [vmem:[%s4461_s27 + $0xf8] sm:$0xff] %v3688_v39  ;;  %s7345_s27 = smov %s3696_s21 }
 0x722 PF: > { %s7144_s22 = sand.u32 31, %s7352_s24   ;;  %s3999_s23 = sshll.u32 %s7036_s17, 8 }
 0x723   : > { %s3701_s26 = scalar_lea.vmem %s6957_s11, %s3999_s23 [#allocation2]   ;;  %s3703_s30 = scalar_lea.vmem %s7030_s15, %s3999_s23  }
 0x724   : > { %p3993_p13 = scmp.le.s32.totalorder %s7144_s22, 0 }
 0x725   : > { %s4475_s12 = smov (!%p3993_p13), %s3703_s30   ;;  %s4479_s13 = smov (!%p3993_p13), %s3701_s26  }
 0x726   : > { %3794 = sbr.rel (%p3993_p13) target bundleno = 1847 (0x737), region = 145  ;;  %s4483_s14 = smov (!%p3993_p13), 0  }
 0x727   : > { %s4487_s16 = smov (!%p3993_p13), 0  }
 0x72d LB: >> { %v3713_v9 = vld [vmem:[%s4481_s13] sm:$0xff]  ;;  %s3715_s24 = sadd.s32 1, %s4485_s14  ;;  %s3707_s16 = sadd.s32 1, %s4489_s16   ;;  %s4489_s16 = sphi %s4487_s16, %s3707_s16   ;;  %s4485_s14 = sphi %s4483_s14, %s4484_s14   ;;  %s4481_s13 = sphi %s4479_s13, %s3720_s13   ;;  %s4477_s12 = sphi %s4475_s12, %s3721_s12  }
 0x72e   : >> { %3714 = vst [vmem:[%s4477_s12] sm:$0xff] %v3713_v9  ;;  %p3716_p0 = scmp.ge.s32.totalorder %s3715_s24, %s7144_s22  ;;  %p3706_p1 = scmp.ge.s32.totalorder %s3707_s16, %s7144_s22 }
 0x730   : >> { %s7356_s24 = smov (%p3716_p0, %s3715_s24), 0  ;;  %3709 = sbr.rel (!%p3706_p1) target bundleno = 1837 (0x72d), region = 151 }
 0x731   : >> { %s3994_s11 = sshll.u32 %s7356_s24, 3  ;;  %s4484_s14 = smov %s7356_s24  }
 0x732   : >> { %s3720_s13 = scalar_lea.vmem %s3701_s26, %s3994_s11 [#allocation2]   ;;  %s3721_s12 = scalar_lea.vmem %s3703_s30, %s3994_s11  }
 0x737 PF: > { %p14_p2 = scmp.ge.s32.totalorder %s4554_s28, 4   ;;  %s7348_s24 = smov %s4453_s25 }
 0x738   : > { %s7349_s25 = smov %s4562_s8  ;;  %s7350_s26 = smov %s4554_s28 }
 0x739   :  { %16 = sbr.rel (!%p14_p2) target bundleno = 2 (0x2), region = 162 }

</bundles_post_ra>
